<compile_context>
chip_gen: v6e
topology: v6e:2x2x1
jax: 0.10.0
libtpu: 0.0.40
codegen_flags: <defaults>
</compile_context>

<pallas_src>
import functools

import numpy as np
import jax
import jax.numpy as jnp
from jax.experimental import pallas as pl
from jax.experimental.pallas import tpu as pltpu


# Tap index t = kh*3 + kw, spatial offset (dh, dw) = (kh-1, kw-1).
_TAPS = tuple((kh - 1, kw - 1) for kh in range(3) for kw in range(3))

# tanh-GELU runs on the EUP (free VLIW slot); exact erf GELU is a VALU
# polynomial.  Difference is < 3e-4 absolute -- well inside the self-check.
_USE_TANH_GELU = True


# ----------------------------------------------------------------------------
# Fused kernel: `imgs_per_step` batch images per grid step, packed into lanes.
# ----------------------------------------------------------------------------
def _my_block_kernel(x_ref, mask_ref, w1_ref, w2_ref, w3_ref, wf_ref,
                     bias_ref, cw1_ref, cb1_ref, cw2_ref, cb2_ref, o_ref,
                     *, H, W, imgs_per_step):
    HW = H * W
    BHW = imgs_per_step * HW
    f32 = jnp.float32
    bf16 = jnp.bfloat16

    x = x_ref[0].astype(f32)                      # (C, B*HW)
    C = x.shape[0]
    masks = mask_ref[...]                         # (9, B*HW) f32 border masks
    biases = bias_ref[...]                        # (C, 4)    f32 folded biases

    def stacked_taps(slab):
        """(C, B*HW) f32 -> (9C, B*HW) bf16; tap t occupies rows [t*C,(t+1)*C).

        A tap is a lane rotation of the flattened slab (XLU) times a 0/1 border
        mask (SAME zero padding).  Cross-image wraparound of the circular roll
        only hits masked lanes, so packing B images per slab stays exact.
        """
        parts = []
        for t in range(9):
            dh, dw = _TAPS[t]
            d = dh * W + dw
            if d == 0:                            # center tap: no roll, no mask
                s = slab
            else:
                s = pltpu.roll(slab, shift=(-d) % BHW, axis=1) * masks[t:t + 1, :]
            parts.append(s.astype(bf16))
        return jnp.concatenate(parts, axis=0)     # (9C, B*HW) bf16

    def gelu(v):
        return jax.nn.gelu(v, approximate=_USE_TANH_GELU)

    def branch(slab, w_ref, bias_col):
        """One whole branch = a single (C,9C)@(9C,B*HW) bf16 MXU matmul."""
        pre = jnp.dot(w_ref[...], stacked_taps(slab), preferred_element_type=f32)
        return gelu(pre + biases[:, bias_col:bias_col + 1])

    x1 = branch(x, w1_ref, 0)                     # conv3x3 + GELU
    x2 = branch(x1, w2_ref, 1)                    # folded dw3x3 -> 1x1, + GELU
    x3 = branch(x2, w3_ref, 2)                    # folded grouped3x3 -> 1x1, + GELU

    # Fusion 1x1 over concat([x1,x2,x3]): one (C,3C)@(3C,B*HW) matmul.
    cat = jnp.concatenate([x1, x2, x3], axis=0).astype(bf16)   # (3C, B*HW)
    bag1 = (jnp.dot(wf_ref[...], cat, preferred_element_type=f32)
            + biases[:, 3:4])                                   # (C, B*HW)

    # CCA (avg-pool squeeze/excite) + residual, per image (segmented pooling).
    cw1 = cw1_ref[...]                            # (C, Cr)
    cb1 = cb1_ref[...]                            # (1, Cr)
    cw2 = cw2_ref[...]                            # (C, Cr)
    cb2 = cb2_ref[...]                            # (C, 1)
    inv_hw = 1.0 / HW
    segs = []
    for b in range(imgs_per_step):                # static, unrolled at trace
        sl = slice(b * HW, (b + 1) * HW)
        bag_b = bag1[:, sl]                                       # (C, HW)
        pooled = jnp.sum(bag_b, axis=1, keepdims=True) * inv_hw   # (C, 1)
        z = jnp.maximum(
            jnp.sum(cw1 * pooled, axis=0, keepdims=True) + cb1, 0.0)   # (1, Cr)
        att = jax.nn.sigmoid(
            jnp.sum(cw2 * z, axis=1, keepdims=True) + cb2)             # (C, 1)
        segs.append(x[:, sl] + bag_b * att)
    o_ref[0] = jnp.concatenate(segs, axis=1).astype(o_ref.dtype)


# ----------------------------------------------------------------------------
# Host-side constants / weight folding
# ----------------------------------------------------------------------------
def _tap_masks(H, W):
    """(9, H*W) f32; 1 where the tap's source pixel lies inside the image."""
    masks = np.zeros((9, H * W), np.float32)
    for t, (dh, dw) in enumerate(_TAPS):
        m = np.zeros((H, W), np.float32)
        h0, h1 = max(0, -dh), min(H, H - dh)
        w0, w1 = max(0, -dw), min(W, W - dw)
        m[h0:h1, w0:w1] = 1.0
        masks[t] = m.reshape(-1)
    return masks


def _grouped_dense(w, C):
    """(C, 2, 3, 3) grouped conv (groups=C//2) -> dense per-tap (9, C, C)."""
    g = np.zeros((9, C, C), np.float32)
    for c in range(C):
        base = (c // 2) * 2
        for t in range(9):
            kh, kw = t // 3, t % 3
            g[t, c, base] = w[c, 0, kh, kw]
            g[t, c, base + 1] = w[c, 1, kh, kw]
    return g


def init_params(key, n_feats=16, reduction=16):
    """Deterministic synthetic weights in PyTorch (OIHW) layouts."""
    C = n_feats
    Cr = max(C // reduction, 1)
    ks = jax.random.split(key, 16)
    rnd = lambda k, s: jax.random.normal(k, s, jnp.float32) * 0.05
    p = {}
    p["b1_w"] = rnd(ks[0], (C, C, 3, 3));        p["b1_b"] = rnd(ks[1], (C,))
    p["b2_dw_w"] = rnd(ks[2], (C, 1, 3, 3));     p["b2_dw_b"] = rnd(ks[3], (C,))
    p["b2_pw_w"] = rnd(ks[4], (C, C, 1, 1));     p["b2_pw_b"] = rnd(ks[5], (C,))
    p["b3_gw_w"] = rnd(ks[6], (C, 2, 3, 3));     p["b3_gw_b"] = rnd(ks[7], (C,))
    p["b3_pw_w"] = rnd(ks[8], (C, C, 1, 1));     p["b3_pw_b"] = rnd(ks[9], (C,))
    p["fus_w"] = rnd(ks[10], (C, 3 * C, 1, 1));  p["fus_b"] = rnd(ks[11], (C,))
    p["cca_w1"] = rnd(ks[12], (Cr, C, 1, 1));    p["cca_b1"] = rnd(ks[13], (Cr,))
    p["cca_w2"] = rnd(ks[14], (C, Cr, 1, 1));    p["cca_b2"] = rnd(ks[15], (C,))
    return p


def pack_params(p, H, W, imgs_per_step=2):
    """Fold + pack PyTorch-layout params into kernel-friendly layouts."""
    C = p["b1_b"].shape[0]

    def stack_taps(w_taps):   # (9, Cout, Cin) -> (Cout, 9*Cin), t-major columns
        return jnp.transpose(w_taps, (1, 0, 2)).reshape(C, 9 * C)

    # branch1: dense 3x3, per-tap (C, C)
    w1_taps = jnp.transpose(p["b1_w"], (2, 3, 0, 1)).reshape(9, C, C)

    # branch2: fold dw3x3 + 1x1:  W2eff[t] = Wpw2 @ diag(Wdw[t])
    wdw = jnp.transpose(p["b2_dw_w"][:, 0], (1, 2, 0)).reshape(9, C)   # (9, C)
    wpw2 = p["b2_pw_w"][:, :, 0, 0]                                    # (C, C)
    w2_taps = wpw2[None, :, :] * wdw[:, None, :]                       # (9, C, C)
    b2_eff = wpw2 @ p["b2_dw_b"] + p["b2_pw_b"]

    # branch3: fold grouped3x3 (groups=C//2) + 1x1:  W3eff[t] = Wpw3 @ G3[t]
    g3 = jnp.asarray(_grouped_dense(np.asarray(p["b3_gw_w"]), C))      # (9, C, C)
    wpw3 = p["b3_pw_w"][:, :, 0, 0]
    w3_taps = jnp.einsum("oc,tci->toi", wpw3, g3)
    b3_eff = wpw3 @ p["b3_gw_b"] + p["b3_pw_b"]

    masks = np.tile(_tap_masks(H, W), (1, imgs_per_step))              # (9, B*HW)

    kp = {
        "masks": jnp.asarray(masks),                                   # (9, B*HW)
        "w1s": stack_taps(w1_taps).astype(jnp.bfloat16),               # (C, 9C)
        "w2s": stack_taps(w2_taps).astype(jnp.bfloat16),               # (C, 9C)
        "w3s": stack_taps(w3_taps).astype(jnp.bfloat16),               # (C, 9C)
        "wfs": p["fus_w"][:, :, 0, 0].astype(jnp.bfloat16),            # (C, 3C)
        "biases": jnp.stack([p["b1_b"], b2_eff, b3_eff, p["fus_b"]],
                            axis=1).astype(jnp.float32),               # (C, 4)
        "cw1": p["cca_w1"][:, :, 0, 0].T,                              # (C, Cr)
        "cb1": p["cca_b1"][None, :],                                   # (1, Cr)
        "cw2": p["cca_w2"][:, :, 0, 0],                                # (C, Cr)
        "cb2": p["cca_b2"][:, None],                                   # (C, 1)
    }
    return kp


# ----------------------------------------------------------------------------
# Forward (single fused pallas_call), NCHW in / NCHW out
# ----------------------------------------------------------------------------
@jax.jit
def my_block_forward(x_nchw, kp):
    N, C, H, W = x_nchw.shape
    HW = H * W
    BHW = kp["masks"].shape[-1]
    B = BHW // HW                        # images packed per grid step
    if N % B != 0:
        raise ValueError(f"batch {N} not divisible by imgs_per_step {B}")
    G = N // B
    Cr = kp["cw1"].shape[1]

    # (N,C,H,W) -> (G, C, B*HW): pack B consecutive images into the lane axis.
    x_packed = (x_nchw.reshape(G, B, C, HW)
                .transpose(0, 2, 1, 3)
                .reshape(G, C, BHW))

    kern = functools.partial(_my_block_kernel, H=H, W=W, imgs_per_step=B)
    out = pl.pallas_call(
        kern,
        out_shape=jax.ShapeDtypeStruct((G, C, BHW), x_nchw.dtype),
        grid=(G,),
        in_specs=[
            pl.BlockSpec((1, C, BHW), lambda g: (g, 0, 0)),   # packed input
            pl.BlockSpec((9, BHW), lambda g: (0, 0)),         # tap border masks
            pl.BlockSpec((C, 9 * C), lambda g: (0, 0)),       # branch1 stacked W
            pl.BlockSpec((C, 9 * C), lambda g: (0, 0)),       # branch2 folded W
            pl.BlockSpec((C, 9 * C), lambda g: (0, 0)),       # branch3 folded W
            pl.BlockSpec((C, 3 * C), lambda g: (0, 0)),       # fusion W
            pl.BlockSpec((C, 4), lambda g: (0, 0)),           # folded biases
            pl.BlockSpec((C, Cr), lambda g: (0, 0)),          # cca w1^T
            pl.BlockSpec((1, Cr), lambda g: (0, 0)),          # cca b1
            pl.BlockSpec((C, Cr), lambda g: (0, 0)),          # cca w2
            pl.BlockSpec((C, 1), lambda g: (0, 0)),           # cca b2
        ],
        out_specs=pl.BlockSpec((1, C, BHW), lambda g: (g, 0, 0)),
        compiler_params=pltpu.CompilerParams(
            dimension_semantics=("parallel",)),               # 2 TCs on v7x
    )(x_packed, kp["masks"], kp["w1s"], kp["w2s"], kp["w3s"], kp["wfs"],
      kp["biases"], kp["cw1"], kp["cb1"], kp["cw2"], kp["cb2"])

    # (G, C, B*HW) -> (N, C, H, W)
    return (out.reshape(G, C, B, HW)
            .transpose(0, 2, 1, 3)
            .reshape(N, C, H, W))


# ----------------------------------------------------------------------------
# Pure-JAX reference (PyTorch semantics, f32, exact GELU) for a self-check
# ----------------------------------------------------------------------------
def _conv_ref(x, w, b, groups=1):
    p = w.shape[-1] // 2
    out = jax.lax.conv_general_dilated(
        x, w, window_strides=(1, 1), padding=((p, p), (p, p)),
        dimension_numbers=("NCHW", "OIHW", "NCHW"),
        feature_group_count=groups, precision=jax.lax.Precision.HIGHEST)
    return out + b[None, :, None, None]


def my_block_reference(x, p):
    C = x.shape[1]
    gelu = lambda v: jax.nn.gelu(v, approximate=False)        # PyTorch exact GELU
    x1 = gelu(_conv_ref(x, p["b1_w"], p["b1_b"]))
    x2 = gelu(_conv_ref(_conv_ref(x1, p["b2_dw_w"], p["b2_dw_b"], groups=C),
                        p["b2_pw_w"], p["b2_pw_b"]))
    x3 = gelu(_conv_ref(_conv_ref(x2, p["b3_gw_w"], p["b3_gw_b"], groups=C // 2),
                        p["b3_pw_w"], p["b3_pw_b"]))
    bag1 = _conv_ref(jnp.concatenate([x1, x2, x3], axis=1),
                     p["fus_w"], p["fus_b"])
    y = jnp.mean(bag1, axis=(2, 3), keepdims=True)
    y = jnp.maximum(_conv_ref(y, p["cca_w1"], p["cca_b1"]), 0.0)
    y = jax.nn.sigmoid(_conv_ref(y, p["cca_w2"], p["cca_b2"]))
    return x + bag1 * y


if __name__ == "__main__":
    key = jax.random.PRNGKey(0)
    k_x, k_p = jax.random.split(key)

    N, C, H, W = 4, 16, 16, 16
    IMGS_PER_STEP = 2          # grid = (2,): divisible by 2 for v7x's 2 TCs
    x = jax.random.normal(k_x, (N, C, H, W), jnp.float32)     # NCHW
    params = init_params(k_p, n_feats=C, reduction=16)
    kparams = pack_params(params, H, W, imgs_per_step=IMGS_PER_STEP)

    y = my_block_forward(x, kparams)
    jax.block_until_ready(y)
    assert y.shape == (N, C, H, W)

    # Self-check vs the pure-JAX f32/exact-GELU reference.  Tolerance covers
    # bf16 matmul operands + tanh GELU (both << 2e-2 at these weight scales).
    y_ref = my_block_reference(x, params)
    err = float(jnp.max(jnp.abs(y - y_ref)))
    assert err < 2e-2, f"max abs err vs reference: {err}"

    print("KERNEL_OK")
</pallas_src>

<mosaic_0001>
module attributes {stable_mosaic.version = 11 : i64} {
  func.func @_my_block_kernel(%arg0: i32, %arg1: memref<1x16x512xf32, #tpu.memory_space<vmem>>, %arg2: memref<9x512xf32, #tpu.memory_space<vmem>>, %arg3: memref<16x144xbf16, #tpu.memory_space<vmem>>, %arg4: memref<16x144xbf16, #tpu.memory_space<vmem>>, %arg5: memref<16x144xbf16, #tpu.memory_space<vmem>>, %arg6: memref<16x48xbf16, #tpu.memory_space<vmem>>, %arg7: memref<16x4xf32, #tpu.memory_space<vmem>>, %arg8: memref<16x1xf32, #tpu.memory_space<vmem>>, %arg9: memref<1x1xf32, #tpu.memory_space<vmem>>, %arg10: memref<16x1xf32, #tpu.memory_space<vmem>>, %arg11: memref<16x1xf32, #tpu.memory_space<vmem>>, %arg12: memref<1x16x512xf32, #tpu.memory_space<vmem>>) attributes {dimension_semantics = [#tpu.dimension_semantics<parallel>], iteration_bounds = array<i64: 2>, scalar_prefetch = 0 : i64, scratch_operands = 0 : i64, tpu.core_type = #tpu.core_type<tc>, window_params = [{transform_indices = @transform_0, window_bounds = array<i64: 1, 16, 512>}, {pipeline_mode = #tpu.pipeline_mode<synchronous>, transform_indices = @transform_1, window_bounds = array<i64: 9, 512>}, {pipeline_mode = #tpu.pipeline_mode<synchronous>, transform_indices = @transform_2, window_bounds = array<i64: 16, 144>}, {pipeline_mode = #tpu.pipeline_mode<synchronous>, transform_indices = @transform_3, window_bounds = array<i64: 16, 144>}, {pipeline_mode = #tpu.pipeline_mode<synchronous>, transform_indices = @transform_4, window_bounds = array<i64: 16, 144>}, {pipeline_mode = #tpu.pipeline_mode<synchronous>, transform_indices = @transform_5, window_bounds = array<i64: 16, 48>}, {pipeline_mode = #tpu.pipeline_mode<synchronous>, transform_indices = @transform_6, window_bounds = array<i64: 16, 4>}, {pipeline_mode = #tpu.pipeline_mode<synchronous>, transform_indices = @transform_7, window_bounds = array<i64: 16, 1>}, {pipeline_mode = #tpu.pipeline_mode<synchronous>, transform_indices = @transform_8, window_bounds = array<i64: 1, 1>}, {pipeline_mode = #tpu.pipeline_mode<synchronous>, transform_indices = @transform_9, window_bounds = array<i64: 16, 1>}, {pipeline_mode = #tpu.pipeline_mode<synchronous>, transform_indices = @transform_10, window_bounds = array<i64: 16, 1>}, {transform_indices = @transform_11, window_bounds = array<i64: 1, 16, 512>}]} {
    %c0 = arith.constant 0 : index
    %c0_0 = arith.constant 0 : index
    %c0_1 = arith.constant 0 : index
    %0 = vector.load %arg1[%c0, %c0_0, %c0_1] : memref<1x16x512xf32, #tpu.memory_space<vmem>>, vector<1x16x512xf32>
    %1 = vector.shape_cast %0 : vector<1x16x512xf32> to vector<16x512xf32>
    %c0_2 = arith.constant 0 : index
    %c0_3 = arith.constant 0 : index
    %2 = vector.load %arg2[%c0_2, %c0_3] : memref<9x512xf32, #tpu.memory_space<vmem>>, vector<9x512xf32>
    %c0_4 = arith.constant 0 : index
    %c0_5 = arith.constant 0 : index
    %3 = vector.load %arg7[%c0_4, %c0_5] : memref<16x4xf32, #tpu.memory_space<vmem>>, vector<16x4xf32>
    %c0_6 = arith.constant 0 : index
    %c0_7 = arith.constant 0 : index
    %4 = vector.load %arg3[%c0_6, %c0_7] : memref<16x144xbf16, #tpu.memory_space<vmem>>, vector<16x144xbf16>
    %c17_i32 = arith.constant 17 : i32
    %5 = tpu.dynamic_rotate %1 by %c17_i32 dim 1 : vector<16x512xf32>, i32 -> vector<16x512xf32>
    %6 = vector.extract_strided_slice %2 {offsets = [0, 0], sizes = [1, 512], strides = [1, 1]} : vector<9x512xf32> to vector<1x512xf32>
    %7 = vector.broadcast %6 : vector<1x512xf32> to vector<16x512xf32>
    %8 = arith.mulf %5, %7 : vector<16x512xf32>
    %9 = arith.truncf %8 : vector<16x512xf32> to vector<16x512xbf16>
    %c16_i32 = arith.constant 16 : i32
    %10 = tpu.dynamic_rotate %1 by %c16_i32 dim 1 : vector<16x512xf32>, i32 -> vector<16x512xf32>
    %11 = vector.extract_strided_slice %2 {offsets = [1, 0], sizes = [1, 512], strides = [1, 1]} : vector<9x512xf32> to vector<1x512xf32>
    %12 = vector.broadcast %11 : vector<1x512xf32> to vector<16x512xf32>
    %13 = arith.mulf %10, %12 : vector<16x512xf32>
    %14 = arith.truncf %13 : vector<16x512xf32> to vector<16x512xbf16>
    %c15_i32 = arith.constant 15 : i32
    %15 = tpu.dynamic_rotate %1 by %c15_i32 dim 1 : vector<16x512xf32>, i32 -> vector<16x512xf32>
    %16 = vector.extract_strided_slice %2 {offsets = [2, 0], sizes = [1, 512], strides = [1, 1]} : vector<9x512xf32> to vector<1x512xf32>
    %17 = vector.broadcast %16 : vector<1x512xf32> to vector<16x512xf32>
    %18 = arith.mulf %15, %17 : vector<16x512xf32>
    %19 = arith.truncf %18 : vector<16x512xf32> to vector<16x512xbf16>
    %c1_i32 = arith.constant 1 : i32
    %20 = tpu.dynamic_rotate %1 by %c1_i32 dim 1 : vector<16x512xf32>, i32 -> vector<16x512xf32>
    %21 = vector.extract_strided_slice %2 {offsets = [3, 0], sizes = [1, 512], strides = [1, 1]} : vector<9x512xf32> to vector<1x512xf32>
    %22 = vector.broadcast %21 : vector<1x512xf32> to vector<16x512xf32>
    %23 = arith.mulf %20, %22 : vector<16x512xf32>
    %24 = arith.truncf %23 : vector<16x512xf32> to vector<16x512xbf16>
    %25 = arith.truncf %1 : vector<16x512xf32> to vector<16x512xbf16>
    %c511_i32 = arith.constant 511 : i32
    %26 = tpu.dynamic_rotate %1 by %c511_i32 dim 1 : vector<16x512xf32>, i32 -> vector<16x512xf32>
    %27 = vector.extract_strided_slice %2 {offsets = [5, 0], sizes = [1, 512], strides = [1, 1]} : vector<9x512xf32> to vector<1x512xf32>
    %28 = vector.broadcast %27 : vector<1x512xf32> to vector<16x512xf32>
    %29 = arith.mulf %26, %28 : vector<16x512xf32>
    %30 = arith.truncf %29 : vector<16x512xf32> to vector<16x512xbf16>
    %c497_i32 = arith.constant 497 : i32
    %31 = tpu.dynamic_rotate %1 by %c497_i32 dim 1 : vector<16x512xf32>, i32 -> vector<16x512xf32>
    %32 = vector.extract_strided_slice %2 {offsets = [6, 0], sizes = [1, 512], strides = [1, 1]} : vector<9x512xf32> to vector<1x512xf32>
    %33 = vector.broadcast %32 : vector<1x512xf32> to vector<16x512xf32>
    %34 = arith.mulf %31, %33 : vector<16x512xf32>
    %35 = arith.truncf %34 : vector<16x512xf32> to vector<16x512xbf16>
    %c496_i32 = arith.constant 496 : i32
    %36 = tpu.dynamic_rotate %1 by %c496_i32 dim 1 : vector<16x512xf32>, i32 -> vector<16x512xf32>
    %37 = vector.extract_strided_slice %2 {offsets = [7, 0], sizes = [1, 512], strides = [1, 1]} : vector<9x512xf32> to vector<1x512xf32>
    %38 = vector.broadcast %37 : vector<1x512xf32> to vector<16x512xf32>
    %39 = arith.mulf %36, %38 : vector<16x512xf32>
    %40 = arith.truncf %39 : vector<16x512xf32> to vector<16x512xbf16>
    %c495_i32 = arith.constant 495 : i32
    %41 = tpu.dynamic_rotate %1 by %c495_i32 dim 1 : vector<16x512xf32>, i32 -> vector<16x512xf32>
    %42 = vector.extract_strided_slice %2 {offsets = [8, 0], sizes = [1, 512], strides = [1, 1]} : vector<9x512xf32> to vector<1x512xf32>
    %43 = vector.broadcast %42 : vector<1x512xf32> to vector<16x512xf32>
    %44 = arith.mulf %41, %43 : vector<16x512xf32>
    %45 = arith.truncf %44 : vector<16x512xf32> to vector<16x512xbf16>
    %46 = tpu.concatenate %9, %14, %19, %24, %25, %30, %35, %40, %45 in 0 : vector<16x512xbf16>, vector<16x512xbf16>, vector<16x512xbf16>, vector<16x512xbf16>, vector<16x512xbf16>, vector<16x512xbf16>, vector<16x512xbf16>, vector<16x512xbf16>, vector<16x512xbf16> -> vector<144x512xbf16>
    %cst = arith.constant dense<0.000000e+00> : vector<16x512xf32>
    %47 = tpu.matmul %4, %46, %cst {dimension_numbers = #tpu.dot_dimension_numbers<[1], [0], [0], [1], [0, 0, 1, 1], [], []>} : vector<16x144xbf16>, vector<144x512xbf16>, vector<16x512xf32> -> vector<16x512xf32>
    %48 = vector.extract_strided_slice %3 {offsets = [0, 0], sizes = [16, 1], strides = [1, 1]} : vector<16x4xf32> to vector<16x1xf32>
    %49 = vector.broadcast %48 : vector<16x1xf32> to vector<16x512xf32>
    %50 = arith.addf %47, %49 : vector<16x512xf32>
    %51 = arith.mulf %50, %50 : vector<16x512xf32>
    %52 = arith.mulf %50, %51 : vector<16x512xf32>
    %cst_8 = arith.constant 4.471500e-02 : f32
    %53 = vector.broadcast %cst_8 : f32 to vector<16x512xf32>
    %54 = arith.mulf %53, %52 : vector<16x512xf32>
    %55 = arith.addf %50, %54 : vector<16x512xf32>
    %cst_9 = arith.constant 0.797884583 : f32
    %56 = vector.broadcast %cst_9 : f32 to vector<16x512xf32>
    %57 = arith.mulf %56, %55 : vector<16x512xf32>
    %58 = math.tanh %57 : vector<16x512xf32>
    %cst_10 = arith.constant 1.000000e+00 : f32
    %59 = vector.broadcast %cst_10 : f32 to vector<16x512xf32>
    %60 = arith.addf %59, %58 : vector<16x512xf32>
    %cst_11 = arith.constant 5.000000e-01 : f32
    %61 = vector.broadcast %cst_11 : f32 to vector<16x512xf32>
    %62 = arith.mulf %61, %60 : vector<16x512xf32>
    %63 = arith.mulf %50, %62 : vector<16x512xf32>
    %c0_12 = arith.constant 0 : index
    %c0_13 = arith.constant 0 : index
    %64 = vector.load %arg4[%c0_12, %c0_13] : memref<16x144xbf16, #tpu.memory_space<vmem>>, vector<16x144xbf16>
    %c17_i32_14 = arith.constant 17 : i32
    %65 = tpu.dynamic_rotate %63 by %c17_i32_14 dim 1 : vector<16x512xf32>, i32 -> vector<16x512xf32>
    %66 = vector.extract_strided_slice %2 {offsets = [0, 0], sizes = [1, 512], strides = [1, 1]} : vector<9x512xf32> to vector<1x512xf32>
    %67 = vector.broadcast %66 : vector<1x512xf32> to vector<16x512xf32>
    %68 = arith.mulf %65, %67 : vector<16x512xf32>
    %69 = arith.truncf %68 : vector<16x512xf32> to vector<16x512xbf16>
    %c16_i32_15 = arith.constant 16 : i32
    %70 = tpu.dynamic_rotate %63 by %c16_i32_15 dim 1 : vector<16x512xf32>, i32 -> vector<16x512xf32>
    %71 = vector.extract_strided_slice %2 {offsets = [1, 0], sizes = [1, 512], strides = [1, 1]} : vector<9x512xf32> to vector<1x512xf32>
    %72 = vector.broadcast %71 : vector<1x512xf32> to vector<16x512xf32>
    %73 = arith.mulf %70, %72 : vector<16x512xf32>
    %74 = arith.truncf %73 : vector<16x512xf32> to vector<16x512xbf16>
    %c15_i32_16 = arith.constant 15 : i32
    %75 = tpu.dynamic_rotate %63 by %c15_i32_16 dim 1 : vector<16x512xf32>, i32 -> vector<16x512xf32>
    %76 = vector.extract_strided_slice %2 {offsets = [2, 0], sizes = [1, 512], strides = [1, 1]} : vector<9x512xf32> to vector<1x512xf32>
    %77 = vector.broadcast %76 : vector<1x512xf32> to vector<16x512xf32>
    %78 = arith.mulf %75, %77 : vector<16x512xf32>
    %79 = arith.truncf %78 : vector<16x512xf32> to vector<16x512xbf16>
    %c1_i32_17 = arith.constant 1 : i32
    %80 = tpu.dynamic_rotate %63 by %c1_i32_17 dim 1 : vector<16x512xf32>, i32 -> vector<16x512xf32>
    %81 = vector.extract_strided_slice %2 {offsets = [3, 0], sizes = [1, 512], strides = [1, 1]} : vector<9x512xf32> to vector<1x512xf32>
    %82 = vector.broadcast %81 : vector<1x512xf32> to vector<16x512xf32>
    %83 = arith.mulf %80, %82 : vector<16x512xf32>
    %84 = arith.truncf %83 : vector<16x512xf32> to vector<16x512xbf16>
    %85 = arith.truncf %63 : vector<16x512xf32> to vector<16x512xbf16>
    %c511_i32_18 = arith.constant 511 : i32
    %86 = tpu.dynamic_rotate %63 by %c511_i32_18 dim 1 : vector<16x512xf32>, i32 -> vector<16x512xf32>
    %87 = vector.extract_strided_slice %2 {offsets = [5, 0], sizes = [1, 512], strides = [1, 1]} : vector<9x512xf32> to vector<1x512xf32>
    %88 = vector.broadcast %87 : vector<1x512xf32> to vector<16x512xf32>
    %89 = arith.mulf %86, %88 : vector<16x512xf32>
    %90 = arith.truncf %89 : vector<16x512xf32> to vector<16x512xbf16>
    %c497_i32_19 = arith.constant 497 : i32
    %91 = tpu.dynamic_rotate %63 by %c497_i32_19 dim 1 : vector<16x512xf32>, i32 -> vector<16x512xf32>
    %92 = vector.extract_strided_slice %2 {offsets = [6, 0], sizes = [1, 512], strides = [1, 1]} : vector<9x512xf32> to vector<1x512xf32>
    %93 = vector.broadcast %92 : vector<1x512xf32> to vector<16x512xf32>
    %94 = arith.mulf %91, %93 : vector<16x512xf32>
    %95 = arith.truncf %94 : vector<16x512xf32> to vector<16x512xbf16>
    %c496_i32_20 = arith.constant 496 : i32
    %96 = tpu.dynamic_rotate %63 by %c496_i32_20 dim 1 : vector<16x512xf32>, i32 -> vector<16x512xf32>
    %97 = vector.extract_strided_slice %2 {offsets = [7, 0], sizes = [1, 512], strides = [1, 1]} : vector<9x512xf32> to vector<1x512xf32>
    %98 = vector.broadcast %97 : vector<1x512xf32> to vector<16x512xf32>
    %99 = arith.mulf %96, %98 : vector<16x512xf32>
    %100 = arith.truncf %99 : vector<16x512xf32> to vector<16x512xbf16>
    %c495_i32_21 = arith.constant 495 : i32
    %101 = tpu.dynamic_rotate %63 by %c495_i32_21 dim 1 : vector<16x512xf32>, i32 -> vector<16x512xf32>
    %102 = vector.extract_strided_slice %2 {offsets = [8, 0], sizes = [1, 512], strides = [1, 1]} : vector<9x512xf32> to vector<1x512xf32>
    %103 = vector.broadcast %102 : vector<1x512xf32> to vector<16x512xf32>
    %104 = arith.mulf %101, %103 : vector<16x512xf32>
    %105 = arith.truncf %104 : vector<16x512xf32> to vector<16x512xbf16>
    %106 = tpu.concatenate %69, %74, %79, %84, %85, %90, %95, %100, %105 in 0 : vector<16x512xbf16>, vector<16x512xbf16>, vector<16x512xbf16>, vector<16x512xbf16>, vector<16x512xbf16>, vector<16x512xbf16>, vector<16x512xbf16>, vector<16x512xbf16>, vector<16x512xbf16> -> vector<144x512xbf16>
    %cst_22 = arith.constant dense<0.000000e+00> : vector<16x512xf32>
    %107 = tpu.matmul %64, %106, %cst_22 {dimension_numbers = #tpu.dot_dimension_numbers<[1], [0], [0], [1], [0, 0, 1, 1], [], []>} : vector<16x144xbf16>, vector<144x512xbf16>, vector<16x512xf32> -> vector<16x512xf32>
    %108 = vector.extract_strided_slice %3 {offsets = [0, 1], sizes = [16, 1], strides = [1, 1]} : vector<16x4xf32> to vector<16x1xf32>
    %109 = vector.broadcast %108 : vector<16x1xf32> to vector<16x512xf32>
    %110 = arith.addf %107, %109 : vector<16x512xf32>
    %111 = arith.mulf %110, %110 : vector<16x512xf32>
    %112 = arith.mulf %110, %111 : vector<16x512xf32>
    %cst_23 = arith.constant 4.471500e-02 : f32
    %113 = vector.broadcast %cst_23 : f32 to vector<16x512xf32>
    %114 = arith.mulf %113, %112 : vector<16x512xf32>
    %115 = arith.addf %110, %114 : vector<16x512xf32>
    %cst_24 = arith.constant 0.797884583 : f32
    %116 = vector.broadcast %cst_24 : f32 to vector<16x512xf32>
    %117 = arith.mulf %116, %115 : vector<16x512xf32>
    %118 = math.tanh %117 : vector<16x512xf32>
    %cst_25 = arith.constant 1.000000e+00 : f32
    %119 = vector.broadcast %cst_25 : f32 to vector<16x512xf32>
    %120 = arith.addf %119, %118 : vector<16x512xf32>
    %cst_26 = arith.constant 5.000000e-01 : f32
    %121 = vector.broadcast %cst_26 : f32 to vector<16x512xf32>
    %122 = arith.mulf %121, %120 : vector<16x512xf32>
    %123 = arith.mulf %110, %122 : vector<16x512xf32>
    %c0_27 = arith.constant 0 : index
    %c0_28 = arith.constant 0 : index
    %124 = vector.load %arg5[%c0_27, %c0_28] : memref<16x144xbf16, #tpu.memory_space<vmem>>, vector<16x144xbf16>
    %c17_i32_29 = arith.constant 17 : i32
    %125 = tpu.dynamic_rotate %123 by %c17_i32_29 dim 1 : vector<16x512xf32>, i32 -> vector<16x512xf32>
    %126 = vector.extract_strided_slice %2 {offsets = [0, 0], sizes = [1, 512], strides = [1, 1]} : vector<9x512xf32> to vector<1x512xf32>
    %127 = vector.broadcast %126 : vector<1x512xf32> to vector<16x512xf32>
    %128 = arith.mulf %125, %127 : vector<16x512xf32>
    %129 = arith.truncf %128 : vector<16x512xf32> to vector<16x512xbf16>
    %c16_i32_30 = arith.constant 16 : i32
    %130 = tpu.dynamic_rotate %123 by %c16_i32_30 dim 1 : vector<16x512xf32>, i32 -> vector<16x512xf32>
    %131 = vector.extract_strided_slice %2 {offsets = [1, 0], sizes = [1, 512], strides = [1, 1]} : vector<9x512xf32> to vector<1x512xf32>
    %132 = vector.broadcast %131 : vector<1x512xf32> to vector<16x512xf32>
    %133 = arith.mulf %130, %132 : vector<16x512xf32>
    %134 = arith.truncf %133 : vector<16x512xf32> to vector<16x512xbf16>
    %c15_i32_31 = arith.constant 15 : i32
    %135 = tpu.dynamic_rotate %123 by %c15_i32_31 dim 1 : vector<16x512xf32>, i32 -> vector<16x512xf32>
    %136 = vector.extract_strided_slice %2 {offsets = [2, 0], sizes = [1, 512], strides = [1, 1]} : vector<9x512xf32> to vector<1x512xf32>
    %137 = vector.broadcast %136 : vector<1x512xf32> to vector<16x512xf32>
    %138 = arith.mulf %135, %137 : vector<16x512xf32>
    %139 = arith.truncf %138 : vector<16x512xf32> to vector<16x512xbf16>
    %c1_i32_32 = arith.constant 1 : i32
    %140 = tpu.dynamic_rotate %123 by %c1_i32_32 dim 1 : vector<16x512xf32>, i32 -> vector<16x512xf32>
    %141 = vector.extract_strided_slice %2 {offsets = [3, 0], sizes = [1, 512], strides = [1, 1]} : vector<9x512xf32> to vector<1x512xf32>
    %142 = vector.broadcast %141 : vector<1x512xf32> to vector<16x512xf32>
    %143 = arith.mulf %140, %142 : vector<16x512xf32>
    %144 = arith.truncf %143 : vector<16x512xf32> to vector<16x512xbf16>
    %145 = arith.truncf %123 : vector<16x512xf32> to vector<16x512xbf16>
    %c511_i32_33 = arith.constant 511 : i32
    %146 = tpu.dynamic_rotate %123 by %c511_i32_33 dim 1 : vector<16x512xf32>, i32 -> vector<16x512xf32>
    %147 = vector.extract_strided_slice %2 {offsets = [5, 0], sizes = [1, 512], strides = [1, 1]} : vector<9x512xf32> to vector<1x512xf32>
    %148 = vector.broadcast %147 : vector<1x512xf32> to vector<16x512xf32>
    %149 = arith.mulf %146, %148 : vector<16x512xf32>
    %150 = arith.truncf %149 : vector<16x512xf32> to vector<16x512xbf16>
    %c497_i32_34 = arith.constant 497 : i32
    %151 = tpu.dynamic_rotate %123 by %c497_i32_34 dim 1 : vector<16x512xf32>, i32 -> vector<16x512xf32>
    %152 = vector.extract_strided_slice %2 {offsets = [6, 0], sizes = [1, 512], strides = [1, 1]} : vector<9x512xf32> to vector<1x512xf32>
    %153 = vector.broadcast %152 : vector<1x512xf32> to vector<16x512xf32>
    %154 = arith.mulf %151, %153 : vector<16x512xf32>
    %155 = arith.truncf %154 : vector<16x512xf32> to vector<16x512xbf16>
    %c496_i32_35 = arith.constant 496 : i32
    %156 = tpu.dynamic_rotate %123 by %c496_i32_35 dim 1 : vector<16x512xf32>, i32 -> vector<16x512xf32>
    %157 = vector.extract_strided_slice %2 {offsets = [7, 0], sizes = [1, 512], strides = [1, 1]} : vector<9x512xf32> to vector<1x512xf32>
    %158 = vector.broadcast %157 : vector<1x512xf32> to vector<16x512xf32>
    %159 = arith.mulf %156, %158 : vector<16x512xf32>
    %160 = arith.truncf %159 : vector<16x512xf32> to vector<16x512xbf16>
    %c495_i32_36 = arith.constant 495 : i32
    %161 = tpu.dynamic_rotate %123 by %c495_i32_36 dim 1 : vector<16x512xf32>, i32 -> vector<16x512xf32>
    %162 = vector.extract_strided_slice %2 {offsets = [8, 0], sizes = [1, 512], strides = [1, 1]} : vector<9x512xf32> to vector<1x512xf32>
    %163 = vector.broadcast %162 : vector<1x512xf32> to vector<16x512xf32>
    %164 = arith.mulf %161, %163 : vector<16x512xf32>
    %165 = arith.truncf %164 : vector<16x512xf32> to vector<16x512xbf16>
    %166 = tpu.concatenate %129, %134, %139, %144, %145, %150, %155, %160, %165 in 0 : vector<16x512xbf16>, vector<16x512xbf16>, vector<16x512xbf16>, vector<16x512xbf16>, vector<16x512xbf16>, vector<16x512xbf16>, vector<16x512xbf16>, vector<16x512xbf16>, vector<16x512xbf16> -> vector<144x512xbf16>
    %cst_37 = arith.constant dense<0.000000e+00> : vector<16x512xf32>
    %167 = tpu.matmul %124, %166, %cst_37 {dimension_numbers = #tpu.dot_dimension_numbers<[1], [0], [0], [1], [0, 0, 1, 1], [], []>} : vector<16x144xbf16>, vector<144x512xbf16>, vector<16x512xf32> -> vector<16x512xf32>
    %168 = vector.extract_strided_slice %3 {offsets = [0, 2], sizes = [16, 1], strides = [1, 1]} : vector<16x4xf32> to vector<16x1xf32>
    %169 = vector.broadcast %168 : vector<16x1xf32> to vector<16x512xf32>
    %170 = arith.addf %167, %169 : vector<16x512xf32>
    %171 = arith.mulf %170, %170 : vector<16x512xf32>
    %172 = arith.mulf %170, %171 : vector<16x512xf32>
    %cst_38 = arith.constant 4.471500e-02 : f32
    %173 = vector.broadcast %cst_38 : f32 to vector<16x512xf32>
    %174 = arith.mulf %173, %172 : vector<16x512xf32>
    %175 = arith.addf %170, %174 : vector<16x512xf32>
    %cst_39 = arith.constant 0.797884583 : f32
    %176 = vector.broadcast %cst_39 : f32 to vector<16x512xf32>
    %177 = arith.mulf %176, %175 : vector<16x512xf32>
    %178 = math.tanh %177 : vector<16x512xf32>
    %cst_40 = arith.constant 1.000000e+00 : f32
    %179 = vector.broadcast %cst_40 : f32 to vector<16x512xf32>
    %180 = arith.addf %179, %178 : vector<16x512xf32>
    %cst_41 = arith.constant 5.000000e-01 : f32
    %181 = vector.broadcast %cst_41 : f32 to vector<16x512xf32>
    %182 = arith.mulf %181, %180 : vector<16x512xf32>
    %183 = arith.mulf %170, %182 : vector<16x512xf32>
    %184 = tpu.concatenate %63, %123, %183 in 0 : vector<16x512xf32>, vector<16x512xf32>, vector<16x512xf32> -> vector<48x512xf32>
    %185 = arith.truncf %184 : vector<48x512xf32> to vector<48x512xbf16>
    %c0_42 = arith.constant 0 : index
    %c0_43 = arith.constant 0 : index
    %186 = vector.load %arg6[%c0_42, %c0_43] : memref<16x48xbf16, #tpu.memory_space<vmem>>, vector<16x48xbf16>
    %cst_44 = arith.constant dense<0.000000e+00> : vector<16x512xf32>
    %187 = tpu.matmul %186, %185, %cst_44 {dimension_numbers = #tpu.dot_dimension_numbers<[1], [0], [0], [1], [0, 0, 1, 1], [], []>} : vector<16x48xbf16>, vector<48x512xbf16>, vector<16x512xf32> -> vector<16x512xf32>
    %188 = vector.extract_strided_slice %3 {offsets = [0, 3], sizes = [16, 1], strides = [1, 1]} : vector<16x4xf32> to vector<16x1xf32>
    %189 = vector.broadcast %188 : vector<16x1xf32> to vector<16x512xf32>
    %190 = arith.addf %187, %189 : vector<16x512xf32>
    %c0_45 = arith.constant 0 : index
    %c0_46 = arith.constant 0 : index
    %191 = vector.load %arg8[%c0_45, %c0_46] : memref<16x1xf32, #tpu.memory_space<vmem>>, vector<16x1xf32>
    %c0_47 = arith.constant 0 : index
    %c0_48 = arith.constant 0 : index
    %192 = vector.load %arg9[%c0_47, %c0_48] : memref<1x1xf32, #tpu.memory_space<vmem>>, vector<1x1xf32>
    %c0_49 = arith.constant 0 : index
    %c0_50 = arith.constant 0 : index
    %193 = vector.load %arg10[%c0_49, %c0_50] : memref<16x1xf32, #tpu.memory_space<vmem>>, vector<16x1xf32>
    %c0_51 = arith.constant 0 : index
    %c0_52 = arith.constant 0 : index
    %194 = vector.load %arg11[%c0_51, %c0_52] : memref<16x1xf32, #tpu.memory_space<vmem>>, vector<16x1xf32>
    %195 = vector.extract_strided_slice %190 {offsets = [0, 0], sizes = [16, 256], strides = [1, 1]} : vector<16x512xf32> to vector<16x256xf32>
    %cst_53 = arith.constant dense<0.000000e+00> : vector<16xf32>
    %196 = vector.multi_reduction <add>, %195, %cst_53 [1] : vector<16x256xf32> to vector<16xf32>
    %197 = vector.shape_cast %196 : vector<16xf32> to vector<16x1xf32>
    %cst_54 = arith.constant 3.906250e-03 : f32
    %198 = vector.broadcast %cst_54 : f32 to vector<16x1xf32>
    %199 = arith.mulf %197, %198 : vector<16x1xf32>
    %200 = arith.mulf %191, %199 : vector<16x1xf32>
    %cst_55 = arith.constant dense<0.000000e+00> : vector<1xf32>
    %201 = vector.multi_reduction <add>, %200, %cst_55 [0] : vector<16x1xf32> to vector<1xf32>
    %202 = vector.shape_cast %201 : vector<1xf32> to vector<1x1xf32>
    %203 = arith.addf %202, %192 : vector<1x1xf32>
    %cst_56 = arith.constant 0.000000e+00 : f32
    %204 = vector.broadcast %cst_56 : f32 to vector<1x1xf32>
    %205 = arith.maximumf %203, %204 : vector<1x1xf32>
    %206 = vector.broadcast %205 : vector<1x1xf32> to vector<16x1xf32>
    %207 = arith.mulf %193, %206 : vector<16x1xf32>
    %cst_57 = arith.constant dense<0.000000e+00> : vector<16xf32>
    %208 = vector.multi_reduction <add>, %207, %cst_57 [1] : vector<16x1xf32> to vector<16xf32>
    %209 = vector.shape_cast %208 : vector<16xf32> to vector<16x1xf32>
    %210 = arith.addf %209, %194 : vector<16x1xf32>
    %211 = arith.negf %210 : vector<16x1xf32>
    %212 = math.exp %211 : vector<16x1xf32>
    %cst_58 = arith.constant 1.000000e+00 : f32
    %213 = vector.broadcast %cst_58 : f32 to vector<16x1xf32>
    %214 = arith.addf %213, %212 : vector<16x1xf32>
    %215 = arith.divf %213, %214 : vector<16x1xf32>
    %216 = vector.extract_strided_slice %1 {offsets = [0, 0], sizes = [16, 256], strides = [1, 1]} : vector<16x512xf32> to vector<16x256xf32>
    %217 = vector.broadcast %215 : vector<16x1xf32> to vector<16x256xf32>
    %218 = arith.mulf %195, %217 : vector<16x256xf32>
    %219 = arith.addf %216, %218 : vector<16x256xf32>
    %220 = vector.extract_strided_slice %190 {offsets = [0, 256], sizes = [16, 256], strides = [1, 1]} : vector<16x512xf32> to vector<16x256xf32>
    %cst_59 = arith.constant dense<0.000000e+00> : vector<16xf32>
    %221 = vector.multi_reduction <add>, %220, %cst_59 [1] : vector<16x256xf32> to vector<16xf32>
    %222 = vector.shape_cast %221 : vector<16xf32> to vector<16x1xf32>
    %cst_60 = arith.constant 3.906250e-03 : f32
    %223 = vector.broadcast %cst_60 : f32 to vector<16x1xf32>
    %224 = arith.mulf %222, %223 : vector<16x1xf32>
    %225 = arith.mulf %191, %224 : vector<16x1xf32>
    %cst_61 = arith.constant dense<0.000000e+00> : vector<1xf32>
    %226 = vector.multi_reduction <add>, %225, %cst_61 [0] : vector<16x1xf32> to vector<1xf32>
    %227 = vector.shape_cast %226 : vector<1xf32> to vector<1x1xf32>
    %228 = arith.addf %227, %192 : vector<1x1xf32>
    %cst_62 = arith.constant 0.000000e+00 : f32
    %229 = vector.broadcast %cst_62 : f32 to vector<1x1xf32>
    %230 = arith.maximumf %228, %229 : vector<1x1xf32>
    %231 = vector.broadcast %230 : vector<1x1xf32> to vector<16x1xf32>
    %232 = arith.mulf %193, %231 : vector<16x1xf32>
    %cst_63 = arith.constant dense<0.000000e+00> : vector<16xf32>
    %233 = vector.multi_reduction <add>, %232, %cst_63 [1] : vector<16x1xf32> to vector<16xf32>
    %234 = vector.shape_cast %233 : vector<16xf32> to vector<16x1xf32>
    %235 = arith.addf %234, %194 : vector<16x1xf32>
    %236 = arith.negf %235 : vector<16x1xf32>
    %237 = math.exp %236 : vector<16x1xf32>
    %cst_64 = arith.constant 1.000000e+00 : f32
    %238 = vector.broadcast %cst_64 : f32 to vector<16x1xf32>
    %239 = arith.addf %238, %237 : vector<16x1xf32>
    %240 = arith.divf %238, %239 : vector<16x1xf32>
    %241 = vector.extract_strided_slice %1 {offsets = [0, 256], sizes = [16, 256], strides = [1, 1]} : vector<16x512xf32> to vector<16x256xf32>
    %242 = vector.broadcast %240 : vector<16x1xf32> to vector<16x256xf32>
    %243 = arith.mulf %220, %242 : vector<16x256xf32>
    %244 = arith.addf %241, %243 : vector<16x256xf32>
    %245 = tpu.concatenate %219, %244 in 1 : vector<16x256xf32>, vector<16x256xf32> -> vector<16x512xf32>
    %c0_65 = arith.constant 0 : index
    %c0_66 = arith.constant 0 : index
    %c0_67 = arith.constant 0 : index
    %246 = vector.load %arg12[%c0_65, %c0_66, %c0_67] : memref<1x16x512xf32, #tpu.memory_space<vmem>>, vector<1x16x512xf32>
    %247 = vector.shape_cast %246 : vector<1x16x512xf32> to vector<16x512xf32>
    %248 = vector.shape_cast %245 : vector<16x512xf32> to vector<1x16x512xf32>
    tpu.vector_store %arg12[%c0_65, %c0_66, %c0_67], %248 {strides = array<i32>} : memref<1x16x512xf32, #tpu.memory_space<vmem>>, vector<1x16x512xf32>,
    return
  }
  func.func @transform_0(%arg0: i32) -> (i32, i32, i32) {
    %c0_i32 = arith.constant 0 : i32
    %c0_i32_0 = arith.constant 0 : i32
    %c0_i32_1 = arith.constant 0 : i32
    return %arg0, %c0_i32, %c0_i32_0 : i32, i32, i32
  }
  func.func @transform_1(%arg0: i32) -> (i32, i32) {
    %c0_i32 = arith.constant 0 : i32
    %c0_i32_0 = arith.constant 0 : i32
    %c0_i32_1 = arith.constant 0 : i32
    return %c0_i32, %c0_i32_0 : i32, i32
  }
  func.func @transform_2(%arg0: i32) -> (i32, i32) {
    %c0_i32 = arith.constant 0 : i32
    %c0_i32_0 = arith.constant 0 : i32
    %c0_i32_1 = arith.constant 0 : i32
    return %c0_i32, %c0_i32_0 : i32, i32
  }
  func.func @transform_3(%arg0: i32) -> (i32, i32) {
    %c0_i32 = arith.constant 0 : i32
    %c0_i32_0 = arith.constant 0 : i32
    %c0_i32_1 = arith.constant 0 : i32
    return %c0_i32, %c0_i32_0 : i32, i32
  }
  func.func @transform_4(%arg0: i32) -> (i32, i32) {
    %c0_i32 = arith.constant 0 : i32
    %c0_i32_0 = arith.constant 0 : i32
    %c0_i32_1 = arith.constant 0 : i32
    return %c0_i32, %c0_i32_0 : i32, i32
  }
  func.func @transform_5(%arg0: i32) -> (i32, i32) {
    %c0_i32 = arith.constant 0 : i32
    %c0_i32_0 = arith.constant 0 : i32
    %c0_i32_1 = arith.constant 0 : i32
    return %c0_i32, %c0_i32_0 : i32, i32
  }
  func.func @transform_6(%arg0: i32) -> (i32, i32) {
    %c0_i32 = arith.constant 0 : i32
    %c0_i32_0 = arith.constant 0 : i32
    %c0_i32_1 = arith.constant 0 : i32
    return %c0_i32, %c0_i32_0 : i32, i32
  }
  func.func @transform_7(%arg0: i32) -> (i32, i32) {
    %c0_i32 = arith.constant 0 : i32
    %c0_i32_0 = arith.constant 0 : i32
    %c0_i32_1 = arith.constant 0 : i32
    return %c0_i32, %c0_i32_0 : i32, i32
  }
  func.func @transform_8(%arg0: i32) -> (i32, i32) {
    %c0_i32 = arith.constant 0 : i32
    %c0_i32_0 = arith.constant 0 : i32
    %c0_i32_1 = arith.constant 0 : i32
    return %c0_i32, %c0_i32_0 : i32, i32
  }
  func.func @transform_9(%arg0: i32) -> (i32, i32) {
    %c0_i32 = arith.constant 0 : i32
    %c0_i32_0 = arith.constant 0 : i32
    %c0_i32_1 = arith.constant 0 : i32
    return %c0_i32, %c0_i32_0 : i32, i32
  }
  func.func @transform_10(%arg0: i32) -> (i32, i32) {
    %c0_i32 = arith.constant 0 : i32
    %c0_i32_0 = arith.constant 0 : i32
    %c0_i32_1 = arith.constant 0 : i32
    return %c0_i32, %c0_i32_0 : i32, i32
  }
  func.func @transform_11(%arg0: i32) -> (i32, i32, i32) {
    %c0_i32 = arith.constant 0 : i32
    %c0_i32_0 = arith.constant 0 : i32
    %c0_i32_1 = arith.constant 0 : i32
    return %arg0, %c0_i32, %c0_i32_0 : i32, i32, i32
  }
}

</mosaic_0001>

<bundles_post_ra>
// kernel: my_block_forward.1
= control target key start
LH: loop header
LB: loop body
LE: loop exit
PB: predicated region body
PF: predicated region fallthrough
CT: control target
= control target key end

     0   :  { %s2504_s19 = smov 0   ;;  %s4226_s0 = inlined_call_operand.vmem [shape: f32[2,16,512], index: 0, kind: input, shape index: {}]   ;;  %s4227_s1 = inlined_call_operand.vmem [shape: f32[9,512], index: 1, kind: input, shape index: {}]   ;;  %s4228_s2 = inlined_call_operand.vmem [shape: bf16[16,144], index: 2, kind: input, shape index: {}]   ;;  %s4229_s3 = inlined_call_operand.vmem [shape: bf16[16,144], index: 3, kind: input, shape index: {}]   ;;  %s4230_s4 = inlined_call_operand.vmem [shape: bf16[16,144], index: 4, kind: input, shape index: {}]   ;;  %s4231_s5 = inlined_call_operand.vmem [shape: bf16[16,48], index: 5, kind: input, shape index: {}]   ;;  %s4232_s6 = inlined_call_operand.vmem [shape: f32[16,4], index: 6, kind: input, shape index: {}]   ;;  %s4233_s7 = inlined_call_operand.vmem [shape: f32[16,1], index: 7, kind: input, shape index: {}]   ;;  %s4234_s8 = inlined_call_operand.<no memory space> [shape: f32[1,1], index: 8, kind: input, shape index: {}]   ;;  %s4235_s9 = inlined_call_operand.vmem [shape: f32[16,1], index: 9, kind: input, shape index: {}]   ;;  %s4236_s10 = inlined_call_operand.vmem [shape: f32[16,1], index: 10, kind: input, shape index: {}]   ;;  %s4237_s11 = inlined_call_operand.vmem [shape: f32[2,16,512], index: 11, kind: output, shape index: {}]  }
   0x1   :  { %v16_v0 = vstv %s4234_s8 }
   0x2   :  { %17 = vst [vmem:[#allocation2] sm:$0x1] %v16_v0 }
   0x3 LB: > { %s2267_s20 = sadd.s32 4294967295, %s2427_s19   ;;  %p2271_p0 = scmp.ge.s32.totalorder %s2427_s19, 1  ;;  %s2427_s19 = sphi %s2504_s19, %s23_s19  }
   0x4   : > { %p339_p1 = scmp.lt.s32.totalorder %s2427_s19, 3 }
   0x6   : > { %p340_p2 = pnand %p2271_p0, %p339_p1 }
   0x8   : > { %343 = sbr.rel (%p340_p2) target bundleno = 1995 (0x7cb), region = 64 }
   0xd   : > { %p379_p3 = scmp.lt.s32.totalorder %s2267_s20, 1  ;;  %s2429_s24 = smov 112   ;;  %v426_v9 = vlaneseq  ;;  %v2335_v11 = vld [vmem:[%s4228_s2 + $0x4] ss:$8 sps:$4 sm:$0xff]   ;;  %vm859_vm0 = vcmask 130048   ;;  %v2702_v23 = vld [vmem:[%s4227_s1 + $0x18] sm:$0xff] }
   0xe   : > { %s2430_s25 = smov 113   ;;  %s2431_s26 = smov 127   ;;  %2282 = vmatprep.mubr.msk.bf16.mxu0 %vm859_vm0, %v2335_v11  ;;  %2283 = vmatprep.mubr.msk.bf16.mxu1 %vm859_vm0, %v2335_v11  ;;  %v2679_v16 = vld [vmem:[%s4227_s1 + $0x8] sm:$0xff]  ;;  %v2684_v17 = vld [vmem:[%s4227_s1] sm:$0xff]  ;;  %v2707_v24 = vld [vmem:[%s4227_s1 + $0x10] sm:$0xff]  ;;  %v4238_v26 = vmov 0  }
   0xf   : > { %s4394_s20 = smov (!%p379_p3, %s2267_s20), 1  ;;  %s2432_s27 = smov 1   ;;  %v2662_v10 = vshrl.u32 %v426_v9, 7  ;;  %v2667_v13 = vand.u32 127, %v426_v9  ;;  %2323 = vset.pattern.permute.xlu0 %v4238_v26  ;;  %2324 = vset.pattern.permute.xlu1 %v4238_v26  ;;  %v2734_v41 = vld [vmem:[%s4232_s6] sm:$0xff]  ;;  %v2747_v46 = vld [vmem:[%s4232_s6 + $0x8] sm:$0xff] }
  0x10   : > { %s2301_s8 = sshll.u32 %s4394_s20, 6  ;;  %s2433_s28 = smov 15   ;;  %vm1984_vm9 = vcmask 392192   ;;  %vm2091_vm10 = vcmask 7168  }
  0x11   : > { %s2520_s23 = scalar_lea.vmem %s4226_s0, %s2301_s8  ;;  %s2434_s29 = smov 16   ;;  %v761_v15 = vsub.s32 7, %v2662_v10  ;;  %vm750_vm1 = vcmp.lt.s32.totalorder %v2667_v13, 112  ;;  %v708_v55 = vsub.s32 6, %v2662_v10  ;;  %vm697_vm2 = vcmp.lt.s32.totalorder %v2667_v13, 113 }
  0x12   : > { %v2523_v1 = vld [vmem:[%s2520_s23 + $0x8] sm:$0xff]  ;;  %v2526_v2 = vld [vmem:[%s2520_s23] sm:$0xff]  ;;  %v2543_v5 = vld [vmem:[%s2520_s23 + $0x30] sm:$0xff]  ;;  %s2435_s30 = smov 17   ;;  %s2436_s12 = smov 111   ;;  %vm644_vm3 = vcmp.lt.s32.totalorder %v2667_v13, 127 }
  0x13   : > { %738 = vrot.lane.b32.xlu1 %v2523_v1, %s2429_s24  ;;  %734 = vrot.lane.b32.xlu0 %v2526_v2, %s2429_s24  ;;  %v2533_v3 = vld [vmem:[%s2520_s23 + $0x28] sm:$0xff]  ;;  %v2536_v4 = vld [vmem:[%s2520_s23 + $0x20] sm:$0xff]  ;;  %v2694_v21 = vrot.slane %v2679_v16, %v761_v15  ;;  %v2697_v22 = vrot.slane %v2684_v17, %v761_v15  ;;  %v2719_v32 = vrot.slane %v2702_v23, %v761_v15  ;;  %vm587_vm4 = vcmp.lt.s32.totalorder %v2667_v13, 1 }
  0x14   : > { %v2546_v6 = vld [vmem:[%s2520_s23 + $0x10] sm:$0xff]  ;;  %v2553_v7 = vld [vmem:[%s2520_s23 + $0x38] sm:$0xff]  ;;  %v2722_v33 = vrot.slane %v2707_v24, %v761_v15  ;;  %v2758_v56 = vrot.slane %v2684_v17, %v708_v55  ;;  %v2765_v61 = vrot.slane %v2679_v16, %v708_v55  ;;  %vm534_vm5 = vcmp.lt.s32.totalorder %v2667_v13, 15 }
  0x15   : > { %v2556_v8 = vld [vmem:[%s2520_s23 + $0x18] sm:$0xff]  ;;  %vm481_vm6 = vcmp.lt.s32.totalorder %v2667_v13, 16  ;;  %vm428_vm7 = vcmp.lt.s32.totalorder %v2667_v13, 17  ;;  %vm803_vm8 = vcmp.lt.s32.totalorder %v2667_v13, 111 }
  0x17   : > { %740 = vrot.lane.b32.xlu1 %v2533_v3, %s2429_s24  ;;  %736 = vrot.lane.b32.xlu0 %v2536_v4, %s2429_s24 }
  0x1b   : > { %744 = vrot.lane.b32.xlu1 %v2543_v5, %s2429_s24  ;;  %742 = vrot.lane.b32.xlu0 %v2546_v6, %s2429_s24 }
  0x1f   : > { %748 = vrot.lane.b32.xlu1 %v2553_v7, %s2429_s24  ;;  %746 = vrot.lane.b32.xlu0 %v2556_v8, %s2429_s24 }
  0x23   : > { %683 = vrot.lane.b32.xlu1 %v2536_v4, %s2430_s25  ;;  %681 = vrot.lane.b32.xlu0 %v2526_v2, %s2430_s25 }
  0x27   : > { %687 = vrot.lane.b32.xlu1 %v2533_v3, %s2430_s25  ;;  %685 = vrot.lane.b32.xlu0 %v2523_v1, %s2430_s25 }
  0x2b   : > { %691 = vrot.lane.b32.xlu1 %v2543_v5, %s2430_s25  ;;  %689 = vrot.lane.b32.xlu0 %v2546_v6, %s2430_s25 }
  0x2f   : > { %695 = vrot.lane.b32.xlu1 %v2553_v7, %s2430_s25  ;;  %693 = vrot.lane.b32.xlu0 %v2556_v8, %s2430_s25 }
  0x33   : > { %630 = vrot.lane.b32.xlu1 %v2536_v4, %s2431_s26  ;;  %628 = vrot.lane.b32.xlu0 %v2526_v2, %s2431_s26 }
  0x37   : > { %634 = vrot.lane.b32.xlu1 %v2533_v3, %s2431_s26  ;;  %632 = vrot.lane.b32.xlu0 %v2523_v1, %s2431_s26 }
  0x3b   : > { %638 = vrot.lane.b32.xlu1 %v2543_v5, %s2431_s26  ;;  %636 = vrot.lane.b32.xlu0 %v2546_v6, %s2431_s26 }
  0x3f   : > { %642 = vrot.lane.b32.xlu1 %v2553_v7, %s2431_s26  ;;  %640 = vrot.lane.b32.xlu0 %v2556_v8, %s2431_s26 }
  0x43   : > { %573 = vrot.lane.b32.xlu1 %v2536_v4, %s2432_s27  ;;  %571 = vrot.lane.b32.xlu0 %v2526_v2, %s2432_s27 }
  0x47   : > { %577 = vrot.lane.b32.xlu1 %v2533_v3, %s2432_s27  ;;  %575 = vrot.lane.b32.xlu0 %v2523_v1, %s2432_s27 }
  0x4b   : > { %581 = vrot.lane.b32.xlu1 %v2543_v5, %s2432_s27  ;;  %579 = vrot.lane.b32.xlu0 %v2546_v6, %s2432_s27 }
  0x4f   : > { %585 = vrot.lane.b32.xlu1 %v2553_v7, %s2432_s27  ;;  %583 = vrot.lane.b32.xlu0 %v2556_v8, %s2432_s27 }
  0x53   : > { %520 = vrot.lane.b32.xlu1 %v2536_v4, %s2433_s28  ;;  %518 = vrot.lane.b32.xlu0 %v2526_v2, %s2433_s28 }
  0x57   : > { %524 = vrot.lane.b32.xlu1 %v2533_v3, %s2433_s28  ;;  %522 = vrot.lane.b32.xlu0 %v2523_v1, %s2433_s28 }
  0x5b   : > { %528 = vrot.lane.b32.xlu1 %v2543_v5, %s2433_s28  ;;  %526 = vrot.lane.b32.xlu0 %v2546_v6, %s2433_s28 }
  0x5f   : > { %532 = vrot.lane.b32.xlu1 %v2553_v7, %s2433_s28  ;;  %530 = vrot.lane.b32.xlu0 %v2556_v8, %s2433_s28 }
  0x63   : > { %467 = vrot.lane.b32.xlu1 %v2536_v4, %s2434_s29  ;;  %465 = vrot.lane.b32.xlu0 %v2526_v2, %s2434_s29 }
  0x67   : > { %471 = vrot.lane.b32.xlu1 %v2533_v3, %s2434_s29  ;;  %469 = vrot.lane.b32.xlu0 %v2523_v1, %s2434_s29 }
  0x6b   : > { %475 = vrot.lane.b32.xlu1 %v2543_v5, %s2434_s29  ;;  %473 = vrot.lane.b32.xlu0 %v2546_v6, %s2434_s29 }
  0x6f   : > { %479 = vrot.lane.b32.xlu1 %v2553_v7, %s2434_s29  ;;  %477 = vrot.lane.b32.xlu0 %v2556_v8, %s2434_s29 }
  0x73   : > { %412 = vrot.lane.b32.xlu1 %v2536_v4, %s2435_s30  ;;  %410 = vrot.lane.b32.xlu0 %v2526_v2, %s2435_s30 }
  0x77   : > { %416 = vrot.lane.b32.xlu1 %v2533_v3, %s2435_s30  ;;  %414 = vrot.lane.b32.xlu0 %v2523_v1, %s2435_s30 }
  0x7b   : > { %420 = vrot.lane.b32.xlu1 %v2543_v5, %s2435_s30  ;;  %418 = vrot.lane.b32.xlu0 %v2546_v6, %s2435_s30 }
  0x7f   : > { %424 = vrot.lane.b32.xlu1 %v2553_v7, %s2435_s30  ;;  %422 = vrot.lane.b32.xlu0 %v2556_v8, %s2435_s30 }
  0x83   : > { %789 = vrot.lane.b32.xlu1 %v2536_v4, %s2436_s12  ;;  %787 = vrot.lane.b32.xlu0 %v2526_v2, %s2436_s12 }
  0x85   : > { %v739_v12 = vpop.permute.xlu1 %738  ;;  %v735_v14 = vpop.permute.xlu0 %734 }
  0x86   : > { %v755_v25 = vsel %vm750_vm1, %v735_v14, %v739_v12 }
  0x87   : > { %793 = vrot.lane.b32.xlu1 %v2533_v3, %s2436_s12  ;;  %791 = vrot.lane.b32.xlu0 %v2523_v1, %s2436_s12  ;;  %v775_v36 = vmul.f32 %v2697_v22, %v755_v25 }
  0x89   : > { %v741_v18 = vpop.permute.xlu1 %740  ;;  %v737_v19 = vpop.permute.xlu0 %736 }
  0x8a   : > { %v756_v20 = vsel %vm750_vm1, %v737_v19, %v741_v18 }
  0x8b   : > { %797 = vrot.lane.b32.xlu1 %v2543_v5, %s2436_s12  ;;  %795 = vrot.lane.b32.xlu0 %v2546_v6, %s2436_s12  ;;  %v779_v29 = vmul.f32 %v2697_v22, %v756_v20 }
  0x8d   : > { %v745_v27 = vpop.permute.xlu1 %744  ;;  %v743_v28 = vpop.permute.xlu0 %742  ;;  %v783_v40 = vpack.c.bf16 %v779_v29, %v775_v36 }
  0x8e   : > { %v753_v30 = vsel %vm750_vm1, %v739_v12, %v743_v28  ;;  %v754_v31 = vsel %vm750_vm1, %v741_v18, %v745_v27  ;;  %v2776_v18 = vrot.slane %v2707_v24, %v708_v55 }
  0x8f   : > { %801 = vrot.lane.b32.xlu1 %v2553_v7, %s2436_s12  ;;  %799 = vrot.lane.b32.xlu0 %v2556_v8, %s2436_s12  ;;  %v776_v34 = vmul.f32 %v2694_v21, %v753_v30  ;;  %v780_v35 = vmul.f32 %v2694_v21, %v754_v31 }
  0x91   : > { %v749_v37 = vpop.permute.xlu1 %748  ;;  %v747_v38 = vpop.permute.xlu0 %746  ;;  %v784_v39 = vpack.c.bf16 %v780_v35, %v776_v34 }
  0x92   : > { %v752_v42 = vsel %vm750_vm1, %v745_v27, %v749_v37  ;;  %v751_v43 = vsel %vm750_vm1, %v743_v28, %v747_v38  ;;  %v757_v44 = vsel %vm750_vm1, %v747_v38, %v735_v14  ;;  %v758_v45 = vsel %vm750_vm1, %v749_v37, %v737_v19 }
  0x93   : > { %863 = vmatprep.subr.bf16.mxu0 %v784_v39  ;;  %v778_v47 = vmul.f32 %v2719_v32, %v757_v44  ;;  %v782_v48 = vmul.f32 %v2719_v32, %v758_v45  ;;  %v777_v49 = vmul.f32 %v2722_v33, %v751_v43  ;;  %v781_v50 = vmul.f32 %v2722_v33, %v752_v42 }
  0x94   : > { %864 = vmatpush1.bf16.msra.mxu0 %v783_v40  ;;  %842 = vperm.xlu0 %2323, %v2734_v41   ;;  %v2779_v19 = vrot.slane %v2702_v23, %v708_v55  ;;  %v655_v44 = vsub.s32 5, %v2662_v10 }
  0x95   : > { %v684_v51 = vpop.permute.xlu1 %683  ;;  %v682_v52 = vpop.permute.xlu0 %681  ;;  %v786_v53 = vpack.c.bf16 %v782_v48, %v778_v47  ;;  %v785_v54 = vpack.c.bf16 %v781_v50, %v777_v49  ;;  %847 = vperm.xlu1 %2324, %v2747_v46  }
  0x96   : > { %v2796_v45 = vrot.slane %v2684_v17, %v655_v44 }
  0x97   : > { %906 = vmatprep.subr.bf16.mxu1 %v786_v53 }
  0x98   : > { %907 = vmatpush1.bf16.msra.mxu1 %v785_v54 }
  0x99   : > { %v688_v57 = vpop.permute.xlu1 %687  ;;  %v686_v58 = vpop.permute.xlu0 %685 }
  0x9a   : > { %v703_v59 = vsel %vm697_vm2, %v684_v51, %v688_v57  ;;  %v702_v60 = vsel %vm697_vm2, %v682_v52, %v686_v58 }
  0x9b   : > { %v726_v62 = vmul.f32 %v2758_v56, %v703_v59  ;;  %v722_v63 = vmul.f32 %v2758_v56, %v702_v60 }
  0x9d   : > { %v692_v0 = vpop.permute.xlu1 %691  ;;  %v690_v9 = vpop.permute.xlu0 %689  ;;  %v730_v28 = vpack.c.bf16 %v726_v62, %v722_v63  ;;  %v2814_v62 = vrot.slane %v2707_v24, %v655_v44  ;;  %v2817_v63 = vrot.slane %v2702_v23, %v655_v44 }
  0x9e   : > { %v701_v11 = vsel %vm697_vm2, %v688_v57, %v692_v0  ;;  %v700_v12 = vsel %vm697_vm2, %v686_v58, %v690_v9 }
  0x9f   : > { %v727_v14 = vmul.f32 %v2765_v61, %v701_v11  ;;  %v723_v15 = vmul.f32 %v2765_v61, %v700_v12 }
  0xa1   : > { %v696_v20 = vpop.permute.xlu1 %695  ;;  %v694_v25 = vpop.permute.xlu0 %693  ;;  %v731_v27 = vpack.c.bf16 %v727_v14, %v723_v15  ;;  %v598_v14 = vsub.s32 3, %v2662_v10  ;;  %v625_v15 = vpack.c.bf16 %v2533_v3, %v2523_v1  ;;  %v624_v3 = vpack.c.bf16 %v2536_v4, %v2526_v2 }
  0xa2   : > { %v699_v29 = vsel %vm697_vm2, %v692_v0, %v696_v20  ;;  %v705_v30 = vsel %vm697_vm2, %v696_v20, %v684_v51  ;;  %v698_v31 = vsel %vm697_vm2, %v690_v9, %v694_v25  ;;  %v704_v34 = vsel %vm697_vm2, %v694_v25, %v682_v52 }
  0xa3   : > { %v728_v35 = vmul.f32 %v2776_v18, %v699_v29  ;;  %v729_v36 = vmul.f32 %v2779_v19, %v705_v30  ;;  %v724_v37 = vmul.f32 %v2776_v18, %v698_v31  ;;  %v725_v38 = vmul.f32 %v2779_v19, %v704_v34  ;;  %865 = vmatprep.subr.bf16.mxu0 %v731_v27 }
  0xa4   : > { %866 = vmatpush1.bf16.msra.mxu0 %v730_v28  ;;  %v2803_v51 = vrot.slane %v2679_v16, %v655_v44  ;;  %v2851_v44 = vrot.slane %v2707_v24, %v598_v14 }
  0xa5   : > { %v631_v39 = vpop.permute.xlu1 %630  ;;  %v629_v40 = vpop.permute.xlu0 %628  ;;  %v733_v42 = vpack.c.bf16 %v729_v36, %v725_v38  ;;  %v732_v43 = vpack.c.bf16 %v728_v35, %v724_v37  ;;  %v627_v38 = vpack.c.bf16 %v2553_v7, %v2556_v8 }
  0xa7   : > { %908 = vmatprep.subr.bf16.mxu1 %v733_v42 }
  0xa8   : > { %909 = vmatpush1.bf16.msra.mxu1 %v732_v43 }
  0xa9   : > { %v635_v47 = vpop.permute.xlu1 %634  ;;  %v633_v48 = vpop.permute.xlu0 %632 }
  0xaa   : > { %v650_v49 = vsel %vm644_vm3, %v631_v39, %v635_v47  ;;  %v649_v50 = vsel %vm644_vm3, %v629_v40, %v633_v48 }
  0xab   : > { %v673_v52 = vmul.f32 %v2796_v45, %v650_v49  ;;  %v669_v53 = vmul.f32 %v2796_v45, %v649_v50  ;;  %v2858_v50 = vrot.slane %v2684_v17, %v598_v14 }
  0xad   : > { %v639_v54 = vpop.permute.xlu1 %638  ;;  %v637_v55 = vpop.permute.xlu0 %636  ;;  %v677_v12 = vpack.c.bf16 %v673_v52, %v669_v53  ;;  %v2861_v52 = vrot.slane %v2702_v23, %v598_v14 }
  0xae   : > { %v648_v57 = vsel %vm644_vm3, %v635_v47, %v639_v54  ;;  %v647_v58 = vsel %vm644_vm3, %v633_v48, %v637_v55 }
  0xaf   : > { %v674_v59 = vmul.f32 %v2803_v51, %v648_v57  ;;  %v670_v60 = vmul.f32 %v2803_v51, %v647_v58  ;;  %v545_v58 = vsub.s32 2, %v2662_v10 }
  0xb1   : > { %v643_v0 = vpop.permute.xlu1 %642  ;;  %v641_v9 = vpop.permute.xlu0 %640  ;;  %v678_v11 = vpack.c.bf16 %v674_v59, %v670_v60 }
  0xb2   : > { %v646_v20 = vsel %vm644_vm3, %v639_v54, %v643_v0  ;;  %v652_v25 = vsel %vm644_vm3, %v643_v0, %v631_v39  ;;  %v645_v27 = vsel %vm644_vm3, %v637_v55, %v641_v9  ;;  %v651_v28 = vsel %vm644_vm3, %v641_v9, %v629_v40 }
  0xb3   : > { %v675_v29 = vmul.f32 %v2814_v62, %v646_v20  ;;  %v676_v30 = vmul.f32 %v2817_v63, %v652_v25  ;;  %v671_v31 = vmul.f32 %v2814_v62, %v645_v27  ;;  %v672_v1 = vmul.f32 %v2817_v63, %v651_v28  ;;  %867 = vmatprep.subr.bf16.mxu0 %v678_v11 }
  0xb4   : > { %868 = vmatpush1.bf16.msra.mxu0 %v677_v12  ;;  %v2840_v39 = vrot.slane %v2679_v16, %v598_v14  ;;  %v626_v40 = vpack.c.bf16 %v2543_v5, %v2546_v6 }
  0xb5   : > { %v574_v34 = vpop.permute.xlu1 %573  ;;  %v572_v35 = vpop.permute.xlu0 %571  ;;  %v680_v36 = vpack.c.bf16 %v676_v30, %v672_v1  ;;  %v679_v37 = vpack.c.bf16 %v675_v29, %v671_v31  ;;  %869 = vmatprep.subr.bf16.mxu0 %v625_v15  ;;  %v2880_v30 = vrot.slane %v2679_v16, %v545_v58 }
  0xb7   : > { %910 = vmatprep.subr.bf16.mxu1 %v680_v36 }
  0xb8   : > { %911 = vmatpush1.bf16.msra.mxu1 %v679_v37  ;;  %870 = vmatpush1.bf16.msra.mxu0 %v624_v3  ;;  %v2889_v37 = vrot.slane %v2707_v24, %v545_v58 }
  0xb9   : > { %v578_v2 = vpop.permute.xlu1 %577  ;;  %v576_v4 = vpop.permute.xlu0 %575  ;;  %912 = vmatprep.subr.bf16.mxu1 %v627_v38 }
  0xba   : > { %v593_v42 = vsel %vm587_vm4, %v574_v34, %v578_v2  ;;  %v592_v7 = vsel %vm587_vm4, %v572_v35, %v576_v4 }
  0xbb   : > { %v617_v8 = vmul.f32 %v2840_v39, %v593_v42  ;;  %v613_v43 = vmul.f32 %v2840_v39, %v592_v7  ;;  %v2896_v7 = vrot.slane %v2684_v17, %v545_v58 }
  0xbc   : > { %913 = vmatpush1.bf16.msra.mxu1 %v626_v40 }
  0xbd   : > { %v582_v47 = vpop.permute.xlu1 %581  ;;  %v580_v48 = vpop.permute.xlu0 %579  ;;  %v621_v5 = vpack.c.bf16 %v617_v8, %v613_v43  ;;  %v2899_v8 = vrot.slane %v2702_v23, %v545_v58 }
  0xbe   : > { %v591_v6 = vsel %vm587_vm4, %v578_v2, %v582_v47  ;;  %v590_v49 = vsel %vm587_vm4, %v576_v4, %v580_v48 }
  0xbf   : > { %871 = vmatprep.subr.bf16.mxu0 %v621_v5  ;;  %v618_v53 = vmul.f32 %v2851_v44, %v591_v6  ;;  %v614_v54 = vmul.f32 %v2851_v44, %v590_v49  ;;  %v492_v6 = vsub.s32 1, %v2662_v10 }
  0xc1   : > { %v586_v55 = vpop.permute.xlu1 %585  ;;  %v584_v57 = vpop.permute.xlu0 %583  ;;  %v622_v29 = vpack.c.bf16 %v618_v53, %v614_v54 }
  0xc2   : > { %v589_v59 = vsel %vm587_vm4, %v582_v47, %v586_v55  ;;  %v595_v60 = vsel %vm587_vm4, %v586_v55, %v574_v34  ;;  %v588_v0 = vsel %vm587_vm4, %v580_v48, %v584_v57  ;;  %v594_v9 = vsel %vm587_vm4, %v584_v57, %v572_v35 }
  0xc3   : > { %v616_v11 = vmul.f32 %v2858_v50, %v595_v60  ;;  %v619_v12 = vmul.f32 %v2861_v52, %v589_v59  ;;  %v612_v14 = vmul.f32 %v2858_v50, %v594_v9  ;;  %v615_v15 = vmul.f32 %v2861_v52, %v588_v0 }
  0xc5   : > { %v521_v20 = vpop.permute.xlu1 %520  ;;  %v519_v25 = vpop.permute.xlu0 %518  ;;  %v620_v27 = vpack.c.bf16 %v616_v11, %v612_v14  ;;  %v623_v28 = vpack.c.bf16 %v619_v12, %v615_v15  ;;  %v2918_v15 = vrot.slane %v2679_v16, %v492_v6 }
  0xc7   : > { %872 = vmatpush1.bf16.msra.mxu0 %v620_v27  ;;  %914 = vmatprep.subr.bf16.mxu1 %v623_v28  ;;  %4302 = vst [vmem:[#allocation3_spill] sm:$0xff] %v2918_v15 }
  0xc8   : > { %915 = vmatpush1.bf16.msra.mxu1 %v622_v29 }
  0xc9   : > { %v525_v31 = vpop.permute.xlu1 %524  ;;  %v523_v1 = vpop.permute.xlu0 %522 }
  0xca   : > { %v540_v3 = vsel %vm534_vm5, %v521_v20, %v525_v31  ;;  %v539_v34 = vsel %vm534_vm5, %v519_v25, %v523_v1 }
  0xcb   : > { %v564_v35 = vmul.f32 %v2880_v30, %v540_v3  ;;  %v560_v36 = vmul.f32 %v2880_v30, %v539_v34 }
  0xcd   : > { %v529_v38 = vpop.permute.xlu1 %528  ;;  %v527_v40 = vpop.permute.xlu0 %526  ;;  %v568_v2 = vpack.c.bf16 %v564_v35, %v560_v36 }
  0xce   : > { %v538_v4 = vsel %vm534_vm5, %v525_v31, %v529_v38  ;;  %v537_v42 = vsel %vm534_vm5, %v523_v1, %v527_v40  ;;  %v2927_v1 = vrot.slane %v2707_v24, %v492_v6 }
  0xcf   : > { %873 = vmatprep.subr.bf16.mxu0 %v568_v2  ;;  %v565_v43 = vmul.f32 %v2889_v37, %v538_v4  ;;  %v561_v47 = vmul.f32 %v2889_v37, %v537_v42  ;;  %v2937_v2 = vrot.slane %v2702_v23, %v492_v6 }
  0xd0   : > { %4303 = vst [vmem:[#allocation4_spill] sm:$0xff] %v2927_v1 }
  0xd1   : > { %v533_v48 = vpop.permute.xlu1 %532  ;;  %v531_v5 = vpop.permute.xlu0 %530  ;;  %v569_v14 = vpack.c.bf16 %v565_v43, %v561_v47  ;;  %4305 = vst [vmem:[#allocation6_spill] sm:$0xff] %v2937_v2 }
  0xd2   : > { %v536_v49 = vsel %vm534_vm5, %v529_v38, %v533_v48  ;;  %v542_v53 = vsel %vm534_vm5, %v533_v48, %v521_v20  ;;  %v535_v54 = vsel %vm534_vm5, %v527_v40, %v531_v5  ;;  %v541_v55 = vsel %vm534_vm5, %v531_v5, %v519_v25 }
  0xd3   : > { %v563_v57 = vmul.f32 %v2896_v7, %v542_v53  ;;  %v566_v58 = vmul.f32 %v2899_v8, %v536_v49  ;;  %v559_v59 = vmul.f32 %v2896_v7, %v541_v55  ;;  %v562_v60 = vmul.f32 %v2899_v8, %v535_v54 }
  0xd4   : > { %v2934_v40 = vrot.slane %v2684_v17, %v492_v6  ;;  %v2942_v48 = vsub.s32 0, %v2662_v10 }
  0xd5   : > { %v468_v0 = vpop.permute.xlu1 %467  ;;  %v466_v9 = vpop.permute.xlu0 %465  ;;  %v567_v11 = vpack.c.bf16 %v563_v57, %v559_v59  ;;  %v570_v12 = vpack.c.bf16 %v566_v58, %v562_v60 }
  0xd6   : > { %4304 = vst [vmem:[#allocation5_spill] sm:$0xff] %v2934_v40  ;;  %4306 = vst [vmem:[#allocation7_spill] sm:$0xff] %v2942_v48 }
  0xd7   : > { %874 = vmatpush1.bf16.msra.mxu0 %v567_v11  ;;  %916 = vmatprep.subr.bf16.mxu1 %v570_v12 }
  0xd8   : > { %917 = vmatpush1.bf16.msra.mxu1 %v569_v14 }
  0xd9   : > { %v472_v20 = vpop.permute.xlu1 %471  ;;  %v470_v25 = vpop.permute.xlu0 %469 }
  0xda   : > { %v487_v27 = vsel %vm481_vm6, %v468_v0, %v472_v20  ;;  %v486_v28 = vsel %vm481_vm6, %v466_v9, %v470_v25 }
  0xdb   : > { %v511_v29 = vmul.f32 %v2918_v15, %v487_v27  ;;  %v507_v31 = vmul.f32 %v2918_v15, %v486_v28 }
  0xdd   : > { %v476_v3 = vpop.permute.xlu1 %475  ;;  %v474_v34 = vpop.permute.xlu0 %473  ;;  %v515_v35 = vpack.c.bf16 %v511_v29, %v507_v31  ;;  %v2969_v29 = vrot.slane %v2707_v24, %v2942_v48 }
  0xde   : > { %v485_v36 = vsel %vm481_vm6, %v472_v20, %v476_v3  ;;  %v484_v38 = vsel %vm481_vm6, %v470_v25, %v474_v34 }
  0xdf   : > { %875 = vmatprep.subr.bf16.mxu0 %v515_v35  ;;  %v512_v4 = vmul.f32 %v2927_v1, %v485_v36  ;;  %v508_v42 = vmul.f32 %v2927_v1, %v484_v38  ;;  %4308 = vst [vmem:[#allocation9_spill] sm:$0xff] %v2969_v29  ;;  %v2977_v36 = vrot.slane %v2684_v17, %v2942_v48 }
  0xe0   : > { %v2981_v38 = vrot.slane %v2702_v23, %v2942_v48 }
  0xe1   : > { %v480_v43 = vpop.permute.xlu1 %479  ;;  %v478_v47 = vpop.permute.xlu0 %477  ;;  %v516_v12 = vpack.c.bf16 %v512_v4, %v508_v42  ;;  %4309 = vst [vmem:[#allocation10_spill] sm:$0xff] %v2977_v36 }
  0xe2   : > { %v483_v5 = vsel %vm481_vm6, %v476_v3, %v480_v43  ;;  %v489_v49 = vsel %vm481_vm6, %v480_v43, %v468_v0  ;;  %v482_v53 = vsel %vm481_vm6, %v474_v34, %v478_v47  ;;  %v488_v6 = vsel %vm481_vm6, %v478_v47, %v466_v9  ;;  %4310 = vst [vmem:[#allocation11_spill] sm:$0xff] %v2981_v38 }
  0xe3   : > { %v510_v54 = vmul.f32 %v2934_v40, %v489_v49  ;;  %v513_v55 = vmul.f32 %v2937_v2, %v483_v5  ;;  %v506_v57 = vmul.f32 %v2934_v40, %v488_v6  ;;  %v509_v10 = vmul.f32 %v2937_v2, %v482_v53 }
  0xe4   : > { %v2959_v0 = vrot.slane %v2679_v16, %v2942_v48 }
  0xe5   : > { %v413_v58 = vpop.permute.xlu1 %412  ;;  %v411_v59 = vpop.permute.xlu0 %410  ;;  %v514_v60 = vpack.c.bf16 %v510_v54, %v506_v57  ;;  %v517_v11 = vpack.c.bf16 %v513_v55, %v509_v10 }
  0xe6   : > { %4307 = vst [vmem:[#allocation8_spill] sm:$0xff] %v2959_v0 }
  0xe7   : > { %876 = vmatpush1.bf16.msra.mxu0 %v514_v60  ;;  %918 = vmatprep.subr.bf16.mxu1 %v517_v11 }
  0xe8   : > { %919 = vmatpush1.bf16.msra.mxu1 %v516_v12  ;;  %v3001_v12 = vld [vmem:[%s4227_s1 + $0x20] ss:$0 sm:$0xff] }
  0xe9   : > { %v417_v9 = vpop.permute.xlu1 %416  ;;  %v415_v14 = vpop.permute.xlu0 %414  ;;  %4311 = vst [vmem:[#allocation12_spill] sm:$0xff] %v3001_v12 }
  0xea   : > { %v434_v20 = vsel %vm428_vm7, %v413_v58, %v417_v9  ;;  %v433_v25 = vsel %vm428_vm7, %v411_v59, %v415_v14 }
  0xeb   : > { %v458_v27 = vmul.f32 %v2959_v0, %v434_v20  ;;  %v454_v28 = vmul.f32 %v2959_v0, %v433_v25  ;;  %v3010_v20 = vld [vmem:[%s4227_s1 + $0x28] ss:$0 sm:$0xff] }
  0xec   : > { %4312 = vst [vmem:[#allocation13_spill] sm:$0xff] %v3010_v20 }
  0xed   : > { %v421_v31 = vpop.permute.xlu1 %420  ;;  %v419_v16 = vpop.permute.xlu0 %418  ;;  %v462_v3 = vpack.c.bf16 %v458_v27, %v454_v28 }
  0xee   : > { %v432_v34 = vsel %vm428_vm7, %v417_v9, %v421_v31  ;;  %v431_v35 = vsel %vm428_vm7, %v415_v14, %v419_v16 }
  0xef   : > { %877 = vmatprep.subr.bf16.mxu0 %v462_v3  ;;  %v459_v24 = vmul.f32 %v2969_v29, %v432_v34  ;;  %v455_v4 = vmul.f32 %v2969_v29, %v431_v35 }
  0xf1   : > { %v425_v42 = vpop.permute.xlu1 %424  ;;  %v423_v43 = vpop.permute.xlu0 %422  ;;  %v463_v11 = vpack.c.bf16 %v459_v24, %v455_v4  ;;  %v3023_v24 = vld [vmem:[%s4227_s1 + $0x30] ss:$0 sm:$0xff]  ;;  %v3028_v4 = vld [vmem:[%s4227_s1 + $0x38] ss:$0 sm:$0xff] }
  0xf2   : > { %v430_v47 = vsel %vm428_vm7, %v421_v31, %v425_v42  ;;  %v436_v5 = vsel %vm428_vm7, %v425_v42, %v413_v58  ;;  %v429_v17 = vsel %vm428_vm7, %v419_v16, %v423_v43  ;;  %v435_v49 = vsel %vm428_vm7, %v423_v43, %v411_v59  ;;  %4313 = vst [vmem:[#allocation14_spill] sm:$0xff] %v3023_v24 }
  0xf3   : > { %v457_v23 = vmul.f32 %v2977_v36, %v436_v5  ;;  %v460_v53 = vmul.f32 %v2981_v38, %v430_v47  ;;  %v453_v6 = vmul.f32 %v2977_v36, %v435_v49  ;;  %v456_v54 = vmul.f32 %v2981_v38, %v429_v17  ;;  %4314 = vst [vmem:[#allocation15_spill] sm:$0xff] %v3028_v4 }
  0xf5   : > { %v790_v55 = vpop.permute.xlu1 %789  ;;  %v788_v57 = vpop.permute.xlu0 %787  ;;  %v461_v10 = vpack.c.bf16 %v457_v23, %v453_v6  ;;  %v464_v60 = vpack.c.bf16 %v460_v53, %v456_v54 }
  0xf7   : > { %878 = vmatpush1.bf16.msra.mxu0 %v461_v10  ;;  %920 = vmatprep.subr.bf16.mxu1 %v464_v60 }
  0xf8   : > { %921 = vmatpush1.bf16.msra.mxu1 %v463_v11  ;;  %v2333_v11 = vld [vmem:[%s4228_s2] ss:$8 sps:$4 sm:$0xff]  }
  0xf9   : > { %v794_v58 = vpop.permute.xlu1 %793  ;;  %v792_v59 = vpop.permute.xlu0 %791 }
  0xfa   : > { %v809_v9 = vsel %vm803_vm8, %v790_v55, %v794_v58  ;;  %v808_v14 = vsel %vm803_vm8, %v788_v57, %v792_v59 }
  0xfb   : > { %v832_v25 = vmul.f32 %v3001_v12, %v809_v9  ;;  %v828_v27 = vmul.f32 %v3001_v12, %v808_v14 }
  0xfd   : > { %v798_v28 = vpop.permute.xlu1 %797  ;;  %v796_v31 = vpop.permute.xlu0 %795  ;;  %v836_v5 = vpack.c.bf16 %v832_v25, %v828_v27 }
  0xfe   : > { %v807_v16 = vsel %vm803_vm8, %v794_v58, %v798_v28  ;;  %v806_v3 = vsel %vm803_vm8, %v792_v59, %v796_v31 }
  0xff   : > { %v833_v34 = vmul.f32 %v3010_v20, %v807_v16  ;;  %v829_v35 = vmul.f32 %v3010_v20, %v806_v3 }
 0x101   : > { %v802_v42 = vpop.permute.xlu1 %801  ;;  %v800_v43 = vpop.permute.xlu0 %799  ;;  %v837_v47 = vpack.c.bf16 %v833_v34, %v829_v35 }
 0x102   : > { %v805_v17 = vsel %vm803_vm8, %v798_v28, %v802_v42  ;;  %v811_v49 = vsel %vm803_vm8, %v802_v42, %v790_v55  ;;  %v804_v23 = vsel %vm803_vm8, %v796_v31, %v800_v43  ;;  %v810_v53 = vsel %vm803_vm8, %v800_v43, %v788_v57 }
 0x103   : > { %v834_v6 = vmul.f32 %v3023_v24, %v805_v17  ;;  %v835_v54 = vmul.f32 %v3028_v4, %v811_v49  ;;  %v830_v10 = vmul.f32 %v3023_v24, %v804_v23  ;;  %v831_v60 = vmul.f32 %v3028_v4, %v810_v53  ;;  %893 = vmatprep.subr.bf16.mxu0 %v837_v47 }
 0x104   : > { %894 = vmatpush2.bf16.msra.mxu0 %v836_v5 }
 0x105   : > { %v839_v55 = vpack.c.bf16 %v835_v54, %v831_v60  ;;  %v838_v58 = vpack.c.bf16 %v834_v6, %v830_v10 }
 0x107   : > { %896 = vmatmul.mubr.bf16.vlgmr.msra.gmra.mxu0 %v2333_v11  ;;  %936 = vmatprep.subr.bf16.mxu1 %v839_v55 }
 0x108   : > { %937 = vmatpush2.bf16.msra.mxu1 %v838_v58 }
 0x10b   : > { %939 = vmatmul.mubr.bf16.vlgmr.msra.gmra.mxu1 %v2333_v11 }
 0x10f   : > { %v3045_v57 = vpop.permute.xlu0 %842 }
 0x110   : > { %v3048_v25 = vpop.permute.xlu1 %847 }
 0x1c7   : > { %v897_v59 = vpop.f32.mrf.mxu0 }
 0x1c8   : > { %v898_v9 = vadd.f32 %v897_v59, %v3045_v57 }
 0x1c9   : > { %v899_v14 = vpop.f32.mrf.mxu0 }
 0x1ca   : > { %v949_v27 = vmul.f32 %v898_v9, %v898_v9 }
 0x1cb   : > { %v901_v28 = vpop.f32.mrf.mxu0  ;;  %v940_v31 = vpop.f32.mrf.mxu1 }
 0x1cc   : > { %v957_v16 = vmul.f32 %v949_v27, %v898_v9  ;;  %v902_v3 = vadd.f32 %v901_v28, %v3048_v25  ;;  %v941_v34 = vadd.f32 %v940_v31, %v3045_v57 }
 0x1cd   : > { %v942_v35 = vpop.f32.mrf.mxu1 }
 0x1ce   : > { %v965_v42 = vmul.f32 0.044715, %v957_v16  ;;  %v953_v43 = vmul.f32 %v902_v3, %v902_v3  ;;  %v951_v47 = vmul.f32 %v941_v34, %v941_v34 }
 0x1cf   : > { %v944_v5 = vpop.f32.mrf.mxu1 }
 0x1d0   : > { %v973_v17 = vadd.f32 %v965_v42, %v898_v9  ;;  %v961_v49 = vmul.f32 %v953_v43, %v902_v3  ;;  %v959_v23 = vmul.f32 %v951_v47, %v941_v34  ;;  %v945_v53 = vadd.f32 %v944_v5, %v3048_v25 }
 0x1d2   : > { %v981_v6 = vmul.f32 0.7978846, %v973_v17  ;;  %v969_v54 = vmul.f32 0.044715, %v961_v49  ;;  %v967_v10 = vmul.f32 0.044715, %v959_v23  ;;  %v955_v60 = vmul.f32 %v945_v53, %v945_v53 }
 0x1d4   : > { %2343 = vtanh.f32 %v981_v6  ;;  %v977_v11 = vadd.f32 %v969_v54, %v902_v3  ;;  %v975_v55 = vadd.f32 %v967_v10, %v941_v34  ;;  %v963_v58 = vmul.f32 %v955_v60, %v945_v53 }
 0x1d6   : > { %v985_v59 = vmul.f32 0.7978846, %v977_v11  ;;  %v983_v27 = vmul.f32 0.7978846, %v975_v55  ;;  %v971_v28 = vmul.f32 0.044715, %v963_v58 }
 0x1d8   : > { %2345 = vtanh.f32 %v985_v59  ;;  %v979_v31 = vadd.f32 %v971_v28, %v945_v53 }
 0x1d9   : > { %2347 = vtanh.f32 %v983_v27 }
 0x1da   : > { %v987_v16 = vmul.f32 0.7978846, %v979_v31 }
 0x1dc   : > { %2349 = vtanh.f32 %v987_v16  ;;  %v3092_v16 = vadd.f32 %v942_v35, %v3045_v57 }
 0x1e1   : > { %v2344_v42 = vpop.eup %2343 }
 0x1e2   : > { %v997_v43 = vadd.f32 1.0, %v2344_v42  ;;  %v946_v42 = vpop.f32.mrf.mxu1 }
 0x1e4   : > { %v1005_v47 = vmul.f32 0.5, %v997_v43 }
 0x1e5   : > { %v2346_v5 = vpop.eup %2345 }
 0x1e6   : > { %v2348_v17 = vpop.eup %2347  ;;  %v3053_v49 = vmul.f32 %v1005_v47, %v898_v9  ;;  %v1001_v23 = vadd.f32 1.0, %v2346_v5  ;;  %v952_v47 = vmul.f32 %v3092_v16, %v3092_v16  ;;  %v947_v5 = vadd.f32 %v946_v42, %v3048_v25 }
 0x1e7   : > { %v999_v6 = vadd.f32 1.0, %v2348_v17 }
 0x1e8   : > { %v1009_v54 = vmul.f32 0.5, %v1001_v23  ;;  %1243 = vrot.lane.b32.xlu1 %v3053_v49, %s2429_s24  ;;  %v960_v17 = vmul.f32 %v952_v47, %v3092_v16  ;;  %v956_v23 = vmul.f32 %v947_v5, %v947_v5 }
 0x1e9   : > { %v1007_v10 = vmul.f32 0.5, %v999_v6  ;;  %v2350_v60 = vpop.eup %2349 }
 0x1ea   : > { %v3057_v11 = vmul.f32 %v1009_v54, %v902_v3  ;;  %v1003_v58 = vadd.f32 1.0, %v2350_v60  ;;  %v968_v54 = vmul.f32 0.044715, %v960_v17 }
 0x1eb   : > { %v3059_v55 = vmul.f32 %v1007_v10, %v941_v34  ;;  %v900_v34 = vadd.f32 %v899_v14, %v3045_v57  ;;  %v964_v10 = vmul.f32 %v956_v23, %v947_v5 }
 0x1ec   : > { %1245 = vrot.lane.b32.xlu0 %v3057_v11, %s2429_s24  ;;  %v3065_v9 = vpack.c.bf16 %v3057_v11, %v3053_v49  ;;  %v1011_v59 = vmul.f32 0.5, %v1003_v58 }
 0x1ed   : > { %1251 = vrot.lane.b32.xlu1 %v3059_v55, %s2429_s24  ;;  %v950_v31 = vmul.f32 %v900_v34, %v900_v34 }
 0x1ee   : > { %4315 = vst [vmem:[#allocation16_spill] sm:$0xff] %v3065_v9  ;;  %v3069_v27 = vmul.f32 %v1011_v59, %v945_v53  ;;  %v903_v53 = vpop.f32.mrf.mxu0  ;;  %v976_v59 = vadd.f32 %v968_v54, %v3092_v16 }
 0x1ef   : > { %v3089_v28 = vadd.f32 %v903_v53, %v3048_v25  ;;  %v958_v43 = vmul.f32 %v950_v31, %v900_v34  ;;  %v972_v53 = vmul.f32 0.044715, %v964_v10 }
 0x1f0   : > { %1253 = vrot.lane.b32.xlu0 %v3069_v27, %s2429_s24  ;;  %v3077_v3 = vpack.c.bf16 %v3069_v27, %v3059_v55  ;;  %v984_v42 = vmul.f32 0.7978846, %v976_v59 }
 0x1f1   : > { %1207 = vrot.lane.b32.xlu1 %v3053_v49, %s2430_s25  ;;  %v954_v14 = vmul.f32 %v3089_v28, %v3089_v28  ;;  %v966_v35 = vmul.f32 0.044715, %v958_v43 }
 0x1f2   : > { %4316 = vst [vmem:[#allocation17_spill] sm:$0xff] %v3077_v3 }
 0x1f3   : > { %v962_v57 = vmul.f32 %v954_v14, %v3089_v28  ;;  %v974_v25 = vadd.f32 %v966_v35, %v900_v34  ;;  %v980_v14 = vadd.f32 %v972_v53, %v947_v5 }
 0x1f4   : > { %1209 = vrot.lane.b32.xlu0 %v3057_v11, %s2430_s25 }
 0x1f5   : > { %1215 = vrot.lane.b32.xlu1 %v3059_v55, %s2430_s25  ;;  %v970_v6 = vmul.f32 0.044715, %v962_v57  ;;  %v982_v58 = vmul.f32 0.7978846, %v974_v25  ;;  %v988_v43 = vmul.f32 0.7978846, %v980_v14 }
 0x1f7   : > { %v978_v60 = vadd.f32 %v970_v6, %v3089_v28  ;;  %2351 = vtanh.f32 %v982_v58 }
 0x1f8   : > { %1217 = vrot.lane.b32.xlu0 %v3069_v27, %s2430_s25 }
 0x1f9   : > { %1171 = vrot.lane.b32.xlu1 %v3053_v49, %s2431_s26  ;;  %v986_v31 = vmul.f32 0.7978846, %v978_v60 }
 0x1fb   : > { %2353 = vtanh.f32 %v986_v31 }
 0x1fc   : > { %1173 = vrot.lane.b32.xlu0 %v3057_v11, %s2431_s26  ;;  %2355 = vtanh.f32 %v984_v42  ;;  %v2438_v42 = vmov 1  }
 0x1fd   : > { %1179 = vrot.lane.b32.xlu1 %v3059_v55, %s2431_s26  ;;  %2357 = vtanh.f32 %v988_v43  ;;  %2326 = vset.pattern.permute.xlu0 %v2438_v42 }
 0x1fe   : > { %2325 = vset.pattern.permute.xlu1 %v2438_v42 }
 0x200   : > { %1181 = vrot.lane.b32.xlu0 %v3069_v27, %s2431_s26 }
 0x201   : > { %1131 = vrot.lane.b32.xlu1 %v3053_v49, %s2432_s27 }
 0x204   : > { %1133 = vrot.lane.b32.xlu0 %v3057_v11, %s2432_s27  ;;  %v2352_v47 = vpop.eup %2351 }
 0x205   : > { %1139 = vrot.lane.b32.xlu1 %v3059_v55, %s2432_s27  ;;  %v998_v35 = vadd.f32 1.0, %v2352_v47 }
 0x207   : > { %v1006_v23 = vmul.f32 0.5, %v998_v35 }
 0x208   : > { %1141 = vrot.lane.b32.xlu0 %v3069_v27, %s2432_s27  ;;  %v2354_v57 = vpop.eup %2353 }
 0x209   : > { %1095 = vrot.lane.b32.xlu1 %v3053_v49, %s2433_s28  ;;  %v2356_v17 = vpop.eup %2355  ;;  %v1002_v6 = vadd.f32 1.0, %v2354_v57  ;;  %v3147_v10 = vmul.f32 %v1006_v23, %v900_v34 }
 0x20a   : > { %v1000_v25 = vadd.f32 1.0, %v2356_v17  ;;  %v2358_v54 = vpop.eup %2357 }
 0x20b   : > { %v1010_v60 = vmul.f32 0.5, %v1002_v6  ;;  %v1004_v59 = vadd.f32 1.0, %v2358_v54 }
 0x20c   : > { %1097 = vrot.lane.b32.xlu0 %v3057_v11, %s2433_s28  ;;  %v1008_v58 = vmul.f32 0.5, %v1000_v25 }
 0x20d   : > { %1103 = vrot.lane.b32.xlu1 %v3059_v55, %s2433_s28 }
 0x20e   : > { %v3157_v53 = vmul.f32 %v1008_v58, %v3092_v16  ;;  %v2336_v16 = vld [vmem:[%s4229_s3 + $0x4] ss:$8 sps:$4 sm:$0xff]  }
 0x20f   : > { %2286 = vmatprep.mubr.msk.bf16.mxu0 %vm859_vm0, %v2336_v16  ;;  %2287 = vmatprep.mubr.msk.bf16.mxu1 %vm859_vm0, %v2336_v16 }
 0x210   : > { %1105 = vrot.lane.b32.xlu0 %v3069_v27, %s2433_s28 }
 0x211   : > { %1059 = vrot.lane.b32.xlu1 %v3053_v49, %s2434_s29 }
 0x214   : > { %1061 = vrot.lane.b32.xlu0 %v3057_v11, %s2434_s29 }
 0x215   : > { %1067 = vrot.lane.b32.xlu1 %v3059_v55, %s2434_s29 }
 0x218   : > { %1069 = vrot.lane.b32.xlu0 %v3069_v27, %s2434_s29 }
 0x219   : > { %1023 = vrot.lane.b32.xlu1 %v3053_v49, %s2435_s30 }
 0x21c   : > { %1025 = vrot.lane.b32.xlu0 %v3057_v11, %s2435_s30 }
 0x21d   : > { %1031 = vrot.lane.b32.xlu1 %v3059_v55, %s2435_s30 }
 0x220   : > { %1033 = vrot.lane.b32.xlu0 %v3069_v27, %s2435_s30 }
 0x221   : > { %1279 = vrot.lane.b32.xlu1 %v3053_v49, %s2436_s12  ;;  %v3154_v49 = vmul.f32 %v1010_v60, %v3089_v28 }
 0x224   : > { %1281 = vrot.lane.b32.xlu0 %v3057_v11, %s2436_s12  ;;  %v1012_v11 = vmul.f32 0.5, %v1004_v59 }
 0x225   : > { %1287 = vrot.lane.b32.xlu1 %v3059_v55, %s2436_s12 }
 0x226   : > { %v3163_v55 = vmul.f32 %v1012_v11, %v947_v5 }
 0x228   : > { %1289 = vrot.lane.b32.xlu0 %v3069_v27, %s2436_s12 }
 0x229   : > { %1247 = vrot.lane.b32.xlu1 %v3147_v10, %s2429_s24 }
 0x22c   : > { %1249 = vrot.lane.b32.xlu0 %v3154_v49, %s2429_s24 }
 0x22d   : > { %1255 = vrot.lane.b32.xlu1 %v3157_v53, %s2429_s24 }
 0x230   : > { %1257 = vrot.lane.b32.xlu0 %v3163_v55, %s2429_s24 }
 0x231   : > { %1211 = vrot.lane.b32.xlu1 %v3147_v10, %s2430_s25 }
 0x234   : > { %1213 = vrot.lane.b32.xlu0 %v3154_v49, %s2430_s25 }
 0x235   : > { %1219 = vrot.lane.b32.xlu1 %v3157_v53, %s2430_s25 }
 0x238   : > { %1221 = vrot.lane.b32.xlu0 %v3163_v55, %s2430_s25 }
 0x239   : > { %1175 = vrot.lane.b32.xlu1 %v3147_v10, %s2431_s26 }
 0x23c   : > { %1177 = vrot.lane.b32.xlu0 %v3154_v49, %s2431_s26 }
 0x23d   : > { %1183 = vrot.lane.b32.xlu1 %v3157_v53, %s2431_s26 }
 0x240   : > { %1185 = vrot.lane.b32.xlu0 %v3163_v55, %s2431_s26 }
 0x241   : > { %1135 = vrot.lane.b32.xlu1 %v3147_v10, %s2432_s27 }
 0x244   : > { %1137 = vrot.lane.b32.xlu0 %v3154_v49, %s2432_s27 }
 0x245   : > { %1143 = vrot.lane.b32.xlu1 %v3157_v53, %s2432_s27 }
 0x248   : > { %1145 = vrot.lane.b32.xlu0 %v3163_v55, %s2432_s27 }
 0x249   : > { %1099 = vrot.lane.b32.xlu1 %v3147_v10, %s2433_s28 }
 0x24c   : > { %1101 = vrot.lane.b32.xlu0 %v3154_v49, %s2433_s28 }
 0x24d   : > { %1107 = vrot.lane.b32.xlu1 %v3157_v53, %s2433_s28 }
 0x250   : > { %1109 = vrot.lane.b32.xlu0 %v3163_v55, %s2433_s28 }
 0x251   : > { %1063 = vrot.lane.b32.xlu1 %v3147_v10, %s2434_s29 }
 0x254   : > { %1065 = vrot.lane.b32.xlu0 %v3154_v49, %s2434_s29 }
 0x255   : > { %1071 = vrot.lane.b32.xlu1 %v3157_v53, %s2434_s29 }
 0x258   : > { %1073 = vrot.lane.b32.xlu0 %v3163_v55, %s2434_s29 }
 0x259   : > { %1027 = vrot.lane.b32.xlu1 %v3147_v10, %s2435_s30 }
 0x25a   : > { %v1244_v27 = vpop.permute.xlu1 %1243 }
 0x25c   : > { %1029 = vrot.lane.b32.xlu0 %v3154_v49, %s2435_s30 }
 0x25d   : > { %1035 = vrot.lane.b32.xlu1 %v3157_v53, %s2435_s30 }
 0x25e   : > { %v3213_v34 = vpop.permute.xlu0 %1245 }
 0x25f   : > { %v1252_v28 = vpop.permute.xlu1 %1251 }
 0x260   : > { %1037 = vrot.lane.b32.xlu0 %v3163_v55, %s2435_s30 }
 0x261   : > { %1283 = vrot.lane.b32.xlu1 %v3147_v10, %s2436_s12 }
 0x262   : > { %v1254_v5 = vpop.permute.xlu0 %1253 }
 0x263   : > { %v3224_v31 = vpop.permute.xlu1 %1207 }
 0x264   : > { %1285 = vrot.lane.b32.xlu0 %v3154_v49, %s2436_s12 }
 0x265   : > { %1291 = vrot.lane.b32.xlu1 %v3157_v53, %s2436_s12 }
 0x266   : > { %v3230_v14 = vpop.permute.xlu0 %1209 }
 0x267   : > { %v3232_v43 = vpop.permute.xlu1 %1215 }
 0x268   : > { %1293 = vrot.lane.b32.xlu0 %v3163_v55, %s2436_s12 }
 0x269   : > { %1316 = vperm.xlu1 %2325, %v2734_v41  }
 0x26a   : > { %v3237_v47 = vpop.permute.xlu0 %1217 }
 0x26b   : > { %v3239_v57 = vpop.permute.xlu1 %1171 }
 0x26c   : > { %1320 = vperm.xlu0 %2326, %v2747_v46  }
 0x26e   : > { %v3242_v35 = vpop.permute.xlu0 %1173 }
 0x26f   : > { %v3244_v17 = vpop.permute.xlu1 %1179 }
 0x272   : > { %v3246_v23 = vpop.permute.xlu0 %1181 }
 0x273   : > { %v3248_v6 = vpop.permute.xlu1 %1131 }
 0x276   : > { %v3250_v25 = vpop.permute.xlu0 %1133 }
 0x277   : > { %v3252_v54 = vpop.permute.xlu1 %1139 }
 0x27a   : > { %v3254_v60 = vpop.permute.xlu0 %1141 }
 0x27b   : > { %v3256_v41 = vpop.permute.xlu1 %1095 }
 0x27e   : > { %v3258_v58 = vpop.permute.xlu0 %1097 }
 0x27f   : > { %v3260_v59 = vpop.permute.xlu1 %1103 }
 0x282   : > { %v3262_v46 = vpop.permute.xlu0 %1105 }
 0x283   : > { %v3264_v11 = vpop.permute.xlu1 %1059 }
 0x286   : > { %v3266_v16 = vpop.permute.xlu0 %1061 }
 0x287   : > { %4317 = vst [vmem:[#allocation18_spill] sm:$0xff] %v3266_v16  ;;  %v3268_v42 = vpop.permute.xlu1 %1067 }
 0x288   : > { %4318 = vst [vmem:[#allocation19_spill] sm:$0xff] %v3268_v42 }
 0x28a   : > { %v3270_v26 = vpop.permute.xlu0 %1069 }
 0x28b   : > { %4319 = vst [vmem:[#allocation20_spill] sm:$0xff] %v3270_v26  ;;  %v3272_v48 = vpop.permute.xlu1 %1023 }
 0x28c   : > { %4320 = vst [vmem:[#allocation21_spill] sm:$0xff] %v3272_v48 }
 0x28e   : > { %v3274_v4 = vpop.permute.xlu0 %1025 }
 0x28f   : > { %4321 = vst [vmem:[#allocation22_spill] sm:$0xff] %v3274_v4  ;;  %v3276_v24 = vpop.permute.xlu1 %1031 }
 0x290   : > { %4322 = vst [vmem:[#allocation23_spill] sm:$0xff] %v3276_v24 }
 0x292   : > { %v3278_v20 = vpop.permute.xlu0 %1033 }
 0x293   : > { %4323 = vst [vmem:[#allocation24_spill] sm:$0xff] %v3278_v20  ;;  %v3280_v12 = vpop.permute.xlu1 %1279 }
 0x294   : > { %4324 = vst [vmem:[#allocation25_spill] sm:$0xff] %v3280_v12 }
 0x296   : > { %v3282_v38 = vpop.permute.xlu0 %1281 }
 0x297   : > { %4325 = vst [vmem:[#allocation26_spill] sm:$0xff] %v3282_v38  ;;  %v3284_v36 = vpop.permute.xlu1 %1287 }
 0x298   : > { %4326 = vst [vmem:[#allocation27_spill] sm:$0xff] %v3284_v36 }
 0x29a   : > { %v3286_v29 = vpop.permute.xlu0 %1289 }
 0x29b   : > { %4327 = vst [vmem:[#allocation28_spill] sm:$0xff] %v3286_v29  ;;  %v1248_v0 = vpop.permute.xlu1 %1247 }
 0x29c   : > { %v1261_v2 = vsel %vm750_vm1, %v1248_v0, %v1252_v28  ;;  %v1263_v48 = vsel %vm750_vm1, %v1244_v27, %v1248_v0 }
 0x29d   : > { %v1267_v12 = vmul.f32 %v1263_v48, %v2697_v22  ;;  %v1268_v29 = vmul.f32 %v1261_v2, %v2694_v21 }
 0x29e   : > { %v1250_v4 = vpop.permute.xlu0 %1249 }
 0x29f   : > { %v1256_v40 = vpop.permute.xlu1 %1255  ;;  %v1262_v24 = vsel %vm750_vm1, %v1250_v4, %v1254_v5  ;;  %v1264_v38 = vsel %vm750_vm1, %v3213_v34, %v1250_v4 }
 0x2a0   : > { %v1271_v36 = vmul.f32 %v1264_v38, %v2697_v22  ;;  %v1272_v20 = vmul.f32 %v1262_v24, %v2694_v21  ;;  %v1259_v0 = vsel %vm750_vm1, %v1252_v28, %v1256_v40  ;;  %v1265_v1 = vsel %vm750_vm1, %v1256_v40, %v1244_v27 }
 0x2a1   : > { %v1269_v48 = vmul.f32 %v1259_v0, %v2722_v33  ;;  %v1270_v38 = vmul.f32 %v1265_v1, %v2719_v32 }
 0x2a2   : > { %v1275_v42 = vpack.c.bf16 %v1271_v36, %v1267_v12  ;;  %v1258_v26 = vpop.permute.xlu0 %1257  ;;  %v1276_v16 = vpack.c.bf16 %v1272_v20, %v1268_v29 }
 0x2a3   : > { %v1212_v15 = vpop.permute.xlu1 %1211  ;;  %v1260_v4 = vsel %vm750_vm1, %v1254_v5, %v1258_v26  ;;  %v1266_v2 = vsel %vm750_vm1, %v1258_v26, %v3213_v34 }
 0x2a4   : > { %v1273_v24 = vmul.f32 %v1260_v4, %v2722_v33  ;;  %v1274_v28 = vmul.f32 %v1266_v2, %v2719_v32  ;;  %1335 = vmatprep.subr.bf16.mxu0 %v1276_v16  ;;  %v1225_v40 = vsel %vm697_vm2, %v1212_v15, %v3232_v43  ;;  %v1227_v29 = vsel %vm697_vm2, %v3224_v31, %v1212_v15 }
 0x2a5   : > { %1336 = vmatpush1.bf16.msra.mxu0 %v1275_v42  ;;  %v1231_v34 = vmul.f32 %v1227_v29, %v2758_v56  ;;  %v1232_v5 = vmul.f32 %v1225_v40, %v2765_v61 }
 0x2a6   : > { %v1277_v36 = vpack.c.bf16 %v1273_v24, %v1269_v48  ;;  %v1214_v26 = vpop.permute.xlu0 %1213  ;;  %v1278_v20 = vpack.c.bf16 %v1274_v28, %v1270_v38 }
 0x2a7   : > { %v1220_v12 = vpop.permute.xlu1 %1219  ;;  %v1226_v1 = vsel %vm697_vm2, %v1214_v26, %v3237_v47  ;;  %v1228_v27 = vsel %vm697_vm2, %v3230_v14, %v1214_v26 }
 0x2a8   : > { %v1235_v16 = vmul.f32 %v1228_v27, %v2758_v56  ;;  %v1236_v15 = vmul.f32 %v1226_v1, %v2765_v61  ;;  %1378 = vmatprep.subr.bf16.mxu1 %v1278_v20  ;;  %v1223_v42 = vsel %vm697_vm2, %v3232_v43, %v1220_v12  ;;  %v1229_v0 = vsel %vm697_vm2, %v1220_v12, %v3224_v31 }
 0x2a9   : > { %1379 = vmatpush1.bf16.msra.mxu1 %v1277_v36  ;;  %v1233_v40 = vmul.f32 %v1223_v42, %v2776_v18  ;;  %v1234_v43 = vmul.f32 %v1229_v0, %v2779_v19 }
 0x2aa   : > { %v1239_v4 = vpack.c.bf16 %v1235_v16, %v1231_v34  ;;  %v1222_v2 = vpop.permute.xlu0 %1221  ;;  %v1240_v38 = vpack.c.bf16 %v1236_v15, %v1232_v5 }
 0x2ab   : > { %v1176_v48 = vpop.permute.xlu1 %1175  ;;  %v1224_v24 = vsel %vm697_vm2, %v3237_v47, %v1222_v2  ;;  %v1230_v28 = vsel %vm697_vm2, %v1222_v2, %v3230_v14 }
 0x2ac   : > { %v1237_v29 = vmul.f32 %v1224_v24, %v2776_v18  ;;  %v1238_v31 = vmul.f32 %v1230_v28, %v2779_v19  ;;  %1337 = vmatprep.subr.bf16.mxu0 %v1240_v38  ;;  %v1189_v36 = vsel %vm644_vm3, %v1176_v48, %v3244_v17  ;;  %v1191_v47 = vsel %vm644_vm3, %v3239_v57, %v1176_v48 }
 0x2ad   : > { %1338 = vmatpush1.bf16.msra.mxu0 %v1239_v4  ;;  %v1195_v34 = vmul.f32 %v1191_v47, %v2796_v45  ;;  %v1196_v5 = vmul.f32 %v1189_v36, %v2803_v51 }
 0x2ae   : > { %v1241_v26 = vpack.c.bf16 %v1237_v29, %v1233_v40  ;;  %v1178_v14 = vpop.permute.xlu0 %1177  ;;  %v1242_v20 = vpack.c.bf16 %v1238_v31, %v1234_v43 }
 0x2af   : > { %v1184_v12 = vpop.permute.xlu1 %1183  ;;  %v1190_v1 = vsel %vm644_vm3, %v1178_v14, %v3246_v23  ;;  %v1192_v27 = vsel %vm644_vm3, %v3242_v35, %v1178_v14 }
 0x2b0   : > { %v1199_v16 = vmul.f32 %v1192_v27, %v2796_v45  ;;  %v1200_v15 = vmul.f32 %v1190_v1, %v2803_v51  ;;  %1380 = vmatprep.subr.bf16.mxu1 %v1242_v20  ;;  %v1187_v42 = vsel %vm644_vm3, %v3244_v17, %v1184_v12  ;;  %v1193_v0 = vsel %vm644_vm3, %v1184_v12, %v3239_v57 }
 0x2b1   : > { %1381 = vmatpush1.bf16.msra.mxu1 %v1241_v26  ;;  %v3376_v17 = vpack.c.bf16 %v3154_v49, %v3147_v10  ;;  %v1197_v40 = vmul.f32 %v1187_v42, %v2814_v62  ;;  %v1198_v57 = vmul.f32 %v1193_v0, %v2817_v63  ;;  %v3396_v12 = vpack.c.bf16 %v3163_v55, %v3157_v53 }
 0x2b2   : > { %v1203_v4 = vpack.c.bf16 %v1199_v16, %v1195_v34  ;;  %v1186_v2 = vpop.permute.xlu0 %1185  ;;  %v1204_v38 = vpack.c.bf16 %v1200_v15, %v1196_v5 }
 0x2b3   : > { %v1136_v48 = vpop.permute.xlu1 %1135  ;;  %v1188_v24 = vsel %vm644_vm3, %v3246_v23, %v1186_v2  ;;  %v1194_v28 = vsel %vm644_vm3, %v1186_v2, %v3242_v35  ;;  %4328 = vst [vmem:[#allocation29_spill] sm:$0xff] %v3376_v17  ;;  %4329 = vst [vmem:[#allocation30_spill] sm:$0xff] %v3396_v12 }
 0x2b4   : > { %v1201_v43 = vmul.f32 %v1188_v24, %v2814_v62  ;;  %v1202_v29 = vmul.f32 %v1194_v28, %v2817_v63  ;;  %1339 = vmatprep.subr.bf16.mxu0 %v1204_v38  ;;  %v1151_v23 = vsel %vm587_vm4, %v3248_v6, %v1136_v48  ;;  %v1149_v53 = vsel %vm587_vm4, %v1136_v48, %v3252_v54 }
 0x2b5   : > { %1340 = vmatpush1.bf16.msra.mxu0 %v1203_v4  ;;  %v1156_v47 = vmul.f32 %v1151_v23, %v2840_v39 }
 0x2b6   : > { %v1205_v31 = vpack.c.bf16 %v1201_v43, %v1197_v40  ;;  %v1138_v35 = vpop.permute.xlu0 %1137  ;;  %1341 = vmatprep.subr.bf16.mxu0 %v3376_v17  ;;  %v1206_v49 = vpack.c.bf16 %v1202_v29, %v1198_v57 }
 0x2b7   : > { %v1144_v10 = vpop.permute.xlu1 %1143  ;;  %v1152_v36 = vsel %vm587_vm4, %v3250_v25, %v1138_v35  ;;  %v1150_v26 = vsel %vm587_vm4, %v1138_v35, %v3254_v60 }
 0x2b8   : > { %v1160_v14 = vmul.f32 %v1152_v36, %v2840_v39  ;;  %1382 = vmatprep.subr.bf16.mxu1 %v1206_v49  ;;  %v1147_v20 = vsel %vm587_vm4, %v3252_v54, %v1144_v10  ;;  %v1153_v1 = vsel %vm587_vm4, %v1144_v10, %v3248_v6  ;;  %v1161_v55 = vmul.f32 %v1150_v26, %v2851_v44 }
 0x2b9   : > { %1342 = vmatpush1.bf16.msra.mxu0 %v3065_v9  ;;  %1383 = vmatpush1.bf16.msra.mxu1 %v1205_v31  ;;  %v1155_v15 = vmul.f32 %v1153_v1, %v2858_v50  ;;  %v1158_v42 = vmul.f32 %v1147_v20, %v2861_v52 }
 0x2ba   : > { %v1146_v27 = vpop.permute.xlu0 %1145  ;;  %1384 = vmatprep.subr.bf16.mxu1 %v3396_v12  ;;  %v1164_v5 = vpack.c.bf16 %v1160_v14, %v1156_v47 }
 0x2bb   : > { %v1100_v34 = vpop.permute.xlu1 %1099  ;;  %v1148_v16 = vsel %vm587_vm4, %v3254_v60, %v1146_v27  ;;  %v1154_v6 = vsel %vm587_vm4, %v1146_v27, %v3250_v25  ;;  %v1157_v60 = vmul.f32 %v1149_v53, %v2851_v44 }
 0x2bc   : > { %v1159_v0 = vmul.f32 %v1154_v6, %v2858_v50  ;;  %v1162_v4 = vmul.f32 %v1148_v16, %v2861_v52  ;;  %1343 = vmatprep.subr.bf16.mxu0 %v1164_v5  ;;  %v1115_v54 = vsel %vm534_vm5, %v3256_v41, %v1100_v34  ;;  %v1113_v49 = vsel %vm534_vm5, %v1100_v34, %v3260_v59  ;;  %v4331_v6 = vld [vmem:[#allocation3_spill] sm:$0xff] }
 0x2bd   : > { %1385 = vmatpush1.bf16.msra.mxu1 %v3077_v3  ;;  %v1165_v28 = vpack.c.bf16 %v1161_v55, %v1157_v60  ;;  %v1120_v40 = vmul.f32 %v1115_v54, %v2880_v30  ;;  %v1121_v27 = vmul.f32 %v1113_v49, %v2889_v37  ;;  %v4333_v54 = vld [vmem:[#allocation19_spill] sm:$0xff] }
 0x2be   : > { %v1163_v2 = vpack.c.bf16 %v1159_v0, %v1155_v15  ;;  %v1102_v48 = vpop.permute.xlu0 %1101  ;;  %v1166_v38 = vpack.c.bf16 %v1162_v4, %v1158_v42  ;;  %v4332_v42 = vld [vmem:[#allocation20_spill] sm:$0xff] }
 0x2bf   : > { %v1108_v25 = vpop.permute.xlu1 %1107  ;;  %v1116_v24 = vsel %vm534_vm5, %v3258_v58, %v1102_v48  ;;  %v1114_v57 = vsel %vm534_vm5, %v1102_v48, %v3262_v46 }
 0x2c0   : > { %v1124_v43 = vmul.f32 %v1116_v24, %v2880_v30  ;;  %1344 = vmatpush1.bf16.msra.mxu0 %v1163_v2  ;;  %v1111_v29 = vsel %vm534_vm5, %v3260_v59, %v1108_v25  ;;  %v1117_v23 = vsel %vm534_vm5, %v1108_v25, %v3256_v41  ;;  %1386 = vmatprep.subr.bf16.mxu1 %v1166_v38 }
 0x2c1   : > { %1387 = vmatpush1.bf16.msra.mxu1 %v1165_v28  ;;  %v1125_v36 = vmul.f32 %v1114_v57, %v2889_v37  ;;  %v1119_v41 = vmul.f32 %v1117_v23, %v2896_v7  ;;  %v1122_v14 = vmul.f32 %v1111_v29, %v2899_v8  ;;  %v4334_v28 = vld [vmem:[#allocation4_spill] sm:$0xff]  ;;  %v4336_v23 = vld [vmem:[#allocation6_spill] sm:$0xff] }
 0x2c2   : > { %v1110_v31 = vpop.permute.xlu0 %1109  ;;  %v1128_v10 = vpack.c.bf16 %v1124_v43, %v1120_v40 }
 0x2c3   : > { %v1064_v35 = vpop.permute.xlu1 %1063  ;;  %v1112_v47 = vsel %vm534_vm5, %v3262_v46, %v1110_v31  ;;  %v1118_v26 = vsel %vm534_vm5, %v1110_v31, %v3258_v58  ;;  %v4330_v58 = vld [vmem:[#allocation18_spill] sm:$0xff]  ;;  %v1129_v16 = vpack.c.bf16 %v1125_v36, %v1121_v27 }
 0x2c4   : > { %v1123_v20 = vmul.f32 %v1118_v26, %v2896_v7  ;;  %v1126_v1 = vmul.f32 %v1112_v47, %v2899_v8  ;;  %1345 = vmatprep.subr.bf16.mxu0 %v1128_v10  ;;  %v1079_v59 = vsel %vm481_vm6, %v3264_v11, %v1064_v35  ;;  %v1077_v24 = vsel %vm481_vm6, %v1064_v35, %v4333_v54  ;;  %v4337_v35 = vld [vmem:[#allocation21_spill] sm:$0xff] }
 0x2c5   : > { %v1084_v15 = vmul.f32 %v1079_v59, %v4331_v6  ;;  %v1085_v47 = vmul.f32 %v1077_v24, %v4334_v28  ;;  %v4343_v24 = vld [vmem:[#allocation10_spill] sm:$0xff] }
 0x2c6   : > { %v1127_v46 = vpack.c.bf16 %v1123_v20, %v1119_v41  ;;  %v1066_v34 = vpop.permute.xlu0 %1065  ;;  %v1130_v53 = vpack.c.bf16 %v1126_v1, %v1122_v14  ;;  %v4338_v1 = vld [vmem:[#allocation22_spill] sm:$0xff] }
 0x2c7   : > { %v1072_v5 = vpop.permute.xlu1 %1071  ;;  %v1080_v55 = vsel %vm481_vm6, %v4330_v58, %v1066_v34  ;;  %v1078_v0 = vsel %vm481_vm6, %v1066_v34, %v4332_v42 }
 0x2c8   : > { %v1088_v4 = vmul.f32 %v1080_v55, %v4331_v6  ;;  %1346 = vmatpush1.bf16.msra.mxu0 %v1127_v46  ;;  %v1075_v60 = vsel %vm481_vm6, %v4333_v54, %v1072_v5  ;;  %v1081_v2 = vsel %vm481_vm6, %v1072_v5, %v3264_v11  ;;  %1388 = vmatprep.subr.bf16.mxu1 %v1130_v53  ;;  %v4335_v11 = vld [vmem:[#allocation5_spill] sm:$0xff]  ;;  %v4339_v46 = vld [vmem:[#allocation8_spill] sm:$0xff]  ;;  %v4341_v55 = vld [vmem:[#allocation23_spill] sm:$0xff] }
 0x2c9   : > { %1389 = vmatpush1.bf16.msra.mxu1 %v1129_v16  ;;  %v1089_v40 = vmul.f32 %v1078_v0, %v4334_v28  ;;  %v1083_v29 = vmul.f32 %v1081_v2, %v4335_v11  ;;  %v1086_v31 = vmul.f32 %v1075_v60, %v4336_v23  ;;  %v4340_v5 = vld [vmem:[#allocation24_spill] sm:$0xff]  ;;  %v4342_v60 = vld [vmem:[#allocation9_spill] sm:$0xff] }
 0x2ca   : > { %v1074_v48 = vpop.permute.xlu0 %1073  ;;  %v1092_v38 = vpack.c.bf16 %v1088_v4, %v1084_v15 }
 0x2cb   : > { %v1028_v25 = vpop.permute.xlu1 %1027  ;;  %v1076_v57 = vsel %vm481_vm6, %v4332_v42, %v1074_v48  ;;  %v1082_v43 = vsel %vm481_vm6, %v1074_v48, %v4330_v58  ;;  %v1093_v27 = vpack.c.bf16 %v1089_v40, %v1085_v47 }
 0x2cc   : > { %v1087_v10 = vmul.f32 %v1082_v43, %v4335_v11  ;;  %v1090_v49 = vmul.f32 %v1076_v57, %v4336_v23  ;;  %1347 = vmatprep.subr.bf16.mxu0 %v1092_v38  ;;  %v1043_v36 = vsel %vm428_vm7, %v4337_v35, %v1028_v25  ;;  %v1041_v42 = vsel %vm428_vm7, %v1028_v25, %v4341_v55  ;;  %v4344_v57 = vld [vmem:[#allocation11_spill] sm:$0xff] }
 0x2cd   : > { %v1048_v34 = vmul.f32 %v1043_v36, %v4339_v46 }
 0x2ce   : > { %v1091_v26 = vpack.c.bf16 %v1087_v10, %v1083_v29  ;;  %v1030_v41 = vpop.permute.xlu0 %1029  ;;  %v1094_v20 = vpack.c.bf16 %v1090_v49, %v1086_v31  ;;  %v1049_v31 = vmul.f32 %v1041_v42, %v4342_v60  ;;  %v4345_v10 = vld [vmem:[#allocation27_spill] sm:$0xff] }
 0x2cf   : > { %v1036_v14 = vpop.permute.xlu1 %1035  ;;  %v1044_v59 = vsel %vm428_vm7, %v4338_v1, %v1030_v41  ;;  %v1042_v53 = vsel %vm428_vm7, %v1030_v41, %v4340_v5 }
 0x2d0   : > { %v1052_v58 = vmul.f32 %v1044_v59, %v4339_v46  ;;  %1348 = vmatpush1.bf16.msra.mxu0 %v1091_v26  ;;  %v1039_v16 = vsel %vm428_vm7, %v4341_v55, %v1036_v14  ;;  %v1045_v15 = vsel %vm428_vm7, %v1036_v14, %v4337_v35  ;;  %1390 = vmatprep.subr.bf16.mxu1 %v1094_v20  ;;  %v4346_v35 = vld [vmem:[#allocation25_spill] sm:$0xff] }
 0x2d1   : > { %1391 = vmatpush1.bf16.msra.mxu1 %v1093_v27  ;;  %v1053_v2 = vmul.f32 %v1042_v53, %v4342_v60  ;;  %v1047_v40 = vmul.f32 %v1045_v15, %v4343_v24  ;;  %v1050_v43 = vmul.f32 %v1039_v16, %v4344_v57  ;;  %v4348_v27 = vld [vmem:[#allocation26_spill] sm:$0xff] }
 0x2d2   : > { %v1038_v0 = vpop.permute.xlu0 %1037  ;;  %v1056_v54 = vpack.c.bf16 %v1052_v58, %v1048_v34  ;;  %v4350_v58 = vld [vmem:[#allocation13_spill] sm:$0xff] }
 0x2d3   : > { %v1284_v4 = vpop.permute.xlu1 %1283  ;;  %v1040_v48 = vsel %vm428_vm7, %v4340_v5, %v1038_v0  ;;  %v1046_v38 = vsel %vm428_vm7, %v1038_v0, %v4338_v1  ;;  %v1057_v20 = vpack.c.bf16 %v1053_v2, %v1049_v31  ;;  %v4347_v1 = vld [vmem:[#allocation28_spill] sm:$0xff] }
 0x2d4   : > { %v1051_v25 = vmul.f32 %v1046_v38, %v4343_v24  ;;  %v1054_v29 = vmul.f32 %v1040_v48, %v4344_v57  ;;  %1349 = vmatprep.subr.bf16.mxu0 %v1056_v54  ;;  %v1297_v49 = vsel %vm803_vm8, %v1284_v4, %v4345_v10  ;;  %v1299_v36 = vsel %vm803_vm8, %v4346_v35, %v1284_v4  ;;  %v4349_v5 = vld [vmem:[#allocation12_spill] sm:$0xff] }
 0x2d5   : > { %v1303_v53 = vmul.f32 %v4349_v5, %v1299_v36  ;;  %v1304_v55 = vmul.f32 %v4350_v58, %v1297_v49  ;;  %v2338_v49 = vld [vmem:[%s4229_s3] ss:$8 sps:$4 sm:$0xff]  }
 0x2d6   : > { %v1055_v47 = vpack.c.bf16 %v1051_v25, %v1047_v40  ;;  %v1286_v26 = vpop.permute.xlu0 %1285  ;;  %v1058_v14 = vpack.c.bf16 %v1054_v29, %v1050_v43  ;;  %v4351_v40 = vld [vmem:[#allocation14_spill] sm:$0xff]  ;;  %v4352_v25 = vld [vmem:[#allocation15_spill] sm:$0xff] }
 0x2d7   : > { %v1292_v41 = vpop.permute.xlu1 %1291  ;;  %v1298_v59 = vsel %vm803_vm8, %v1286_v26, %v4347_v1  ;;  %v1300_v34 = vsel %vm803_vm8, %v4348_v27, %v1286_v26 }
 0x2d8   : > { %v1307_v16 = vmul.f32 %v4349_v5, %v1300_v34  ;;  %v1308_v15 = vmul.f32 %v4350_v58, %v1298_v59  ;;  %1350 = vmatpush1.bf16.msra.mxu0 %v1055_v47  ;;  %v1295_v42 = vsel %vm803_vm8, %v4345_v10, %v1292_v41  ;;  %v1301_v0 = vsel %vm803_vm8, %v1292_v41, %v4346_v35 }
 0x2d9   : > { %1392 = vmatprep.subr.bf16.mxu1 %v1058_v14  ;;  %v1305_v43 = vmul.f32 %v4351_v40, %v1295_v42  ;;  %v1306_v29 = vmul.f32 %v4352_v25, %v1301_v0 }
 0x2da   : > { %v1311_v4 = vpack.c.bf16 %v1307_v16, %v1303_v53  ;;  %1393 = vmatpush1.bf16.msra.mxu1 %v1057_v20  ;;  %v1294_v54 = vpop.permute.xlu0 %1293  ;;  %v1312_v2 = vpack.c.bf16 %v1308_v15, %v1304_v55 }
 0x2db   : > { %v1296_v48 = vsel %vm803_vm8, %v4347_v1, %v1294_v54  ;;  %v1302_v38 = vsel %vm803_vm8, %v1294_v54, %v4348_v27 }
 0x2dc   : > { %v1309_v31 = vmul.f32 %v4351_v40, %v1296_v48  ;;  %v1310_v10 = vmul.f32 %v4352_v25, %v1302_v38  ;;  %1365 = vmatprep.subr.bf16.mxu0 %v1312_v2 }
 0x2dd   : > { %1366 = vmatpush2.bf16.msra.mxu0 %v1311_v4 }
 0x2de   : > { %v1313_v35 = vpack.c.bf16 %v1309_v31, %v1305_v43  ;;  %v1314_v36 = vpack.c.bf16 %v1310_v10, %v1306_v29 }
 0x2e0   : > { %1368 = vmatmul.mubr.bf16.vlgmr.msra.gmra.mxu0 %v2338_v49  ;;  %1408 = vmatprep.subr.bf16.mxu1 %v1314_v36 }
 0x2e1   : > { %1409 = vmatpush2.bf16.msra.mxu1 %v1313_v35 }
 0x2e4   : > { %1411 = vmatmul.mubr.bf16.vlgmr.msra.gmra.mxu1 %v2338_v49  ;;  %v3553_v47 = vpop.permute.xlu1 %1316 }
 0x2e7   : > { %v3556_v20 = vpop.permute.xlu0 %1320 }
 0x3a0   : > { %v1369_v26 = vpop.f32.mrf.mxu0 }
 0x3a1   : > { %v1370_v41 = vadd.f32 %v1369_v26, %v3553_v47 }
 0x3a2   : > { %v1371_v14 = vpop.f32.mrf.mxu0 }
 0x3a3   : > { %v1421_v1 = vmul.f32 %v1370_v41, %v1370_v41 }
 0x3a4   : > { %v1373_v59 = vpop.f32.mrf.mxu0  ;;  %v1412_v27 = vpop.f32.mrf.mxu1 }
 0x3a5   : > { %v1429_v34 = vmul.f32 %v1421_v1, %v1370_v41  ;;  %v1374_v5 = vadd.f32 %v1373_v59, %v3556_v20  ;;  %v1413_v53 = vadd.f32 %v1412_v27, %v3553_v47 }
 0x3a6   : > { %v1414_v58 = vpop.f32.mrf.mxu1 }
 0x3a7   : > { %v1437_v55 = vmul.f32 0.044715, %v1429_v34  ;;  %v1425_v16 = vmul.f32 %v1374_v5, %v1374_v5  ;;  %v1423_v15 = vmul.f32 %v1413_v53, %v1413_v53 }
 0x3a8   : > { %v1416_v42 = vpop.f32.mrf.mxu1 }
 0x3a9   : > { %v1445_v0 = vadd.f32 %v1437_v55, %v1370_v41  ;;  %v1433_v4 = vmul.f32 %v1425_v16, %v1374_v5  ;;  %v1431_v54 = vmul.f32 %v1423_v15, %v1413_v53  ;;  %v1417_v2 = vadd.f32 %v1416_v42, %v3556_v20 }
 0x3ab   : > { %v1453_v48 = vmul.f32 0.7978846, %v1445_v0  ;;  %v1441_v38 = vmul.f32 0.044715, %v1433_v4  ;;  %v1439_v40 = vmul.f32 0.044715, %v1431_v54  ;;  %v1427_v43 = vmul.f32 %v1417_v2, %v1417_v2 }
 0x3ad   : > { %2359 = vtanh.f32 %v1453_v48  ;;  %v1449_v25 = vadd.f32 %v1441_v38, %v1374_v5  ;;  %v1447_v29 = vadd.f32 %v1439_v40, %v1413_v53  ;;  %v1435_v31 = vmul.f32 %v1427_v43, %v1417_v2 }
 0x3af   : > { %v1457_v10 = vmul.f32 0.7978846, %v1449_v25  ;;  %v1455_v49 = vmul.f32 0.7978846, %v1447_v29  ;;  %v1443_v35 = vmul.f32 0.044715, %v1435_v31 }
 0x3b1   : > { %2361 = vtanh.f32 %v1457_v10  ;;  %v1451_v36 = vadd.f32 %v1443_v35, %v1417_v2  ;;  %v3600_v10 = vadd.f32 %v1414_v58, %v3553_v47 }
 0x3b2   : > { %2363 = vtanh.f32 %v1455_v49  ;;  %v1418_v49 = vpop.f32.mrf.mxu1 }
 0x3b3   : > { %v1459_v26 = vmul.f32 0.7978846, %v1451_v36  ;;  %v1424_v36 = vmul.f32 %v3600_v10, %v3600_v10 }
 0x3b5   : > { %2365 = vtanh.f32 %v1459_v26  ;;  %v1419_v26 = vadd.f32 %v1418_v49, %v3556_v20 }
 0x3ba   : > { %v2360_v1 = vpop.eup %2359 }
 0x3bb   : > { %v1469_v59 = vadd.f32 1.0, %v2360_v1  ;;  %v1432_v1 = vmul.f32 %v1424_v36, %v3600_v10 }
 0x3bd   : > { %v1477_v27 = vmul.f32 0.5, %v1469_v59  ;;  %v1428_v59 = vmul.f32 %v1419_v26, %v1419_v26 }
 0x3be   : > { %v2362_v34 = vpop.eup %2361 }
 0x3bf   : > { %v2364_v55 = vpop.eup %2363  ;;  %v3561_v16 = vmul.f32 %v1477_v27, %v1370_v41  ;;  %v1473_v15 = vadd.f32 1.0, %v2362_v34  ;;  %v1440_v34 = vmul.f32 0.044715, %v1432_v1 }
 0x3c0   : > { %v1471_v42 = vadd.f32 1.0, %v2364_v55  ;;  %v1436_v55 = vmul.f32 %v1428_v59, %v1419_v26 }
 0x3c1   : > { %v1481_v0 = vmul.f32 0.5, %v1473_v15  ;;  %1715 = vrot.lane.b32.xlu1 %v3561_v16, %s2429_s24 }
 0x3c2   : > { %v1479_v4 = vmul.f32 0.5, %v1471_v42  ;;  %v2366_v54 = vpop.eup %2365 }
 0x3c3   : > { %v3565_v48 = vmul.f32 %v1481_v0, %v1374_v5  ;;  %v1475_v40 = vadd.f32 1.0, %v2366_v54  ;;  %v1448_v0 = vadd.f32 %v1440_v34, %v3600_v10 }
 0x3c4   : > { %v3567_v38 = vmul.f32 %v1479_v4, %v1413_v53  ;;  %v1372_v53 = vadd.f32 %v1371_v14, %v3553_v47  ;;  %v1444_v4 = vmul.f32 0.044715, %v1436_v55 }
 0x3c5   : > { %1717 = vrot.lane.b32.xlu1 %v3565_v48, %s2429_s24  ;;  %v3573_v41 = vpack.c.bf16 %v3565_v48, %v3561_v16  ;;  %v1483_v43 = vmul.f32 0.5, %v1475_v40  ;;  %v1456_v40 = vmul.f32 0.7978846, %v1448_v0 }
 0x3c6   : > { %1723 = vrot.lane.b32.xlu0 %v3567_v38, %s2429_s24  ;;  %v1422_v31 = vmul.f32 %v1372_v53, %v1372_v53 }
 0x3c7   : > { %v3577_v25 = vmul.f32 %v1483_v43, %v1417_v2  ;;  %v1375_v2 = vpop.f32.mrf.mxu0  ;;  %v1452_v43 = vadd.f32 %v1444_v4, %v1419_v26 }
 0x3c8   : > { %v3597_v29 = vadd.f32 %v1375_v2, %v3556_v20  ;;  %v1430_v35 = vmul.f32 %v1422_v31, %v1372_v53 }
 0x3c9   : > { %1725 = vrot.lane.b32.xlu1 %v3577_v25, %s2429_s24  ;;  %v3585_v5 = vpack.c.bf16 %v3577_v25, %v3567_v38  ;;  %v1460_v2 = vmul.f32 0.7978846, %v1452_v43 }
 0x3ca   : > { %1679 = vrot.lane.b32.xlu0 %v3561_v16, %s2430_s25  ;;  %v1426_v14 = vmul.f32 %v3597_v29, %v3597_v29  ;;  %v1438_v58 = vmul.f32 0.044715, %v1430_v35 }
 0x3cc   : > { %v1434_v47 = vmul.f32 %v1426_v14, %v3597_v29  ;;  %v1446_v20 = vadd.f32 %v1438_v58, %v1372_v53 }
 0x3cd   : > { %1681 = vrot.lane.b32.xlu1 %v3565_v48, %s2430_s25 }
 0x3ce   : > { %1687 = vrot.lane.b32.xlu0 %v3567_v38, %s2430_s25  ;;  %v1442_v27 = vmul.f32 0.044715, %v1434_v47  ;;  %v1454_v42 = vmul.f32 0.7978846, %v1446_v20 }
 0x3d0   : > { %v1450_v15 = vadd.f32 %v1442_v27, %v3597_v29  ;;  %2367 = vtanh.f32 %v1454_v42  ;;  %v2439_v42 = vmov 2  }
 0x3d1   : > { %1689 = vrot.lane.b32.xlu1 %v3577_v25, %s2430_s25  ;;  %2327 = vset.pattern.permute.xlu0 %v2439_v42 }
 0x3d2   : > { %1643 = vrot.lane.b32.xlu0 %v3561_v16, %s2431_s26  ;;  %v1458_v54 = vmul.f32 0.7978846, %v1450_v15  ;;  %2328 = vset.pattern.permute.xlu1 %v2439_v42 }
 0x3d4   : > { %2369 = vtanh.f32 %v1458_v54  ;;  %v3747_v54 = vld [vmem:[%s4232_s6] sm:$0xff] }
 0x3d5   : > { %1645 = vrot.lane.b32.xlu1 %v3565_v48, %s2431_s26  ;;  %2371 = vtanh.f32 %v1456_v40  ;;  %4353 = vst [vmem:[#allocation18_spill] sm:$0xff] %v3747_v54 }
 0x3d6   : > { %1651 = vrot.lane.b32.xlu0 %v3567_v38, %s2431_s26  ;;  %2373 = vtanh.f32 %v1460_v2  ;;  %v3757_v2 = vld [vmem:[%s4232_s6 + $0x8] sm:$0xff] }
 0x3d7   : > { %4354 = vst [vmem:[#allocation20_spill] sm:$0xff] %v3757_v2 }
 0x3d9   : > { %1653 = vrot.lane.b32.xlu1 %v3577_v25, %s2431_s26 }
 0x3da   : > { %1603 = vrot.lane.b32.xlu0 %v3561_v16, %s2432_s27 }
 0x3dd   : > { %1605 = vrot.lane.b32.xlu1 %v3565_v48, %s2432_s27  ;;  %v2368_v31 = vpop.eup %2367 }
 0x3de   : > { %1611 = vrot.lane.b32.xlu0 %v3567_v38, %s2432_s27  ;;  %v1470_v14 = vadd.f32 1.0, %v2368_v31 }
 0x3e0   : > { %v1478_v36 = vmul.f32 0.5, %v1470_v14 }
 0x3e1   : > { %1613 = vrot.lane.b32.xlu1 %v3577_v25, %s2432_s27  ;;  %v2370_v49 = vpop.eup %2369 }
 0x3e2   : > { %1567 = vrot.lane.b32.xlu0 %v3561_v16, %s2433_s28  ;;  %v2372_v35 = vpop.eup %2371  ;;  %v1474_v47 = vadd.f32 1.0, %v2370_v49  ;;  %v3655_v59 = vmul.f32 %v1478_v36, %v1372_v53 }
 0x3e3   : > { %v1472_v58 = vadd.f32 1.0, %v2372_v35  ;;  %v2374_v1 = vpop.eup %2373 }
 0x3e4   : > { %v1482_v27 = vmul.f32 0.5, %v1474_v47  ;;  %v1476_v34 = vadd.f32 1.0, %v2374_v1 }
 0x3e5   : > { %1569 = vrot.lane.b32.xlu1 %v3565_v48, %s2433_s28  ;;  %v1480_v20 = vmul.f32 0.5, %v1472_v58 }
 0x3e6   : > { %1575 = vrot.lane.b32.xlu0 %v3567_v38, %s2433_s28 }
 0x3e7   : > { %v3665_v55 = vmul.f32 %v1480_v20, %v3600_v10  ;;  %v2339_v10 = vld [vmem:[%s4230_s4 + $0x4] ss:$8 sps:$4 sm:$0xff]  }
 0x3e8   : > { %2290 = vmatprep.mubr.msk.bf16.mxu0 %vm859_vm0, %v2339_v10  ;;  %2291 = vmatprep.mubr.msk.bf16.mxu1 %vm859_vm0, %v2339_v10 }
 0x3e9   : > { %1577 = vrot.lane.b32.xlu1 %v3577_v25, %s2433_s28 }
 0x3ea   : > { %1531 = vrot.lane.b32.xlu0 %v3561_v16, %s2434_s29 }
 0x3ed   : > { %1533 = vrot.lane.b32.xlu1 %v3565_v48, %s2434_s29 }
 0x3ee   : > { %1539 = vrot.lane.b32.xlu0 %v3567_v38, %s2434_s29 }
 0x3f1   : > { %1541 = vrot.lane.b32.xlu1 %v3577_v25, %s2434_s29 }
 0x3f2   : > { %1495 = vrot.lane.b32.xlu0 %v3561_v16, %s2435_s30 }
 0x3f5   : > { %1497 = vrot.lane.b32.xlu1 %v3565_v48, %s2435_s30 }
 0x3f6   : > { %1503 = vrot.lane.b32.xlu0 %v3567_v38, %s2435_s30 }
 0x3f9   : > { %1505 = vrot.lane.b32.xlu1 %v3577_v25, %s2435_s30 }
 0x3fa   : > { %1751 = vrot.lane.b32.xlu0 %v3561_v16, %s2436_s12  ;;  %v3662_v16 = vmul.f32 %v1482_v27, %v3597_v29 }
 0x3fd   : > { %1753 = vrot.lane.b32.xlu1 %v3565_v48, %s2436_s12 }
 0x3fe   : > { %1759 = vrot.lane.b32.xlu0 %v3567_v38, %s2436_s12  ;;  %v1484_v38 = vmul.f32 0.5, %v1476_v34 }
 0x400   : > { %v3671_v48 = vmul.f32 %v1484_v38, %v1419_v26 }
 0x401   : > { %1761 = vrot.lane.b32.xlu1 %v3577_v25, %s2436_s12 }
 0x402   : > { %1719 = vrot.lane.b32.xlu0 %v3655_v59, %s2429_s24 }
 0x405   : > { %1721 = vrot.lane.b32.xlu1 %v3662_v16, %s2429_s24 }
 0x406   : > { %1727 = vrot.lane.b32.xlu0 %v3665_v55, %s2429_s24 }
 0x409   : > { %1729 = vrot.lane.b32.xlu1 %v3671_v48, %s2429_s24  ;;  %s4199_s24 = scalar_lea.vmem %s4237_s11, %s2301_s8 }
 0x40a   : > { %1683 = vrot.lane.b32.xlu0 %v3655_v59, %s2430_s25 }
 0x40d   : > { %1685 = vrot.lane.b32.xlu1 %v3662_v16, %s2430_s25 }
 0x40e   : > { %1691 = vrot.lane.b32.xlu0 %v3665_v55, %s2430_s25 }
 0x411   : > { %1693 = vrot.lane.b32.xlu1 %v3671_v48, %s2430_s25 }
 0x412   : > { %1647 = vrot.lane.b32.xlu0 %v3655_v59, %s2431_s26 }
 0x415   : > { %1649 = vrot.lane.b32.xlu1 %v3662_v16, %s2431_s26 }
 0x416   : > { %1655 = vrot.lane.b32.xlu0 %v3665_v55, %s2431_s26 }
 0x419   : > { %1657 = vrot.lane.b32.xlu1 %v3671_v48, %s2431_s26 }
 0x41a   : > { %1607 = vrot.lane.b32.xlu0 %v3655_v59, %s2432_s27 }
 0x41d   : > { %1609 = vrot.lane.b32.xlu1 %v3662_v16, %s2432_s27 }
 0x41e   : > { %1615 = vrot.lane.b32.xlu0 %v3665_v55, %s2432_s27 }
 0x421   : > { %1617 = vrot.lane.b32.xlu1 %v3671_v48, %s2432_s27 }
 0x422   : > { %1571 = vrot.lane.b32.xlu0 %v3655_v59, %s2433_s28 }
 0x425   : > { %1573 = vrot.lane.b32.xlu1 %v3662_v16, %s2433_s28 }
 0x426   : > { %1579 = vrot.lane.b32.xlu0 %v3665_v55, %s2433_s28 }
 0x429   : > { %1581 = vrot.lane.b32.xlu1 %v3671_v48, %s2433_s28 }
 0x42a   : > { %1535 = vrot.lane.b32.xlu0 %v3655_v59, %s2434_s29 }
 0x42d   : > { %1537 = vrot.lane.b32.xlu1 %v3662_v16, %s2434_s29 }
 0x42e   : > { %1543 = vrot.lane.b32.xlu0 %v3665_v55, %s2434_s29 }
 0x431   : > { %1545 = vrot.lane.b32.xlu1 %v3671_v48, %s2434_s29 }
 0x432   : > { %1499 = vrot.lane.b32.xlu0 %v3655_v59, %s2435_s30 }
 0x433   : > { %v1716_v25 = vpop.permute.xlu1 %1715 }
 0x435   : > { %1501 = vrot.lane.b32.xlu1 %v3662_v16, %s2435_s30 }
 0x436   : > { %1507 = vrot.lane.b32.xlu0 %v3665_v55, %s2435_s30 }
 0x437   : > { %v3721_v53 = vpop.permute.xlu1 %1717 }
 0x438   : > { %v1724_v29 = vpop.permute.xlu0 %1723 }
 0x439   : > { %1509 = vrot.lane.b32.xlu1 %v3671_v48, %s2435_s30 }
 0x43a   : > { %1755 = vrot.lane.b32.xlu0 %v3655_v59, %s2436_s12 }
 0x43b   : > { %v1726_v15 = vpop.permute.xlu1 %1725 }
 0x43c   : > { %v3732_v26 = vpop.permute.xlu0 %1679 }
 0x43d   : > { %1757 = vrot.lane.b32.xlu1 %v3662_v16, %s2436_s12 }
 0x43e   : > { %1763 = vrot.lane.b32.xlu0 %v3665_v55, %s2436_s12 }
 0x43f   : > { %v3740_v4 = vpop.permute.xlu1 %1681 }
 0x440   : > { %v3738_v0 = vpop.permute.xlu0 %1687 }
 0x441   : > { %1765 = vrot.lane.b32.xlu1 %v3671_v48, %s2436_s12 }
 0x442   : > { %1788 = vperm.xlu0 %2327, %v3747_v54  }
 0x443   : > { %v3752_v43 = vpop.permute.xlu1 %1689 }
 0x444   : > { %v3750_v40 = vpop.permute.xlu0 %1643 }
 0x445   : > { %1792 = vperm.xlu1 %2328, %v3757_v2  }
 0x447   : > { %v3762_v49 = vpop.permute.xlu1 %1645 }
 0x448   : > { %v3760_v31 = vpop.permute.xlu0 %1651 }
 0x44b   : > { %v3766_v35 = vpop.permute.xlu1 %1653 }
 0x44c   : > { %v3764_v14 = vpop.permute.xlu0 %1603 }
 0x44f   : > { %v3770_v47 = vpop.permute.xlu1 %1605 }
 0x450   : > { %v3768_v36 = vpop.permute.xlu0 %1611 }
 0x453   : > { %v3774_v1 = vpop.permute.xlu1 %1613 }
 0x454   : > { %v3772_v58 = vpop.permute.xlu0 %1567 }
 0x457   : > { %v3778_v20 = vpop.permute.xlu1 %1569 }
 0x458   : > { %v3776_v27 = vpop.permute.xlu0 %1575 }
 0x45b   : > { %v3782_v38 = vpop.permute.xlu1 %1577 }
 0x45c   : > { %v3780_v34 = vpop.permute.xlu0 %1531 }
 0x45d   : > { %4355 = vst [vmem:[#allocation19_spill] sm:$0xff] %v3780_v34 }
 0x45f   : > { %v3786_v42 = vpop.permute.xlu1 %1533 }
 0x460   : > { %v3784_v10 = vpop.permute.xlu0 %1539  ;;  %4356 = vst [vmem:[#allocation21_spill] sm:$0xff] %v3786_v42 }
 0x463   : > { %v3790_v12 = vpop.permute.xlu1 %1541 }
 0x464   : > { %v3788_v3 = vpop.permute.xlu0 %1495  ;;  %4358 = vst [vmem:[#allocation24_spill] sm:$0xff] %v3790_v12 }
 0x465   : > { %4357 = vst [vmem:[#allocation22_spill] sm:$0xff] %v3788_v3 }
 0x467   : > { %v3794_v17 = vpop.permute.xlu1 %1497 }
 0x468   : > { %v3792_v9 = vpop.permute.xlu0 %1503  ;;  %4360 = vst [vmem:[#allocation27_spill] sm:$0xff] %v3794_v17 }
 0x469   : > { %4359 = vst [vmem:[#allocation23_spill] sm:$0xff] %v3792_v9 }
 0x46b   : > { %v3798_v54 = vpop.permute.xlu1 %1505 }
 0x46c   : > { %v3796_v2 = vpop.permute.xlu0 %1751  ;;  %4362 = vst [vmem:[#allocation28_spill] sm:$0xff] %v3798_v54 }
 0x46d   : > { %4361 = vst [vmem:[#allocation25_spill] sm:$0xff] %v3796_v2 }
 0x46f   : > { %v3802_v24 = vpop.permute.xlu1 %1753 }
 0x470   : > { %v3800_v57 = vpop.permute.xlu0 %1759  ;;  %4364 = vst [vmem:[#allocation12_spill] sm:$0xff] %v3802_v24 }
 0x471   : > { %4363 = vst [vmem:[#allocation26_spill] sm:$0xff] %v3800_v57 }
 0x473   : > { %v3804_v46 = vpop.permute.xlu1 %1761 }
 0x474   : > { %v1720_v60 = vpop.permute.xlu0 %1719  ;;  %4365 = vst [vmem:[#allocation13_spill] sm:$0xff] %v3804_v46 }
 0x475   : > { %v1733_v3 = vsel %vm750_vm1, %v1720_v60, %v1724_v29  ;;  %v1735_v23 = vsel %vm750_vm1, %v1716_v25, %v1720_v60 }
 0x476   : > { %v1739_v24 = vmul.f32 %v1735_v23, %v2697_v22  ;;  %v1740_v17 = vmul.f32 %v1733_v3, %v2694_v21 }
 0x477   : > { %v1722_v11 = vpop.permute.xlu1 %1721 }
 0x478   : > { %v1728_v9 = vpop.permute.xlu0 %1727  ;;  %v1734_v2 = vsel %vm750_vm1, %v1722_v11, %v1726_v15  ;;  %v1736_v57 = vsel %vm750_vm1, %v3721_v53, %v1722_v11 }
 0x479   : > { %v1743_v46 = vmul.f32 %v1736_v57, %v2697_v22  ;;  %v1744_v54 = vmul.f32 %v1734_v2, %v2694_v21  ;;  %v1731_v60 = vsel %vm750_vm1, %v1724_v29, %v1728_v9  ;;  %v1737_v28 = vsel %vm750_vm1, %v1728_v9, %v1716_v25 }
 0x47a   : > { %v1741_v22 = vmul.f32 %v1731_v60, %v2722_v33  ;;  %v1742_v21 = vmul.f32 %v1737_v28, %v2719_v32 }
 0x47b   : > { %v1747_v6 = vpack.c.bf16 %v1743_v46, %v1739_v24  ;;  %v1730_v12 = vpop.permute.xlu1 %1729  ;;  %v1748_v34 = vpack.c.bf16 %v1744_v54, %v1740_v17 }
 0x47c   : > { %v1684_v42 = vpop.permute.xlu0 %1683  ;;  %v1732_v11 = vsel %vm750_vm1, %v1726_v15, %v1730_v12  ;;  %v1738_v3 = vsel %vm750_vm1, %v1730_v12, %v3721_v53 }
 0x47d   : > { %v1745_v23 = vmul.f32 %v1732_v11, %v2722_v33  ;;  %v1746_v57 = vmul.f32 %v1738_v3, %v2719_v32  ;;  %1807 = vmatprep.subr.bf16.mxu0 %v1748_v34  ;;  %v1697_v9 = vsel %vm697_vm2, %v1684_v42, %v3738_v0  ;;  %v1699_v17 = vsel %vm697_vm2, %v3732_v26, %v1684_v42 }
 0x47e   : > { %1808 = vmatpush1.bf16.msra.mxu0 %v1747_v6  ;;  %v1703_v28 = vmul.f32 %v1699_v17, %v2758_v56  ;;  %v1704_v53 = vmul.f32 %v1697_v9, %v2765_v61 }
 0x47f   : > { %v1749_v46 = vpack.c.bf16 %v1745_v23, %v1741_v22  ;;  %v1686_v24 = vpop.permute.xlu1 %1685  ;;  %v1750_v25 = vpack.c.bf16 %v1746_v57, %v1742_v21 }
 0x480   : > { %v1692_v12 = vpop.permute.xlu0 %1691  ;;  %v1698_v33 = vsel %vm697_vm2, %v1686_v24, %v3752_v43  ;;  %v1700_v32 = vsel %vm697_vm2, %v3740_v4, %v1686_v24 }
 0x481   : > { %v1707_v29 = vmul.f32 %v1700_v32, %v2758_v56  ;;  %v1708_v6 = vmul.f32 %v1698_v33, %v2765_v61  ;;  %1850 = vmatprep.subr.bf16.mxu1 %v1750_v25  ;;  %v1695_v15 = vsel %vm697_vm2, %v3738_v0, %v1692_v12  ;;  %v1701_v54 = vsel %vm697_vm2, %v1692_v12, %v3732_v26 }
 0x482   : > { %1851 = vmatpush1.bf16.msra.mxu1 %v1749_v46  ;;  %v1705_v11 = vmul.f32 %v1695_v15, %v2776_v18  ;;  %v1706_v0 = vmul.f32 %v1701_v54, %v2779_v19 }
 0x483   : > { %v1711_v2 = vpack.c.bf16 %v1707_v29, %v1703_v28  ;;  %v1694_v42 = vpop.permute.xlu1 %1693  ;;  %v1712_v60 = vpack.c.bf16 %v1708_v6, %v1704_v53 }
 0x484   : > { %v1648_v34 = vpop.permute.xlu0 %1647  ;;  %v1696_v56 = vsel %vm697_vm2, %v3752_v43, %v1694_v42  ;;  %v1702_v61 = vsel %vm697_vm2, %v1694_v42, %v3740_v4 }
 0x485   : > { %v1709_v3 = vmul.f32 %v1696_v56, %v2776_v18  ;;  %v1710_v26 = vmul.f32 %v1702_v61, %v2779_v19  ;;  %1809 = vmatprep.subr.bf16.mxu0 %v1712_v60  ;;  %v1661_v22 = vsel %vm644_vm3, %v1648_v34, %v3760_v31  ;;  %v1663_v43 = vsel %vm644_vm3, %v3750_v40, %v1648_v34 }
 0x486   : > { %1810 = vmatpush1.bf16.msra.mxu0 %v1711_v2  ;;  %v1667_v9 = vmul.f32 %v1663_v43, %v2796_v45  ;;  %v1668_v17 = vmul.f32 %v1661_v22, %v2803_v51  ;;  %v3915_v34 = vpack.c.bf16 %v3671_v48, %v3665_v55 }
 0x487   : > { %v1713_v21 = vpack.c.bf16 %v1709_v3, %v1705_v11  ;;  %v1650_v23 = vpop.permute.xlu1 %1649  ;;  %v1714_v57 = vpack.c.bf16 %v1710_v26, %v1706_v0 }
 0x488   : > { %v1656_v4 = vpop.permute.xlu0 %1655  ;;  %v1662_v18 = vsel %vm644_vm3, %v1650_v23, %v3766_v35  ;;  %v1664_v19 = vsel %vm644_vm3, %v3762_v49, %v1650_v23 }
 0x489   : > { %v1671_v46 = vmul.f32 %v1664_v19, %v2796_v45  ;;  %v1672_v12 = vmul.f32 %v1662_v18, %v2803_v51  ;;  %1852 = vmatprep.subr.bf16.mxu1 %v1714_v57  ;;  %v1659_v24 = vsel %vm644_vm3, %v3760_v31, %v1656_v4  ;;  %v1665_v25 = vsel %vm644_vm3, %v1656_v4, %v3750_v40 }
 0x48a   : > { %1853 = vmatpush1.bf16.msra.mxu1 %v1713_v21  ;;  %v3894_v31 = vpack.c.bf16 %v3662_v16, %v3655_v59  ;;  %v1669_v29 = vmul.f32 %v1659_v24, %v2814_v62  ;;  %v1670_v40 = vmul.f32 %v1665_v25, %v2817_v63 }
 0x48b   : > { %v1675_v33 = vpack.c.bf16 %v1671_v46, %v1667_v9  ;;  %v1658_v28 = vpop.permute.xlu1 %1657  ;;  %v1676_v53 = vpack.c.bf16 %v1672_v12, %v1668_v17 }
 0x48c   : > { %v1608_v32 = vpop.permute.xlu0 %1607  ;;  %v1660_v45 = vsel %vm644_vm3, %v3766_v35, %v1658_v28  ;;  %v1666_v51 = vsel %vm644_vm3, %v1658_v28, %v3762_v49 }
 0x48d   : > { %v1673_v6 = vmul.f32 %v1660_v45, %v2814_v62  ;;  %v1674_v15 = vmul.f32 %v1666_v51, %v2817_v63  ;;  %1811 = vmatprep.subr.bf16.mxu0 %v1676_v53  ;;  %v1621_v35 = vsel %vm587_vm4, %v1608_v32, %v3768_v36  ;;  %v1623_v49 = vsel %vm587_vm4, %v3764_v14, %v1608_v32  ;;  %v4366_v51 = vld [vmem:[#allocation19_spill] sm:$0xff] }
 0x48e   : > { %1812 = vmatpush1.bf16.msra.mxu0 %v1675_v33  ;;  %v1628_v42 = vmul.f32 %v1623_v49, %v2840_v39  ;;  %v1629_v60 = vmul.f32 %v1621_v35, %v2851_v44  ;;  %v4369_v49 = vld [vmem:[#allocation3_spill] sm:$0xff] }
 0x48f   : > { %v1677_v59 = vpack.c.bf16 %v1673_v6, %v1669_v29  ;;  %1813 = vmatprep.subr.bf16.mxu0 %v3894_v31  ;;  %v1610_v54 = vpop.permute.xlu1 %1609  ;;  %v1678_v2 = vpack.c.bf16 %v1674_v15, %v1670_v40  ;;  %v4367_v15 = vld [vmem:[#allocation24_spill] sm:$0xff] }
 0x490   : > { %v1616_v16 = vpop.permute.xlu0 %1615  ;;  %v1622_v62 = vsel %vm587_vm4, %v1610_v54, %v3774_v1  ;;  %v1624_v63 = vsel %vm587_vm4, %v3770_v47, %v1610_v54 }
 0x491   : > { %v1632_v56 = vmul.f32 %v1624_v63, %v2840_v39  ;;  %v1633_v61 = vmul.f32 %v1622_v62, %v2851_v44  ;;  %1854 = vmatprep.subr.bf16.mxu1 %v1678_v2  ;;  %v1619_v11 = vsel %vm587_vm4, %v3768_v36, %v1616_v16  ;;  %v1625_v0 = vsel %vm587_vm4, %v1616_v16, %v3764_v14  ;;  %v4370_v16 = vld [vmem:[#allocation4_spill] sm:$0xff] }
 0x492   : > { %1814 = vmatpush1.bf16.msra.mxu0 %v3573_v41  ;;  %1855 = vmatpush1.bf16.msra.mxu1 %v1677_v59  ;;  %v1627_v26 = vmul.f32 %v1625_v0, %v2858_v50  ;;  %v1630_v14 = vmul.f32 %v1619_v11, %v2861_v52 }
 0x493   : > { %v1637_v55 = vpack.c.bf16 %v1633_v61, %v1629_v60  ;;  %1856 = vmatprep.subr.bf16.mxu1 %v3915_v34  ;;  %v1618_v3 = vpop.permute.xlu1 %1617  ;;  %v1636_v39 = vpack.c.bf16 %v1632_v56, %v1628_v42 }
 0x494   : > { %v1572_v48 = vpop.permute.xlu0 %1571  ;;  %v1620_v44 = vsel %vm587_vm4, %v3774_v1, %v1618_v3  ;;  %v1626_v36 = vsel %vm587_vm4, %v1618_v3, %v3770_v47  ;;  %v4372_v3 = vld [vmem:[#allocation6_spill] sm:$0xff] }
 0x495   : > { %v1631_v22 = vmul.f32 %v1626_v36, %v2858_v50  ;;  %v1634_v43 = vmul.f32 %v1620_v44, %v2861_v52  ;;  %1815 = vmatprep.subr.bf16.mxu0 %v1636_v39  ;;  %v1585_v21 = vsel %vm534_vm5, %v1572_v48, %v3776_v27  ;;  %v1587_v1 = vsel %vm534_vm5, %v3772_v58, %v1572_v48  ;;  %v4371_v48 = vld [vmem:[#allocation5_spill] sm:$0xff] }
 0x496   : > { %1857 = vmatpush1.bf16.msra.mxu1 %v3585_v5  ;;  %v1592_v18 = vmul.f32 %v1587_v1, %v2880_v30  ;;  %v1593_v19 = vmul.f32 %v1585_v21, %v2889_v37 }
 0x497   : > { %v1635_v47 = vpack.c.bf16 %v1631_v22, %v1627_v26  ;;  %v1574_v23 = vpop.permute.xlu1 %1573  ;;  %v1638_v57 = vpack.c.bf16 %v1634_v43, %v1630_v14  ;;  %v4373_v26 = vld [vmem:[#allocation23_spill] sm:$0xff]  ;;  %v4374_v22 = vld [vmem:[#allocation22_spill] sm:$0xff] }
 0x498   : > { %v1580_v4 = vpop.permute.xlu0 %1579  ;;  %v1586_v50 = vsel %vm534_vm5, %v1574_v23, %v3782_v38  ;;  %v1588_v52 = vsel %vm534_vm5, %v3778_v20, %v1574_v23  ;;  %v4375_v23 = vld [vmem:[#allocation28_spill] sm:$0xff] }
 0x499   : > { %v1596_v9 = vmul.f32 %v1588_v52, %v2880_v30  ;;  %v1597_v17 = vmul.f32 %v1586_v50, %v2889_v37  ;;  %1816 = vmatpush1.bf16.msra.mxu0 %v1635_v47  ;;  %v1583_v46 = vsel %vm534_vm5, %v3776_v27, %v1580_v4  ;;  %v1589_v12 = vsel %vm534_vm5, %v1580_v4, %v3772_v58  ;;  %v4376_v50 = vld [vmem:[#allocation27_spill] sm:$0xff] }
 0x49a   : > { %1858 = vmatprep.subr.bf16.mxu1 %v1638_v57  ;;  %v1591_v27 = vmul.f32 %v1589_v12, %v2896_v7  ;;  %v1594_v28 = vmul.f32 %v1583_v46, %v2899_v8 }
 0x49b   : > { %v1601_v24 = vpack.c.bf16 %v1597_v17, %v1593_v19  ;;  %1859 = vmatpush1.bf16.msra.mxu1 %v1637_v55  ;;  %v1582_v33 = vpop.permute.xlu1 %1581  ;;  %v1600_v32 = vpack.c.bf16 %v1596_v9, %v1592_v18  ;;  %v4377_v18 = vld [vmem:[#allocation8_spill] sm:$0xff]  ;;  %v4378_v9 = vld [vmem:[#allocation9_spill] sm:$0xff] }
 0x49c   : > { %v1536_v25 = vpop.permute.xlu0 %1535  ;;  %v1584_v30 = vsel %vm534_vm5, %v3782_v38, %v1582_v33  ;;  %v1590_v37 = vsel %vm534_vm5, %v1582_v33, %v3778_v20 }
 0x49d   : > { %v1595_v58 = vmul.f32 %v1590_v37, %v2896_v7  ;;  %v1598_v53 = vmul.f32 %v1584_v30, %v2899_v8  ;;  %1817 = vmatprep.subr.bf16.mxu0 %v1600_v32  ;;  %v1549_v45 = vsel %vm481_vm6, %v1536_v25, %v3784_v10  ;;  %v1551_v38 = vsel %vm481_vm6, %v4366_v51, %v1536_v25  ;;  %v4368_v7 = vld [vmem:[#allocation21_spill] sm:$0xff] }
 0x49e   : > { %v1556_v59 = vmul.f32 %v1551_v38, %v4369_v49  ;;  %v1557_v54 = vmul.f32 %v1549_v45, %v4370_v16  ;;  %v4380_v45 = vld [vmem:[#allocation11_spill] sm:$0xff] }
 0x49f   : > { %v1599_v29 = vpack.c.bf16 %v1595_v58, %v1591_v27  ;;  %v1538_v20 = vpop.permute.xlu1 %1537  ;;  %v1602_v6 = vpack.c.bf16 %v1598_v53, %v1594_v28  ;;  %v4379_v58 = vld [vmem:[#allocation10_spill] sm:$0xff] }
 0x4a0   : > { %v1544_v40 = vpop.permute.xlu0 %1543  ;;  %v1550_v35 = vsel %vm481_vm6, %v1538_v20, %v4367_v15  ;;  %v1552_v8 = vsel %vm481_vm6, %v4368_v7, %v1538_v20 }
 0x4a1   : > { %v1560_v2 = vmul.f32 %v1552_v8, %v4369_v49  ;;  %v1561_v62 = vmul.f32 %v1550_v35, %v4370_v16  ;;  %1818 = vmatpush1.bf16.msra.mxu0 %v1599_v29  ;;  %v1547_v63 = vsel %vm481_vm6, %v3784_v10, %v1544_v40  ;;  %v1553_v42 = vsel %vm481_vm6, %v1544_v40, %v4366_v51  ;;  %v4381_v40 = vld [vmem:[#allocation26_spill] sm:$0xff] }
 0x4a2   : > { %1860 = vmatprep.subr.bf16.mxu1 %v1602_v6  ;;  %v1555_v10 = vmul.f32 %v1553_v42, %v4371_v48  ;;  %v1558_v39 = vmul.f32 %v1547_v63, %v4372_v3  ;;  %v4382_v6 = vld [vmem:[#allocation25_spill] sm:$0xff]  ;;  %v2410_v42 = vld [vmem:[%s4227_s1 + $0x28] ss:$0 sm:$0xff] }
 0x4a3   : > { %v1565_v60 = vpack.c.bf16 %v1561_v62, %v1557_v54  ;;  %1861 = vmatpush1.bf16.msra.mxu1 %v1601_v24  ;;  %v1546_v61 = vpop.permute.xlu1 %1545  ;;  %v1564_v11 = vpack.c.bf16 %v1560_v2, %v1556_v59  ;;  %v4383_v59 = vld [vmem:[#allocation13_spill] sm:$0xff]  ;;  %v4384_v54 = vld [vmem:[#allocation12_spill] sm:$0xff]  ;;  %v2409_v62 = vld [vmem:[%s4227_s1 + $0x20] ss:$0 sm:$0xff] }
 0x4a4   : > { %v1500_v56 = vpop.permute.xlu0 %1499  ;;  %v1548_v0 = vsel %vm481_vm6, %v4367_v15, %v1546_v61  ;;  %v1554_v55 = vsel %vm481_vm6, %v1546_v61, %v4368_v7 }
 0x4a5   : > { %v1559_v44 = vmul.f32 %v1554_v55, %v4371_v48  ;;  %v1562_v36 = vmul.f32 %v1548_v0, %v4372_v3  ;;  %1819 = vmatprep.subr.bf16.mxu0 %v1564_v11  ;;  %v1513_v14 = vsel %vm428_vm7, %v1500_v56, %v4373_v26  ;;  %v1515_v43 = vsel %vm428_vm7, %v4374_v22, %v1500_v56 }
 0x4a6   : > { %v1520_v19 = vmul.f32 %v1515_v43, %v4377_v18  ;;  %v1521_v17 = vmul.f32 %v1513_v14, %v4378_v9 }
 0x4a7   : > { %v1563_v21 = vpack.c.bf16 %v1559_v44, %v1555_v10  ;;  %v1502_v47 = vpop.permute.xlu1 %1501  ;;  %v1566_v4 = vpack.c.bf16 %v1562_v36, %v1558_v39  ;;  %v2411_v44 = vld [vmem:[%s4227_s1 + $0x30] ss:$0 sm:$0xff] }
 0x4a8   : > { %v1508_v1 = vpop.permute.xlu0 %1507  ;;  %v1514_v57 = vsel %vm428_vm7, %v1502_v47, %v4375_v23  ;;  %v1516_v52 = vsel %vm428_vm7, %v4376_v50, %v1502_v47  ;;  %v4385_v47 = vmov 0  }
 0x4a9   : > { %v1524_v46 = vmul.f32 %v1516_v52, %v4377_v18  ;;  %v1525_v12 = vmul.f32 %v1514_v57, %v4378_v9  ;;  %1820 = vmatpush1.bf16.msra.mxu0 %v1563_v21  ;;  %v1511_v24 = vsel %vm428_vm7, %v4373_v26, %v1508_v1  ;;  %v1517_v25 = vsel %vm428_vm7, %v1508_v1, %v4374_v22  ;;  %v2412_v26 = vld [vmem:[%s4227_s1 + $0x38] ss:$0 sm:$0xff]  ;;  %v2341_v21 = vld [vmem:[%s4230_s4] ss:$8 sps:$4 sm:$0xff]  }
 0x4aa   : > { %1862 = vmatprep.subr.bf16.mxu1 %v1566_v4  ;;  %v1519_v53 = vmul.f32 %v1517_v25, %v4379_v58  ;;  %v1522_v51 = vmul.f32 %v1511_v24, %v4380_v45  ;;  %v2440_v4 = vmov 3   ;;  %v4387_v57 = vld [vmem:[#allocation20_spill] sm:$0xff] }
 0x4ab   : > { %v1529_v33 = vpack.c.bf16 %v1525_v12, %v1521_v17  ;;  %1863 = vmatpush1.bf16.msra.mxu1 %v1565_v60  ;;  %v1510_v30 = vpop.permute.xlu1 %1509  ;;  %v1528_v37 = vpack.c.bf16 %v1524_v46, %v1520_v19  ;;  %2329 = vset.pattern.permute.xlu1 %v2440_v4 }
 0x4ac   : > { %v1756_v32 = vpop.permute.xlu0 %1755  ;;  %v1512_v27 = vsel %vm428_vm7, %v4375_v23, %v1510_v30  ;;  %v1518_v28 = vsel %vm428_vm7, %v1510_v30, %v4376_v50  ;;  %2330 = vset.pattern.permute.xlu0 %v2440_v4  ;;  %v4386_v23 = vld [vmem:[#allocation18_spill] sm:$0xff] }
 0x4ad   : > { %v1523_v38 = vmul.f32 %v1518_v28, %v4379_v58  ;;  %v1526_v29 = vmul.f32 %v1512_v27, %v4380_v45  ;;  %1821 = vmatprep.subr.bf16.mxu0 %v1528_v37  ;;  %v1769_v20 = vsel %vm803_vm8, %v1756_v32, %v4381_v40  ;;  %v1771_v15 = vsel %vm803_vm8, %v4382_v6, %v1756_v32 }
 0x4ae   : > { %v1775_v63 = vmul.f32 %v2409_v62, %v1771_v15  ;;  %v1776_v60 = vmul.f32 %v2410_v42, %v1769_v20  ;;  %1972 = vperm.xlu1 %2329, %v4386_v23   ;;  %1976 = vperm.xlu0 %2330, %v4387_v57  }
 0x4af   : > { %v1527_v35 = vpack.c.bf16 %v1523_v38, %v1519_v53  ;;  %v1758_v8 = vpop.permute.xlu1 %1757  ;;  %v1530_v49 = vpack.c.bf16 %v1526_v29, %v1522_v51 }
 0x4b0   : > { %v1764_v7 = vpop.permute.xlu0 %1763  ;;  %v1770_v16 = vsel %vm803_vm8, %v1758_v8, %v4383_v59  ;;  %v1772_v2 = vsel %vm803_vm8, %v4384_v54, %v1758_v8 }
 0x4b1   : > { %v1779_v56 = vmul.f32 %v2409_v62, %v1772_v2  ;;  %v1780_v61 = vmul.f32 %v2410_v42, %v1770_v16  ;;  %1822 = vmatpush1.bf16.msra.mxu0 %v1527_v35  ;;  %v1767_v11 = vsel %vm803_vm8, %v4381_v40, %v1764_v7  ;;  %v1773_v0 = vsel %vm803_vm8, %v1764_v7, %v4382_v6 }
 0x4b2   : > { %1864 = vmatprep.subr.bf16.mxu1 %v1530_v49  ;;  %v1777_v36 = vmul.f32 %v2411_v44, %v1767_v11  ;;  %v1778_v14 = vmul.f32 %v2412_v26, %v1773_v0  ;;  %2332 = vset.pattern.permute.xlu0 %v4385_v47 }
 0x4b3   : > { %v1783_v55 = vpack.c.bf16 %v1779_v56, %v1775_v63  ;;  %1865 = vmatpush1.bf16.msra.mxu1 %v1529_v33  ;;  %v1766_v48 = vpop.permute.xlu1 %1765  ;;  %v1784_v10 = vpack.c.bf16 %v1780_v61, %v1776_v60  ;;  %2331 = vset.pattern.permute.xlu1 %v4385_v47 }
 0x4b4   : > { %v1768_v3 = vsel %vm803_vm8, %v4383_v59, %v1766_v48  ;;  %v1774_v39 = vsel %vm803_vm8, %v1766_v48, %v4384_v54 }
 0x4b5   : > { %v1781_v22 = vmul.f32 %v2411_v44, %v1768_v3  ;;  %v1782_v43 = vmul.f32 %v2412_v26, %v1774_v39  ;;  %1837 = vmatprep.subr.bf16.mxu0 %v1784_v10 }
 0x4b6   : > { %1838 = vmatpush2.bf16.msra.mxu0 %v1783_v55 }
 0x4b7   : > { %v1785_v13 = vpack.c.bf16 %v1781_v22, %v1777_v36  ;;  %v1786_v1 = vpack.c.bf16 %v1782_v43, %v1778_v14 }
 0x4b9   : > { %1840 = vmatmul.mubr.bf16.vlgmr.msra.gmra.mxu0 %v2341_v21  ;;  %1880 = vmatprep.subr.bf16.mxu1 %v1786_v1 }
 0x4ba   : > { %1881 = vmatpush2.bf16.msra.mxu1 %v1785_v13  ;;  %2020 = vmatprep.mubr.bf16.mxu0 %v4385_v47 }
 0x4bd   : > { %1883 = vmatmul.mubr.bf16.vlgmr.msra.gmra.mxu1 %v2341_v21  ;;  %v1789_v50 = vpop.permute.xlu0 %1788 }
 0x4be   : > { %2063 = vmatprep.mubr.bf16.mxu1 %v4385_v47 }
 0x4c0   : > { %v1793_v9 = vpop.permute.xlu1 %1792 }
 0x579   : > { %v1841_v52 = vpop.f32.mrf.mxu0 }
 0x57a   : > { %v4081_v18 = vadd.f32 %v1841_v52, %v1789_v50 }
 0x57b   : > { %v1843_v19 = vpop.f32.mrf.mxu0 }
 0x57c   : > { %v1893_v17 = vmul.f32 %v4081_v18, %v4081_v18  ;;  %v4085_v46 = vadd.f32 %v1843_v19, %v1789_v50 }
 0x57d   : > { %v1884_v12 = vpop.f32.mrf.mxu1  ;;  %v1845_v24 = vpop.f32.mrf.mxu0 }
 0x57e   : > { %v1901_v25 = vmul.f32 %v1893_v17, %v4081_v18  ;;  %v1894_v33 = vmul.f32 %v4085_v46, %v4085_v46  ;;  %v4090_v32 = vadd.f32 %v1884_v12, %v1789_v50  ;;  %v4092_v30 = vadd.f32 %v1845_v24, %v1793_v9 }
 0x57f   : > { %v1847_v37 = vpop.f32.mrf.mxu0  ;;  %v1886_v27 = vpop.f32.mrf.mxu1 }
 0x580   : > { %v1909_v28 = vmul.f32 0.044715, %v1901_v25  ;;  %v1902_v58 = vmul.f32 %v1894_v33, %v4085_v46  ;;  %v1895_v53 = vmul.f32 %v4090_v32, %v4090_v32  ;;  %v1897_v45 = vmul.f32 %v4092_v30, %v4092_v30 }
 0x581   : > { %v4099_v51 = vadd.f32 %v1847_v37, %v1793_v9  ;;  %v4101_v38 = vadd.f32 %v1886_v27, %v1789_v50  ;;  %v1888_v29 = vpop.f32.mrf.mxu1 }
 0x582   : > { %v1917_v40 = vadd.f32 %v1909_v28, %v4081_v18  ;;  %v1910_v20 = vmul.f32 0.044715, %v1902_v58  ;;  %v1903_v6 = vmul.f32 %v1895_v53, %v4090_v32  ;;  %v1905_v15 = vmul.f32 %v1897_v45, %v4092_v30 }
 0x583   : > { %v1898_v35 = vmul.f32 %v4099_v51, %v4099_v51  ;;  %v1896_v7 = vmul.f32 %v4101_v38, %v4101_v38  ;;  %v4110_v8 = vadd.f32 %v1888_v29, %v1793_v9  ;;  %v1890_v49 = vpop.f32.mrf.mxu1 }
 0x584   : > { %v1925_v59 = vmul.f32 0.7978846, %v1917_v40  ;;  %v1918_v16 = vadd.f32 %v1910_v20, %v4085_v46  ;;  %v1911_v54 = vmul.f32 0.044715, %v1903_v6  ;;  %v1913_v2 = vmul.f32 0.044715, %v1905_v15 }
 0x585   : > { %v1906_v62 = vmul.f32 %v1898_v35, %v4099_v51  ;;  %v1904_v63 = vmul.f32 %v1896_v7, %v4101_v38  ;;  %v1899_v42 = vmul.f32 %v4110_v8, %v4110_v8  ;;  %v4117_v60 = vadd.f32 %v1890_v49, %v1793_v9 }
 0x586   : > { %2375 = vtanh.f32 %v1925_v59  ;;  %v1926_v56 = vmul.f32 0.7978846, %v1918_v16  ;;  %v1919_v61 = vadd.f32 %v1911_v54, %v4090_v32  ;;  %v1921_v11 = vadd.f32 %v1913_v2, %v4092_v30 }
 0x587   : > { %v1914_v0 = vmul.f32 0.044715, %v1906_v62  ;;  %v1912_v55 = vmul.f32 0.044715, %v1904_v63  ;;  %v1907_v48 = vmul.f32 %v1899_v42, %v4110_v8  ;;  %v1900_v10 = vmul.f32 %v4117_v60, %v4117_v60 }
 0x588   : > { %2377 = vtanh.f32 %v1926_v56  ;;  %v1927_v3 = vmul.f32 0.7978846, %v1919_v61  ;;  %v1929_v39 = vmul.f32 0.7978846, %v1921_v11  ;;  %v4388_v56 = vld [vmem:[#allocation29_spill] sm:$0xff] }
 0x589   : > { %v1922_v44 = vadd.f32 %v1914_v0, %v4099_v51  ;;  %v1920_v36 = vadd.f32 %v1912_v55, %v4101_v38  ;;  %v1915_v26 = vmul.f32 0.044715, %v1907_v48  ;;  %v1908_v14 = vmul.f32 %v1900_v10, %v4117_v60  ;;  %v1977_v0 = vpop.permute.xlu0 %1976 }
 0x58a   : > { %2379 = vtanh.f32 %v1929_v39 }
 0x58b   : > { %v1930_v22 = vmul.f32 0.7978846, %v1922_v44  ;;  %v1928_v43 = vmul.f32 0.7978846, %v1920_v36  ;;  %v1923_v21 = vadd.f32 %v1915_v26, %v4110_v8  ;;  %2381 = vtanh.f32 %v1927_v3 }
 0x58c   : > { %v1916_v13 = vmul.f32 0.044715, %v1908_v14 }
 0x58d   : > { %2383 = vtanh.f32 %v1930_v22  ;;  %v1931_v1 = vmul.f32 0.7978846, %v1923_v21 }
 0x58e   : > { %2385 = vtanh.f32 %v1928_v43  ;;  %v1924_v47 = vadd.f32 %v1916_v13, %v4117_v60 }
 0x58f   : > { %2387 = vtanh.f32 %v1931_v1 }
 0x590   : > { %v1932_v4 = vmul.f32 0.7978846, %v1924_v47 }
 0x592   : > { %2389 = vtanh.f32 %v1932_v4 }
 0x593   : > { %v2376_v23 = vpop.eup %2375 }
 0x594   : > { %v1941_v19 = vadd.f32 1.0, %v2376_v23 }
 0x595   : > { %v2378_v57 = vpop.eup %2377 }
 0x596   : > { %v1942_v50 = vadd.f32 1.0, %v2378_v57  ;;  %v1949_v28 = vmul.f32 0.5, %v1941_v19  ;;  %v2074_v57 = vld [vmem:[%s4233_s7] sm:$0xff] }
 0x597   : > { %v2380_v52 = vpop.eup %2379 }
 0x598   : > { %v2382_v9 = vpop.eup %2381  ;;  %v1945_v17 = vadd.f32 1.0, %v2380_v52  ;;  %v1950_v37 = vmul.f32 0.5, %v1942_v50  ;;  %v1957_v7 = vmul.f32 %v1949_v28, %v4081_v18  ;;  %v2075_v50 = vld [vmem:[%s4233_s7 + $0x8] sm:$0xff] }
 0x599   : > { %v1943_v53 = vadd.f32 1.0, %v2382_v9 }
 0x59a   : > { %v2384_v12 = vpop.eup %2383  ;;  %v1953_v25 = vmul.f32 0.5, %v1945_v17  ;;  %v1958_v15 = vmul.f32 %v1950_v37, %v4085_v46 }
 0x59b   : > { %v2386_v24 = vpop.eup %2385  ;;  %v1946_v33 = vadd.f32 1.0, %v2384_v12  ;;  %v1951_v16 = vmul.f32 0.5, %v1943_v53 }
 0x59c   : > { %v2388_v27 = vpop.eup %2387  ;;  %v1944_v58 = vadd.f32 1.0, %v2386_v24  ;;  %v1961_v40 = vmul.f32 %v1953_v25, %v4092_v30 }
 0x59d   : > { %v1947_v45 = vadd.f32 1.0, %v2388_v27  ;;  %v1954_v29 = vmul.f32 0.5, %v1946_v33  ;;  %v1959_v46 = vmul.f32 %v1951_v16, %v4090_v32  ;;  %v4391_v32 = vld [vmem:[#allocation17_spill] sm:$0xff]  ;;  %v2076_v16 = vld [vmem:[#allocation2] sm:$0x1] }
 0x59e   : > { %v1952_v59 = vmul.f32 0.5, %v1944_v58  ;;  %v1965_v2 = vpack.c.bf16 %v1961_v40, %v1957_v7 }
 0x59f   : > { %v2390_v20 = vpop.eup %2389  ;;  %v1955_v6 = vmul.f32 0.5, %v1947_v45  ;;  %v1962_v35 = vmul.f32 %v1954_v29, %v4099_v51 }
 0x5a0   : > { %v1948_v49 = vadd.f32 1.0, %v2390_v20  ;;  %v1960_v30 = vmul.f32 %v1952_v59, %v4101_v38  ;;  %v2342_v38 = vld [vmem:[%s4231_s5] sm:$0xff]  }
 0x5a1   : > { %v1966_v54 = vpack.c.bf16 %v1962_v35, %v1958_v15  ;;  %v1963_v63 = vmul.f32 %v1955_v6, %v4110_v8  ;;  %v4389_v8 = vld [vmem:[#allocation16_spill] sm:$0xff] }
 0x5a2   : > { %v1956_v62 = vmul.f32 0.5, %v1948_v49 }
 0x5a3   : > { %1998 = vmatprep.subr.bf16.mxu0 %v1966_v54  ;;  %v1967_v18 = vpack.c.bf16 %v1963_v63, %v1959_v46  ;;  %v2077_v46 = vld [vmem:[%s4235_s9] sm:$0xff] }
 0x5a4   : > { %1999 = vmatpush1.bf16.msra.mxu0 %v1965_v2  ;;  %v1964_v42 = vmul.f32 %v1956_v62, %v4117_v60 }
 0x5a5   : > { %2000 = vmatprep.subr.bf16.mxu0 %v3894_v31  ;;  %v4390_v31 = vld [vmem:[#allocation30_spill] sm:$0xff] }
 0x5a6   : > { %v1968_v51 = vpack.c.bf16 %v1964_v42, %v1960_v30 }
 0x5a8   : > { %2041 = vmatprep.subr.bf16.mxu1 %v1968_v51  ;;  %2001 = vmatpush1.bf16.msra.mxu0 %v3573_v41  ;;  %v1973_v41 = vpop.permute.xlu1 %1972  ;;  %v2078_v51 = vld [vmem:[%s4235_s9 + $0x8] sm:$0xff] }
 0x5a9   : > { %2042 = vmatpush1.bf16.msra.mxu1 %v1967_v18  ;;  %2002 = vmatprep.subr.bf16.mxu0 %v4388_v56  ;;  %v4392_v56 = vld [vmem:[#allocation7_spill] sm:$0xff] }
 0x5aa   : > { %2043 = vmatprep.subr.bf16.mxu1 %v3915_v34 }
 0x5ac   : > { %2003 = vmatpush1.bf16.msra.mxu0 %v4389_v8  ;;  %v2079_v8 = vld [vmem:[%s4236_s10] sm:$0xff] }
 0x5ad   : > { %2044 = vmatpush1.bf16.msra.mxu1 %v3585_v5 }
 0x5ae   : > { %2045 = vmatprep.subr.bf16.mxu1 %v4390_v31  ;;  %v2080_v31 = vld [vmem:[%s4236_s10 + $0x8] sm:$0xff] }
 0x5af   : > { %2293 = vmatmul.mubr.msk.bf16.vlgmr.msra.gmra.mxu0 %vm1984_vm9, %v2342_v38 }
 0x5b1   : > { %2046 = vmatpush1.bf16.msra.mxu1 %v4391_v32 }
 0x5b4   : > { %2294 = vmatmul.mubr.msk.bf16.vlgmr.msra.gmra.mxu1 %vm1984_vm9, %v2342_v38 }
 0x66f   : > { %v2022_v60 = vpop.f32.mrf.mxu0 }
 0x670   : > { %v4148_v11 = vadd.f32 %v2022_v60, %v1973_v41 }
 0x671   : > { %v2024_v61 = vpop.f32.mrf.mxu0 }
 0x672   : > { %v4150_v34 = vadd.f32 %v2024_v61, %v1973_v41 }
 0x673   : > { %v2026_v55 = vpop.f32.mrf.mxu0 }
 0x674   : > { %v2081_v48 = vadd.f32 %v4150_v34, %v4148_v11  ;;  %v2065_v10 = vpop.f32.mrf.mxu1  ;;  %v4154_v3 = vadd.f32 %v2026_v55, %v1977_v0 }
 0x675   : > { %v2028_v5 = vpop.f32.mrf.mxu0  ;;  %v4158_v36 = vadd.f32 %v2065_v10, %v1973_v41 }
 0x676   : > { %v4156_v39 = vadd.f32 %v2028_v5, %v1977_v0  ;;  %v2067_v44 = vpop.f32.mrf.mxu1  ;;  %2082 = vadd.xlane.f32.xlu1 %v2081_v48 }
 0x677   : > { %v4160_v26 = vadd.f32 %v2067_v44, %v1973_v41 }
 0x678   : > { %v2084_v14 = vadd.f32 %v4156_v39, %v4154_v3  ;;  %v2069_v22 = vpop.f32.mrf.mxu1 }
 0x679   : > { %v2143_v43 = vadd.f32 %v4160_v26, %v4158_v36  ;;  %v4166_v13 = vadd.f32 %v2069_v22, %v1977_v0 }
 0x67a   : > { %v2071_v21 = vpop.f32.mrf.mxu1  ;;  %2085 = vadd.xlane.f32.xlu0 %v2084_v14 }
 0x67b   : > { %v4168_v1 = vadd.f32 %v2071_v21, %v1977_v0  ;;  %2144 = vadd.xlane.f32.xlu1 %v2143_v43 }
 0x67d   : > { %v2146_v47 = vadd.f32 %v4168_v1, %v4166_v13 }
 0x67f   : > { %2147 = vadd.xlane.f32.xlu0 %v2146_v47 }
 0x6ff   : > { %v2083_v4 = vpop.xlane.xlu1 %2082 }
 0x700   : > { %v2087_v23 = vmul.f32 0.00390625, %v2083_v4 }
 0x702   : > { %v2089_v19 = vmul.f32 %v2087_v23, %v2074_v57 }
 0x703   : > { %v2086_v52 = vpop.xlane.xlu0 %2085 }
 0x704   : > { %v2088_v9 = vmul.f32 0.00390625, %v2086_v52  ;;  %v2145_v17 = vpop.xlane.xlu1 %2144  ;;  %v2092_v25 = vsel %vm2091_vm10, %v2089_v19, 0.0 }
 0x705   : > { %v2149_v12 = vmul.f32 0.00390625, %v2145_v17 }
 0x706   : > { %v2090_v24 = vmul.f32 %v2088_v9, %v2075_v50 }
 0x707   : > { %v2151_v28 = vmul.f32 %v2149_v12, %v2074_v57 }
 0x708   : > { %v2093_v33 = vsel %vm2091_vm10, %v2090_v24, 0.0  ;;  %v2148_v37 = vpop.xlane.xlu0 %2147 }
 0x709   : > { %v2094_v27 = vadd.f32 %v2093_v33, %v2092_v25  ;;  %v2150_v58 = vmul.f32 0.00390625, %v2148_v37  ;;  %v2153_v40 = vsel %vm2091_vm10, %v2151_v28, 0.0 }
 0x70b   : > { %v2095_v53 = vrot.slane %v2094_v27, 4  ;;  %v2152_v45 = vmul.f32 %v2150_v58, %v2075_v50 }
 0x70d   : > { %v2096_v29 = vadd.f32 %v2095_v53, %v2094_v27  ;;  %v2154_v20 = vsel %vm2091_vm10, %v2152_v45, 0.0 }
 0x70e   : > { %v2155_v6 = vadd.f32 %v2154_v20, %v2153_v40  ;;  %v2415_v20 = vld [vmem:[%s2520_s23 + $0x20] sm:$0xff] }
 0x70f   : > { %v2097_v15 = vrot.slane %v2096_v29, 2 }
 0x710   : > { %v2156_v35 = vrot.slane %v2155_v6, 4 }
 0x711   : > { %v2098_v7 = vadd.f32 %v2097_v15, %v2096_v29  ;;  %v2413_v29 = vld [vmem:[%s2520_s23] sm:$0xff]  ;;  %v2416_v15 = vld [vmem:[%s2520_s23 + $0x28] sm:$0xff] }
 0x712   : > { %v2157_v49 = vadd.f32 %v2156_v35, %v2155_v6 }
 0x713   : > { %v2099_v59 = vrot.slane %v2098_v7, 1 }
 0x714   : > { %v2158_v54 = vrot.slane %v2157_v49, 2 }
 0x715   : > { %v2100_v2 = vadd.f32 %v2099_v59, %v2098_v7 }
 0x716   : > { %v2159_v62 = vadd.f32 %v2158_v54, %v2157_v49  ;;  %v2417_v49 = vld [vmem:[%s2520_s23 + $0x10] sm:$0xff] }
 0x717   : > { %v2101_v63 = vadd.f32 %v2100_v2, %v2076_v16 }
 0x718   : > { %v2160_v30 = vrot.slane %v2159_v62, 1 }
 0x719   : > { %v2102_v42 = vmax.f32 %v2101_v63, 0.0 }
 0x71a   : > { %v2161_v18 = vadd.f32 %v2160_v30, %v2159_v62  ;;  %v2419_v30 = vld [vmem:[%s2520_s23 + $0x30] sm:$0xff] }
 0x71b   : > { %v2106_v38 = vrot.slane %v2102_v42, %v4392_v56 }
 0x71c   : > { %v2162_v32 = vadd.f32 %v2161_v18, %v2076_v16  ;;  %v2418_v16 = vld [vmem:[%s2520_s23 + $0x18] sm:$0xff] }
 0x71d   : > { %v2107_v41 = vmul.f32 %v2106_v38, %v2077_v46  ;;  %v2108_v60 = vmul.f32 %v2106_v38, %v2078_v51 }
 0x71e   : > { %v2163_v61 = vmax.f32 %v2162_v32, 0.0 }
 0x71f   : > { %v2111_v0 = vadd.f32 %v2107_v41, %v2079_v8  ;;  %v2112_v55 = vadd.f32 %v2108_v60, %v2080_v31 }
 0x720   : > { %v2167_v48 = vrot.slane %v2163_v61, %v4392_v56 }
 0x721   : > { %v2295_v10 = vmul.f32 -1.442695, %v2111_v0  ;;  %v2296_v5 = vmul.f32 -1.442695, %v2112_v55 }
 0x722   : > { %v2168_v44 = vmul.f32 %v2167_v48, %v2077_v46  ;;  %v2169_v14 = vmul.f32 %v2167_v48, %v2078_v51  ;;  %v2420_v46 = vld [vmem:[%s2520_s23 + $0x38] sm:$0xff] }
 0x723   : > { %2391 = vpow2.f32 %v2295_v10 }
 0x724   : > { %2393 = vpow2.f32 %v2296_v5  ;;  %v2172_v22 = vadd.f32 %v2168_v44, %v2079_v8  ;;  %v2173_v43 = vadd.f32 %v2169_v14, %v2080_v31 }
 0x726   : > { %v2297_v21 = vmul.f32 -1.442695, %v2172_v22  ;;  %v2298_v47 = vmul.f32 -1.442695, %v2173_v43 }
 0x728   : > { %2395 = vpow2.f32 %v2297_v21 }
 0x729   : > { %2397 = vpow2.f32 %v2298_v47 }
 0x730   : > { %v2392_v4 = vpop.eup %2391 }
 0x731   : > { %v2394_v23 = vpop.eup %2393  ;;  %v2119_v57 = vadd.f32 1.0, %v2392_v4 }
 0x732   : > { %v2120_v50 = vadd.f32 1.0, %v2394_v23 }
 0x733   : > { %2399 = vrcp.f32 %v2119_v57 }
 0x734   : > { %2401 = vrcp.f32 %v2120_v50 }
 0x735   : > { %v2396_v52 = vpop.eup %2395 }
 0x736   : > { %v2398_v19 = vpop.eup %2397  ;;  %v2180_v9 = vadd.f32 1.0, %v2396_v52 }
 0x737   : > { %v2181_v17 = vadd.f32 1.0, %v2398_v19 }
 0x738   : > { %2403 = vrcp.f32 %v2180_v9 }
 0x739   : > { %2405 = vrcp.f32 %v2181_v17 }
 0x740   : > { %v2400_v12 = vpop.eup %2399 }
 0x741   : > { %v2402_v24 = vpop.eup %2401  ;;  %2127 = vperm.xlu1 %2331, %v2400_v12  }
 0x742   : > { %2132 = vperm.xlu0 %2332, %v2402_v24  }
 0x745   : > { %v2404_v25 = vpop.eup %2403 }
 0x746   : > { %2188 = vperm.xlu1 %2331, %v2404_v25   ;;  %v2406_v33 = vpop.eup %2405 }
 0x74a   : > { %2193 = vperm.xlu1 %2331, %v2406_v33  }
 0x7bc   : > { %v2128_v37 = vpop.permute.xlu1 %2127 }
 0x7bd   : > { %v2133_v27 = vpop.permute.xlu0 %2132  ;;  %v2135_v28 = vmul.f32 %v2128_v37, %v4148_v11  ;;  %v2136_v58 = vmul.f32 %v2128_v37, %v4150_v34  ;;  %v2414_v11 = vld [vmem:[%s2520_s23 + $0x8] sm:$0xff] }
 0x7be   : > { %v2137_v53 = vmul.f32 %v2133_v27, %v4154_v3  ;;  %v2138_v45 = vmul.f32 %v2133_v27, %v4156_v39 }
 0x7bf   : > { %v2139_v40 = vadd.f32 %v2413_v29, %v2135_v28  ;;  %v2140_v34 = vadd.f32 %v2414_v11, %v2136_v58 }
 0x7c0   : > { %v2141_v6 = vadd.f32 %v2415_v20, %v2137_v53  ;;  %v2142_v35 = vadd.f32 %v2416_v15, %v2138_v45 }
 0x7c1   : > { %2204 = vst [vmem:[%s4199_s24] sm:$0xff] %v2139_v40  ;;  %2205 = vst [vmem:[%s4199_s24 + $0x8] sm:$0xff] %v2140_v34  ;;  %v2189_v7 = vpop.permute.xlu1 %2188 }
 0x7c2   : > { %2208 = vst [vmem:[%s4199_s24 + $0x20] sm:$0xff] %v2141_v6  ;;  %2209 = vst [vmem:[%s4199_s24 + $0x28] sm:$0xff] %v2142_v35  ;;  %v2196_v3 = vmul.f32 %v2189_v7, %v4158_v36  ;;  %v2197_v39 = vmul.f32 %v2189_v7, %v4160_v26 }
 0x7c4   : > { %v2200_v59 = vadd.f32 %v2417_v49, %v2196_v3  ;;  %v2201_v54 = vadd.f32 %v2418_v16, %v2197_v39 }
 0x7c5   : > { %v2194_v2 = vpop.permute.xlu1 %2193 }
 0x7c6   : > { %2206 = vst [vmem:[%s4199_s24 + $0x10] sm:$0xff] %v2200_v59  ;;  %2207 = vst [vmem:[%s4199_s24 + $0x18] sm:$0xff] %v2201_v54  ;;  %v2198_v62 = vmul.f32 %v2194_v2, %v4166_v13  ;;  %v2199_v63 = vmul.f32 %v2194_v2, %v4168_v1 }
 0x7c8   : > { %v2202_v42 = vadd.f32 %v2419_v30, %v2198_v62  ;;  %v2203_v51 = vadd.f32 %v2420_v46, %v2199_v63 }
 0x7ca   : > { %2210 = vst [vmem:[%s4199_s24 + $0x30] sm:$0xff] %v2202_v42  ;;  %2211 = vst [vmem:[%s4199_s24 + $0x38] sm:$0xff] %v2203_v51 }
 0x7cb PF: > { %s23_s19 = sadd.s32 1, %s2427_s19  }
 0x7cc   : > { %p20_p4 = scmp.ge.s32.totalorder %s23_s19, 4  }
 0x7ce   :  { %22 = sbr.rel (!%p20_p4) target bundleno = 3 (0x3), region = 94 }

</bundles_post_ra>
